<compile_context>
chip_gen: v7x
topology: tpu7x:2x2x1
jax: 0.10.0
libtpu: 0.0.40
codegen_flags: <defaults>
</compile_context>

<pallas_src>
import functools
import math

import jax
import jax.numpy as jnp
from jax import lax
from jax.experimental import pallas as pl
from jax.experimental.pallas import tpu as pltpu

# 48 MiB: safe headroom on v7x (64 MiB physical), granted on v5e/v6e.
VMEM_LIMIT = 48 * 1024 * 1024


# ----------------------------- tiling helpers ------------------------------

def _pick_tk(K, preferred=2048):
    """Largest multiple of 128 that divides K and is <= preferred, else full K.

    preferred=2048 keeps K = H (768/1024/1280/2048) as a single K tile so the
    fused pre-LayerNorm path is actually used at GPT-2 widths."""
    if K <= preferred or K % 128 != 0:
        return K
    t = (preferred // 128) * 128
    while t >= 128:
        if K % t == 0:
            return t
        t -= 128
    return K


def _pick_row_tile(dim, preferred=256):
    return preferred if dim >= preferred else dim


def _pick_div_tile(dim, preferred=256):
    """Largest multiple of 128 <= preferred that divides dim, else full dim."""
    if dim <= preferred:
        return dim
    t = (preferred // 128) * 128
    while t >= 128:
        if dim % t == 0:
            return t
        t -= 128
    return dim


# ----------------------------- layernorm kernel ----------------------------

def _layernorm_kernel(x_ref, g_ref, b_ref, o_ref, *, eps):
    x = x_ref[...].astype(jnp.float32)
    mean = jnp.mean(x, axis=-1, keepdims=True)
    var = jnp.mean(jnp.square(x - mean), axis=-1, keepdims=True)
    xn = (x - mean) * lax.rsqrt(var + eps)
    o_ref[...] = (xn * g_ref[...] + b_ref[...]).astype(o_ref.dtype)


def pallas_layernorm(x, g, b, eps=1e-5):
    """Standalone layernorm; only used when LN cannot be fused into a matmul."""
    M, H = x.shape
    tm = _pick_row_tile(M)
    return pl.pallas_call(
        functools.partial(_layernorm_kernel, eps=eps),
        out_shape=jax.ShapeDtypeStruct((M, H), jnp.float32),
        grid=(pl.cdiv(M, tm),),
        in_specs=[
            pl.BlockSpec((tm, H), lambda i: (i, 0)),
            pl.BlockSpec((1, H), lambda i: (0, 0)),
            pl.BlockSpec((1, H), lambda i: (0, 0)),
        ],
        out_specs=pl.BlockSpec((tm, H), lambda i: (i, 0)),
        compiler_params=pltpu.CompilerParams(
            dimension_semantics=("parallel",), vmem_limit_bytes=VMEM_LIMIT),
    )(x, g.reshape(1, H).astype(jnp.float32), b.reshape(1, H).astype(jnp.float32))


# ------------------ fused (LN) + matmul + bias (+relu/residual) -------------

def pallas_matmul(x, w, b=None, *, activation=None, residual=None, ln=None,
                  ln_eps=1e-5, out_dtype=jnp.float32, tm=None, tn=None):
    """(M,K) @ (K,N) + b with M/N/K tiling, f32 accumulator, bf16 MXU operands.

    Optional fusions: pre-LayerNorm on x (when K fits a single tile; the LN'd
    tile is cached in VMEM scratch and reused for all N tiles), ReLU, residual
    add (out = x@w + b [relu] + residual)."""
    M, K = x.shape
    Kw, N = w.shape
    assert K == Kw

    tk = _pick_tk(K)
    assert K % tk == 0, "K tile must divide K exactly"
    n_k = K // tk
    fuse_ln = (ln is not None) and (n_k == 1)
    if (ln is not None) and not fuse_ln:
        # K is tiled -> fall back to a separate layernorm pass.
        x = pallas_layernorm(x, ln[0], ln[1], eps=ln_eps)

    tm = _pick_row_tile(M, tm if tm is not None else 256)
    tn = _pick_row_tile(N, tn if tn is not None else 256)
    gm = pl.cdiv(M, tm)
    gn = pl.cdiv(N, tn)

    has_bias = b is not None
    has_res = residual is not None

    in_specs = [
        pl.BlockSpec((tm, tk), lambda i, j, k: (i, k)),
        pl.BlockSpec((tk, tn), lambda i, j, k: (k, j)),
    ]
    args = [x, w]
    if has_bias:
        in_specs.append(pl.BlockSpec((1, tn), lambda i, j, k: (0, j)))
        args.append(b.reshape(1, N).astype(jnp.float32))
    if fuse_ln:
        in_specs += [pl.BlockSpec((1, K), lambda i, j, k: (0, 0)),
                     pl.BlockSpec((1, K), lambda i, j, k: (0, 0))]
        args += [ln[0].reshape(1, K).astype(jnp.float32),
                 ln[1].reshape(1, K).astype(jnp.float32)]
    if has_res:
        in_specs.append(pl.BlockSpec((tm, tn), lambda i, j, k: (i, j)))
        args.append(residual)

    scratch = [pltpu.VMEM((tm, tn), jnp.float32)]
    if fuse_ln:
        scratch.append(pltpu.VMEM((tm, K), jnp.bfloat16))   # cached LN'd x tile

    def kernel(*refs):
        pos = 0
        x_ref = refs[pos]; pos += 1
        w_ref = refs[pos]; pos += 1
        b_ref = None
        if has_bias:
            b_ref = refs[pos]; pos += 1
        if fuse_ln:
            g_ref, beta_ref = refs[pos], refs[pos + 1]; pos += 2
        if has_res:
            res_ref = refs[pos]; pos += 1
        o_ref = refs[pos]; pos += 1
        acc_ref = refs[pos]; pos += 1
        if fuse_ln:
            xn_ref = refs[pos]; pos += 1

        jidx = pl.program_id(1)
        kidx = pl.program_id(2)

        if fuse_ln:
            # Normalize the row tile once per i (at j == 0) and reuse the
            # cached bf16 result for every output-column tile j > 0.
            @pl.when(jidx == 0)
            def _():
                xv = x_ref[...].astype(jnp.float32)
                mu = jnp.mean(xv, axis=-1, keepdims=True)
                var = jnp.mean(jnp.square(xv - mu), axis=-1, keepdims=True)
                xv = (xv - mu) * lax.rsqrt(var + ln_eps)
                xn_ref[...] = (xv * g_ref[...] + beta_ref[...]).astype(jnp.bfloat16)
            xb = xn_ref[...]
        else:
            xb = x_ref[...].astype(jnp.bfloat16)

        @pl.when(kidx == 0)
        def _():
            acc_ref[...] = jnp.zeros_like(acc_ref)

        acc_ref[...] += jnp.dot(xb, w_ref[...].astype(jnp.bfloat16),
                                preferred_element_type=jnp.float32)

        @pl.when(kidx == pl.num_programs(2) - 1)
        def _():
            out = acc_ref[...]
            if has_bias:
                out = out + b_ref[...]
            if activation == "relu":
                out = jnp.maximum(out, 0.0)
            if has_res:
                out = out + res_ref[...].astype(jnp.float32)
            o_ref[...] = out.astype(o_ref.dtype)

    # When LN is cached in scratch, the j axis must not be sharded across
    # cores (j == 0 initializes the scratch), so mark it arbitrary.
    sem_j = "arbitrary" if fuse_ln else "parallel"
    return pl.pallas_call(
        kernel,
        out_shape=jax.ShapeDtypeStruct((M, N), out_dtype),
        grid=(gm, gn, n_k),
        in_specs=in_specs,
        out_specs=pl.BlockSpec((tm, tn), lambda i, j, k: (i, j)),
        scratch_shapes=scratch,
        compiler_params=pltpu.CompilerParams(
            dimension_semantics=("parallel", sem_j, "arbitrary"),
            vmem_limit_bytes=VMEM_LIMIT),
    )(*args)


# ----------------------------- attention kernels ----------------------------

def _attend_heads(q, k, v, bias, o_ref, *, nheads):
    """Per-head softmax(q k^T + bias) v; each head's result is written directly
    into its lane slice of o_ref (no concat epilogue). Scale is already folded
    into q by the caller."""
    H = q.shape[1]
    dh = H // nheads
    for h in range(nheads):
        sl = slice(h * dh, (h + 1) * dh)
        s = lax.dot_general(q[:, sl], k[:, sl], (((1,), (1,)), ((), ())),
                            preferred_element_type=jnp.float32)
        s = s + bias
        s = s - jnp.max(s, axis=-1, keepdims=True)
        p = jnp.exp(s)
        p = p * (1.0 / jnp.sum(p, axis=-1, keepdims=True))
        o = jnp.dot(p.astype(jnp.bfloat16), v[:, sl],
                    preferred_element_type=jnp.float32)
        o_ref[0, :, sl] = o.astype(o_ref.dtype)


def _self_attn_kernel(qrows_ref, kv_ref, o_ref, *, nheads, scale, tq):
    H = o_ref.shape[2]
    T = kv_ref.shape[1]
    qi = pl.program_id(1)
    # Softmax scale folded into q once (one (tq,H) multiply, not per head).
    q = (qrows_ref[0, :, :H].astype(jnp.float32) * scale).astype(jnp.bfloat16)
    k = kv_ref[0, :, H:2 * H]
    v = kv_ref[0, :, 2 * H:]
    row = qi * tq + lax.broadcasted_iota(jnp.int32, (tq, T), 0)
    col = lax.broadcasted_iota(jnp.int32, (tq, T), 1)
    bias = jnp.where(col <= row, 0.0, -1e9)           # causal mask, in-kernel
    _attend_heads(q, k, v, bias, o_ref, nheads=nheads)


def pallas_self_attention(qkv, nheads, scale):
    """qkv: (B, T, 3H) packed projections -> (B, T, H) attention output.

    Grid is (B, T // tq): scores are (tq, T) not (T, T), and the second
    parallel axis keeps both v7x TensorCores busy at small B. The packed K/V
    block's index is constant in qi, so it is only DMA'd once per batch elem."""
    B, T, H3 = qkv.shape
    H = H3 // 3
    tq = _pick_div_tile(T, 256)
    n_tq = T // tq
    return pl.pallas_call(
        functools.partial(_self_attn_kernel, nheads=nheads, scale=scale, tq=tq),
        out_shape=jax.ShapeDtypeStruct((B, T, H), jnp.bfloat16),
        grid=(B, n_tq),
        in_specs=[
            pl.BlockSpec((1, tq, H3), lambda b, qi: (b, qi, 0)),   # q rows
            pl.BlockSpec((1, T, H3), lambda b, qi: (b, 0, 0)),     # k/v (full seq)
        ],
        out_specs=pl.BlockSpec((1, tq, H), lambda b, qi: (b, qi, 0)),
        compiler_params=pltpu.CompilerParams(
            dimension_semantics=("parallel", "parallel"),
            vmem_limit_bytes=VMEM_LIMIT),
    )(qkv, qkv)


def _cross_attn_kernel(q_ref, kv_ref, m_ref, o_ref, *, nheads, scale):
    H = o_ref.shape[2]
    q = (q_ref[0].astype(jnp.float32) * scale).astype(jnp.bfloat16)   # (tq, H)
    k = kv_ref[0, :, :H]
    v = kv_ref[0, :, H:]
    pad = m_ref[0]                                     # (1, S) int32, 1 == pad
    bias = jnp.where(pad > 0, -1e9, 0.0)               # (1, S), in-kernel
    _attend_heads(q, k, v, bias, o_ref, nheads=nheads)


def pallas_cross_attention(q, kv, pad_mask, nheads, scale):
    """q: (B,T,H), kv: (B,S,2H) packed, pad_mask: (B,S) bool (True == pad)."""
    B, T, H = q.shape
    S = kv.shape[1]
    tq = _pick_div_tile(T, 256)
    n_tq = T // tq
    mask_i32 = pad_mask.astype(jnp.int32).reshape(B, 1, S)
    return pl.pallas_call(
        functools.partial(_cross_attn_kernel, nheads=nheads, scale=scale),
        out_shape=jax.ShapeDtypeStruct((B, T, H), jnp.bfloat16),
        grid=(B, n_tq),
        in_specs=[
            pl.BlockSpec((1, tq, H), lambda b, qi: (b, qi, 0)),
            pl.BlockSpec((1, S, 2 * H), lambda b, qi: (b, 0, 0)),
            pl.BlockSpec((1, 1, S), lambda b, qi: (b, 0, 0)),
        ],
        out_specs=pl.BlockSpec((1, tq, H), lambda b, qi: (b, qi, 0)),
        compiler_params=pltpu.CompilerParams(
            dimension_semantics=("parallel", "parallel"),
            vmem_limit_bytes=VMEM_LIMIT),
    )(q, kv, mask_i32)


# ----------------------------- parameters ---------------------------------

def init_params(key, vocab, H, nheads, ffn, nlayers):
    def nrm(k, shape, std=0.02):
        return (std * jax.random.normal(k, shape, dtype=jnp.float32)).astype(jnp.bfloat16)

    keys = iter(jax.random.split(key, 2 + nlayers * 8))
    embed_f32 = 0.02 * jax.random.normal(next(keys), (vocab, H), dtype=jnp.float32)
    params = {
        "embed": embed_f32.astype(jnp.bfloat16),
        "embed_t": embed_f32.T.astype(jnp.bfloat16),   # hoisted transpose (shared out proj)
        "ln_f_g": jnp.ones((H,), jnp.float32),
        "ln_f_b": jnp.zeros((H,), jnp.float32),
        "layers": [],
    }
    for _ in range(nlayers):
        lyr = {
            "ln1_g": jnp.ones((H,), jnp.float32), "ln1_b": jnp.zeros((H,), jnp.float32),
            "w_qkv": nrm(next(keys), (H, 3 * H)), "b_qkv": jnp.zeros((3 * H,), jnp.float32),
            "wo": nrm(next(keys), (H, H)), "bo": jnp.zeros((H,), jnp.float32),
            "ln2_g": jnp.ones((H,), jnp.float32), "ln2_b": jnp.zeros((H,), jnp.float32),
            "cwq": nrm(next(keys), (H, H)), "cbq": jnp.zeros((H,), jnp.float32),
            "w_ckv": nrm(next(keys), (H, 2 * H)), "b_ckv": jnp.zeros((2 * H,), jnp.float32),
            "cwo": nrm(next(keys), (H, H)), "cbo": jnp.zeros((H,), jnp.float32),
            "ln3_g": jnp.ones((H,), jnp.float32), "ln3_b": jnp.zeros((H,), jnp.float32),
            "w1": nrm(next(keys), (H, ffn)), "b1": jnp.zeros((ffn,), jnp.float32),
            "w2": nrm(next(keys), (ffn, H)), "b2": jnp.zeros((H,), jnp.float32),
        }
        params["layers"].append(lyr)
    return params


def _sinusoidal_pos(T, H):
    half = H // 2
    freqs = jnp.exp(jnp.arange(half, dtype=jnp.float32)
                    * (-math.log(10000.0) / max(half - 1, 1)))
    ang = jnp.arange(T, dtype=jnp.float32)[:, None] * freqs[None, :]
    return jnp.concatenate([jnp.sin(ang), jnp.cos(ang)], axis=-1)  # (T, H)


# ----------------------------- forward pass --------------------------------

def clgpt2_forward(params, trg_tokens, encoder_out, encoder_padding_mask,
                   return_accu=True, sep_id=3, nheads=4):
    B, T = trg_tokens.shape
    S, _, H = encoder_out.shape
    dh = H // nheads
    scale = 1.0 / math.sqrt(dh)
    V = params["embed"].shape[0]

    # embedding: scaled token embedding + sinusoidal positions
    x = params["embed"][trg_tokens].astype(jnp.float32) * math.sqrt(H)   # (B, T, H)
    x = x + _sinusoidal_pos(T, H)[None, :, :]
    # TODO(synk): embedding / hidden dropout omitted (inference, ratio treated as 0).

    mem = jnp.transpose(encoder_out, (1, 0, 2))              # (B, S, H)

    # bf16 activation / residual stream between kernels; all LN / accumulate /
    # residual math stays f32 inside the kernels.
    x2 = x.reshape(B * T, H).astype(jnp.bfloat16)
    mem2 = mem.reshape(B * S, H).astype(jnp.bfloat16)

    for lyr in params["layers"]:
        # masked self-attention (pre-LN fused into the packed QKV projection)
        qkv = pallas_matmul(x2, lyr["w_qkv"], lyr["b_qkv"],
                            ln=(lyr["ln1_g"], lyr["ln1_b"]),
                            out_dtype=jnp.bfloat16).reshape(B, T, 3 * H)
        a = pallas_self_attention(qkv, nheads, scale)                    # (B,T,H) bf16
        x2 = pallas_matmul(a.reshape(B * T, H), lyr["wo"], lyr["bo"],
                           residual=x2, out_dtype=jnp.bfloat16)           # fused residual

        # cross-attention over encoder output (pre-LN fused into q projection)
        q = pallas_matmul(x2, lyr["cwq"], lyr["cbq"],
                          ln=(lyr["ln2_g"], lyr["ln2_b"]),
                          out_dtype=jnp.bfloat16).reshape(B, T, H)
        kv = pallas_matmul(mem2, lyr["w_ckv"], lyr["b_ckv"],
                           out_dtype=jnp.bfloat16).reshape(B, S, 2 * H)
        a = pallas_cross_attention(q, kv, encoder_padding_mask, nheads, scale)
        x2 = pallas_matmul(a.reshape(B * T, H), lyr["cwo"], lyr["cbo"],
                           residual=x2, out_dtype=jnp.bfloat16)           # fused residual

        # feed-forward (pre-LN + ReLU fused into the up-projection)
        h = pallas_matmul(x2, lyr["w1"], lyr["b1"],
                          ln=(lyr["ln3_g"], lyr["ln3_b"]),
                          activation="relu", out_dtype=jnp.bfloat16)
        x2 = pallas_matmul(h, lyr["w2"], lyr["b2"],
                           residual=x2, out_dtype=jnp.bfloat16)           # fused residual

    # final LN fused into the shared-embedding output projection; large row
    # tile (tm=512) to minimize re-streaming of the (H, V) weight; no bias.
    logits = pallas_matmul(x2, params["embed_t"], None,
                           ln=(params["ln_f_g"], params["ln_f_b"]),
                           out_dtype=jnp.float32, tm=512)
    decoder_out = logits.reshape(B, T, V)

    accu = jnp.float32(-1.0)
    if return_accu:
        output_label = jnp.argmax(decoder_out, axis=-1).reshape(B, -1)
        mask = jnp.cumsum((output_label == sep_id).astype(jnp.int32), axis=1)
        predict_tokens = jnp.where(mask > 0, 0, output_label)
        temp = predict_tokens[:, :-1]
        temp2 = trg_tokens[:, 1:].astype(predict_tokens.dtype)
        mask2 = jnp.cumsum((temp2 == sep_id).astype(jnp.int32), axis=1)
        temp2 = jnp.where(mask2 > 0, 0, temp2)
        result = temp == temp2
        accu = jnp.all(result, axis=1).astype(jnp.float32).mean()
    return accu, decoder_out


# TODO(synk): tokenizer-based convertToken()/predict() (BertTokenizer encode/decode
# and the host-side autoregressive loop) have no Pallas equivalent and are omitted.


if __name__ == "__main__":
    B, T, S, H, NH, FFN, NL, V = 2, 8, 8, 32, 4, 64, 2, 64
    key = jax.random.PRNGKey(0)
    kp, kt, ke = jax.random.split(key, 3)

    params = init_params(kp, V, H, NH, FFN, NL)
    trg_tokens = jax.random.randint(kt, (B, T), 0, V, dtype=jnp.int32)
    encoder_out = jax.random.normal(ke, (S, B, H), dtype=jnp.float32)
    valid_lengths = jnp.array([S, S - 2])
    encoder_padding_mask = jnp.arange(S)[None, :] >= valid_lengths[:, None]  # True=pad

    fwd = jax.jit(functools.partial(clgpt2_forward, return_accu=True,
                                    sep_id=3, nheads=NH))
    accu, decoder_out = fwd(params, trg_tokens, encoder_out, encoder_padding_mask)
    jax.block_until_ready((accu, decoder_out))

    assert decoder_out.shape == (B, T, V)
    assert decoder_out.dtype == jnp.float32
    assert accu.shape == ()
    assert bool(jnp.isfinite(decoder_out).all())
    print("KERNEL_OK")
</pallas_src>

<mosaic_0001>
module attributes {stable_mosaic.version = 11 : i64} {
  func.func @kernel(%arg0: i32, %arg1: i32, %arg2: i32, %arg3: memref<16x32xbf16, #tpu.memory_space<vmem>>, %arg4: memref<32x32xbf16, #tpu.memory_space<vmem>>, %arg5: memref<1x32xf32, #tpu.memory_space<vmem>>, %arg6: memref<16x32xbf16, #tpu.memory_space<vmem>>, %arg7: memref<16x32xbf16, #tpu.memory_space<vmem>>, %arg8: memref<16x32xf32, #tpu.memory_space<vmem>>) attributes {dimension_semantics = [#tpu.dimension_semantics<parallel>, #tpu.dimension_semantics<parallel>, #tpu.dimension_semantics<arbitrary>], iteration_bounds = array<i64: 1, 1, 1>, scalar_prefetch = 0 : i64, scratch_operands = 1 : i64, tpu.core_type = #tpu.core_type<tc>, window_params = [{transform_indices = @transform_0, window_bounds = array<i64: 16, 32>}, {transform_indices = @transform_1, window_bounds = array<i64: 32, 32>}, {transform_indices = @transform_2, window_bounds = array<i64: 1, 32>}, {transform_indices = @transform_3, window_bounds = array<i64: 16, 32>}, {transform_indices = @transform_4, window_bounds = array<i64: 16, 32>}]} {
    %c0 = arith.constant 0 : index
    %c0_0 = arith.constant 0 : index
    %0 = vector.load %arg3[%c0, %c0_0] : memref<16x32xbf16, #tpu.memory_space<vmem>>, vector<16x32xbf16>
    %c0_i32 = arith.constant 0 : i32
    %1 = arith.cmpi eq, %arg2, %c0_i32 : i32
    %2 = arith.extui %1 : i1 to i32
    %c0_i32_1 = arith.constant 0 : i32
    %3 = arith.cmpi ne, %2, %c0_i32_1 : i32
    scf.if %3 {
      %cst_10 = arith.constant 0.000000e+00 : f32
      %12 = vector.broadcast %cst_10 : f32 to vector<16x32xf32>
      %c0_11 = arith.constant 0 : index
      %c0_12 = arith.constant 0 : index
      %13 = vector.load %arg8[%c0_11, %c0_12] : memref<16x32xf32, #tpu.memory_space<vmem>>, vector<16x32xf32>
      tpu.vector_store %arg8[%c0_11, %c0_12], %12 {strides = array<i32>} : memref<16x32xf32, #tpu.memory_space<vmem>>, vector<16x32xf32>,
    } else {
    }
    %c0_2 = arith.constant 0 : index
    %c0_3 = arith.constant 0 : index
    %4 = vector.load %arg8[%c0_2, %c0_3] : memref<16x32xf32, #tpu.memory_space<vmem>>, vector<16x32xf32>
    %c0_4 = arith.constant 0 : index
    %c0_5 = arith.constant 0 : index
    %5 = vector.load %arg4[%c0_4, %c0_5] : memref<32x32xbf16, #tpu.memory_space<vmem>>, vector<32x32xbf16>
    %cst = arith.constant dense<0.000000e+00> : vector<16x32xf32>
    %6 = tpu.matmul %0, %5, %cst {dimension_numbers = #tpu.dot_dimension_numbers<[1], [0], [0], [1], [0, 0, 1, 1], [], []>} : vector<16x32xbf16>, vector<32x32xbf16>, vector<16x32xf32> -> vector<16x32xf32>
    %7 = arith.addf %4, %6 : vector<16x32xf32>
    %c0_6 = arith.constant 0 : index
    %c0_7 = arith.constant 0 : index
    %8 = vector.load %arg8[%c0_6, %c0_7] : memref<16x32xf32, #tpu.memory_space<vmem>>, vector<16x32xf32>
    tpu.vector_store %arg8[%c0_6, %c0_7], %7 {strides = array<i32>} : memref<16x32xf32, #tpu.memory_space<vmem>>, vector<16x32xf32>,
    %c0_i32_8 = arith.constant 0 : i32
    %9 = arith.cmpi eq, %arg2, %c0_i32_8 : i32
    %10 = arith.extui %9 : i1 to i32
    %c0_i32_9 = arith.constant 0 : i32
    %11 = arith.cmpi ne, %10, %c0_i32_9 : i32
    scf.if %11 {
      %c0_10 = arith.constant 0 : index
      %c0_11 = arith.constant 0 : index
      %12 = vector.load %arg8[%c0_10, %c0_11] : memref<16x32xf32, #tpu.memory_space<vmem>>, vector<16x32xf32>
      %c0_12 = arith.constant 0 : index
      %c0_13 = arith.constant 0 : index
      %13 = vector.load %arg5[%c0_12, %c0_13] : memref<1x32xf32, #tpu.memory_space<vmem>>, vector<1x32xf32>
      %14 = vector.broadcast %13 : vector<1x32xf32> to vector<16x32xf32>
      %15 = arith.addf %12, %14 : vector<16x32xf32>
      %c0_14 = arith.constant 0 : index
      %c0_15 = arith.constant 0 : index
      %16 = vector.load %arg6[%c0_14, %c0_15] : memref<16x32xbf16, #tpu.memory_space<vmem>>, vector<16x32xbf16>
      %17 = arith.extf %16 : vector<16x32xbf16> to vector<16x32xf32>
      %18 = arith.addf %15, %17 : vector<16x32xf32>
      %19 = arith.truncf %18 : vector<16x32xf32> to vector<16x32xbf16>
      %c0_16 = arith.constant 0 : index
      %c0_17 = arith.constant 0 : index
      %20 = vector.load %arg7[%c0_16, %c0_17] : memref<16x32xbf16, #tpu.memory_space<vmem>>, vector<16x32xbf16>
      tpu.vector_store %arg7[%c0_16, %c0_17], %19 {strides = array<i32>} : memref<16x32xbf16, #tpu.memory_space<vmem>>, vector<16x32xbf16>,
    } else {
    }
    return
  }
  func.func @transform_0(%arg0: i32, %arg1: i32, %arg2: i32) -> (i32, i32) {
    %c0_i32 = arith.constant 0 : i32
    return %arg0, %arg2 : i32, i32
  }
  func.func @transform_1(%arg0: i32, %arg1: i32, %arg2: i32) -> (i32, i32) {
    %c0_i32 = arith.constant 0 : i32
    return %arg2, %arg1 : i32, i32
  }
  func.func @transform_2(%arg0: i32, %arg1: i32, %arg2: i32) -> (i32, i32) {
    %c0_i32 = arith.constant 0 : i32
    %c0_i32_0 = arith.constant 0 : i32
    return %c0_i32, %arg1 : i32, i32
  }
  func.func @transform_3(%arg0: i32, %arg1: i32, %arg2: i32) -> (i32, i32) {
    %c0_i32 = arith.constant 0 : i32
    return %arg0, %arg1 : i32, i32
  }
  func.func @transform_4(%arg0: i32, %arg1: i32, %arg2: i32) -> (i32, i32) {
    %c0_i32 = arith.constant 0 : i32
    return %arg0, %arg1 : i32, i32
  }
}

module attributes {stable_mosaic.version = 11 : i64} {
  func.func @kernel(%arg0: i32, %arg1: i32, %arg2: i32, %arg3: memref<16x32xbf16, #tpu.memory_space<vmem>>, %arg4: memref<32x32xbf16, #tpu.memory_space<vmem>>, %arg5: memref<1x32xf32, #tpu.memory_space<vmem>>, %arg6: memref<1x32xf32, #tpu.memory_space<vmem>>, %arg7: memref<1x32xf32, #tpu.memory_space<vmem>>, %arg8: memref<16x32xbf16, #tpu.memory_space<vmem>>, %arg9: memref<16x32xf32, #tpu.memory_space<vmem>>, %arg10: memref<16x32xbf16, #tpu.memory_space<vmem>>) attributes {dimension_semantics = [#tpu.dimension_semantics<parallel>, #tpu.dimension_semantics<arbitrary>, #tpu.dimension_semantics<arbitrary>], iteration_bounds = array<i64: 1, 1, 1>, scalar_prefetch = 0 : i64, scratch_operands = 2 : i64, tpu.core_type = #tpu.core_type<tc>, window_params = [{transform_indices = @transform_0, window_bounds = array<i64: 16, 32>}, {transform_indices = @transform_1, window_bounds = array<i64: 32, 32>}, {transform_indices = @transform_2, window_bounds = array<i64: 1, 32>}, {pipeline_mode = #tpu.pipeline_mode<synchronous>, transform_indices = @transform_3, window_bounds = array<i64: 1, 32>}, {pipeline_mode = #tpu.pipeline_mode<synchronous>, transform_indices = @transform_4, window_bounds = array<i64: 1, 32>}, {transform_indices = @transform_5, window_bounds = array<i64: 16, 32>}]} {
    %c0_i32 = arith.constant 0 : i32
    %0 = arith.cmpi eq, %arg1, %c0_i32 : i32
    %1 = arith.extui %0 : i1 to i32
    %c0_i32_0 = arith.constant 0 : i32
    %2 = arith.cmpi ne, %1, %c0_i32_0 : i32
    scf.if %2 {
      %c0_12 = arith.constant 0 : index
      %c0_13 = arith.constant 0 : index
      %15 = vector.load %arg3[%c0_12, %c0_13] : memref<16x32xbf16, #tpu.memory_space<vmem>>, vector<16x32xbf16>
      %16 = arith.extf %15 : vector<16x32xbf16> to vector<16x32xf32>
      %cst_14 = arith.constant dense<0.000000e+00> : vector<16xf32>
      %17 = vector.multi_reduction <add>, %16, %cst_14 [1] : vector<16x32xf32> to vector<16xf32>
      %18 = vector.shape_cast %17 : vector<16xf32> to vector<16x1xf32>
      %cst_15 = arith.constant 3.200000e+01 : f32
      %19 = vector.broadcast %cst_15 : f32 to vector<16x1xf32>
      %20 = arith.divf %18, %19 : vector<16x1xf32>
      %21 = vector.broadcast %20 : vector<16x1xf32> to vector<16x32xf32>
      %22 = arith.subf %16, %21 : vector<16x32xf32>
      %23 = arith.mulf %22, %22 : vector<16x32xf32>
      %cst_16 = arith.constant dense<0.000000e+00> : vector<16xf32>
      %24 = vector.multi_reduction <add>, %23, %cst_16 [1] : vector<16x32xf32> to vector<16xf32>
      %25 = vector.shape_cast %24 : vector<16xf32> to vector<16x1xf32>
      %cst_17 = arith.constant 3.200000e+01 : f32
      %26 = vector.broadcast %cst_17 : f32 to vector<16x1xf32>
      %27 = arith.divf %25, %26 : vector<16x1xf32>
      %28 = vector.broadcast %20 : vector<16x1xf32> to vector<16x32xf32>
      %29 = arith.subf %16, %28 : vector<16x32xf32>
      %cst_18 = arith.constant 9.99999974E-6 : f32
      %30 = vector.broadcast %cst_18 : f32 to vector<16x1xf32>
      %31 = arith.addf %27, %30 : vector<16x1xf32>
      %32 = math.rsqrt %31 : vector<16x1xf32>
      %33 = vector.broadcast %32 : vector<16x1xf32> to vector<16x32xf32>
      %34 = arith.mulf %29, %33 : vector<16x32xf32>
      %c0_19 = arith.constant 0 : index
      %c0_20 = arith.constant 0 : index
      %35 = vector.load %arg6[%c0_19, %c0_20] : memref<1x32xf32, #tpu.memory_space<vmem>>, vector<1x32xf32>
      %36 = vector.broadcast %35 : vector<1x32xf32> to vector<16x32xf32>
      %37 = arith.mulf %34, %36 : vector<16x32xf32>
      %c0_21 = arith.constant 0 : index
      %c0_22 = arith.constant 0 : index
      %38 = vector.load %arg7[%c0_21, %c0_22] : memref<1x32xf32, #tpu.memory_space<vmem>>, vector<1x32xf32>
      %39 = vector.broadcast %38 : vector<1x32xf32> to vector<16x32xf32>
      %40 = arith.addf %37, %39 : vector<16x32xf32>
      %41 = arith.truncf %40 : vector<16x32xf32> to vector<16x32xbf16>
      %c0_23 = arith.constant 0 : index
      %c0_24 = arith.constant 0 : index
      %42 = vector.load %arg10[%c0_23, %c0_24] : memref<16x32xbf16, #tpu.memory_space<vmem>>, vector<16x32xbf16>
      tpu.vector_store %arg10[%c0_23, %c0_24], %41 {strides = array<i32>} : memref<16x32xbf16, #tpu.memory_space<vmem>>, vector<16x32xbf16>,
    } else {
    }
    %c0 = arith.constant 0 : index
    %c0_1 = arith.constant 0 : index
    %3 = vector.load %arg10[%c0, %c0_1] : memref<16x32xbf16, #tpu.memory_space<vmem>>, vector<16x32xbf16>
    %c0_i32_2 = arith.constant 0 : i32
    %4 = arith.cmpi eq, %arg2, %c0_i32_2 : i32
    %5 = arith.extui %4 : i1 to i32
    %c0_i32_3 = arith.constant 0 : i32
    %6 = arith.cmpi ne, %5, %c0_i32_3 : i32
    scf.if %6 {
      %cst_12 = arith.constant 0.000000e+00 : f32
      %15 = vector.broadcast %cst_12 : f32 to vector<16x32xf32>
      %c0_13 = arith.constant 0 : index
      %c0_14 = arith.constant 0 : index
      %16 = vector.load %arg9[%c0_13, %c0_14] : memref<16x32xf32, #tpu.memory_space<vmem>>, vector<16x32xf32>
      tpu.vector_store %arg9[%c0_13, %c0_14], %15 {strides = array<i32>} : memref<16x32xf32, #tpu.memory_space<vmem>>, vector<16x32xf32>,
    } else {
    }
    %c0_4 = arith.constant 0 : index
    %c0_5 = arith.constant 0 : index
    %7 = vector.load %arg9[%c0_4, %c0_5] : memref<16x32xf32, #tpu.memory_space<vmem>>, vector<16x32xf32>
    %c0_6 = arith.constant 0 : index
    %c0_7 = arith.constant 0 : index
    %8 = vector.load %arg4[%c0_6, %c0_7] : memref<32x32xbf16, #tpu.memory_space<vmem>>, vector<32x32xbf16>
    %cst = arith.constant dense<0.000000e+00> : vector<16x32xf32>
    %9 = tpu.matmul %3, %8, %cst {dimension_numbers = #tpu.dot_dimension_numbers<[1], [0], [0], [1], [0, 0, 1, 1], [], []>} : vector<16x32xbf16>, vector<32x32xbf16>, vector<16x32xf32> -> vector<16x32xf32>
    %10 = arith.addf %7, %9 : vector<16x32xf32>
    %c0_8 = arith.constant 0 : index
    %c0_9 = arith.constant 0 : index
    %11 = vector.load %arg9[%c0_8, %c0_9] : memref<16x32xf32, #tpu.memory_space<vmem>>, vector<16x32xf32>
    tpu.vector_store %arg9[%c0_8, %c0_9], %10 {strides = array<i32>} : memref<16x32xf32, #tpu.memory_space<vmem>>, vector<16x32xf32>,
    %c0_i32_10 = arith.constant 0 : i32
    %12 = arith.cmpi eq, %arg2, %c0_i32_10 : i32
    %13 = arith.extui %12 : i1 to i32
    %c0_i32_11 = arith.constant 0 : i32
    %14 = arith.cmpi ne, %13, %c0_i32_11 : i32
    scf.if %14 {
      %c0_12 = arith.constant 0 : index
      %c0_13 = arith.constant 0 : index
      %15 = vector.load %arg9[%c0_12, %c0_13] : memref<16x32xf32, #tpu.memory_space<vmem>>, vector<16x32xf32>
      %c0_14 = arith.constant 0 : index
      %c0_15 = arith.constant 0 : index
      %16 = vector.load %arg5[%c0_14, %c0_15] : memref<1x32xf32, #tpu.memory_space<vmem>>, vector<1x32xf32>
      %17 = vector.broadcast %16 : vector<1x32xf32> to vector<16x32xf32>
      %18 = arith.addf %15, %17 : vector<16x32xf32>
      %19 = arith.truncf %18 : vector<16x32xf32> to vector<16x32xbf16>
      %c0_16 = arith.constant 0 : index
      %c0_17 = arith.constant 0 : index
      %20 = vector.load %arg8[%c0_16, %c0_17] : memref<16x32xbf16, #tpu.memory_space<vmem>>, vector<16x32xbf16>
      tpu.vector_store %arg8[%c0_16, %c0_17], %19 {strides = array<i32>} : memref<16x32xbf16, #tpu.memory_space<vmem>>, vector<16x32xbf16>,
    } else {
    }
    return
  }
  func.func @transform_0(%arg0: i32, %arg1: i32, %arg2: i32) -> (i32, i32) {
    %c0_i32 = arith.constant 0 : i32
    return %arg0, %arg2 : i32, i32
  }
  func.func @transform_1(%arg0: i32, %arg1: i32, %arg2: i32) -> (i32, i32) {
    %c0_i32 = arith.constant 0 : i32
    return %arg2, %arg1 : i32, i32
  }
  func.func @transform_2(%arg0: i32, %arg1: i32, %arg2: i32) -> (i32, i32) {
    %c0_i32 = arith.constant 0 : i32
    %c0_i32_0 = arith.constant 0 : i32
    return %c0_i32, %arg1 : i32, i32
  }
  func.func @transform_3(%arg0: i32, %arg1: i32, %arg2: i32) -> (i32, i32) {
    %c0_i32 = arith.constant 0 : i32
    %c0_i32_0 = arith.constant 0 : i32
    %c0_i32_1 = arith.constant 0 : i32
    return %c0_i32, %c0_i32_0 : i32, i32
  }
  func.func @transform_4(%arg0: i32, %arg1: i32, %arg2: i32) -> (i32, i32) {
    %c0_i32 = arith.constant 0 : i32
    %c0_i32_0 = arith.constant 0 : i32
    %c0_i32_1 = arith.constant 0 : i32
    return %c0_i32, %c0_i32_0 : i32, i32
  }
  func.func @transform_5(%arg0: i32, %arg1: i32, %arg2: i32) -> (i32, i32) {
    %c0_i32 = arith.constant 0 : i32
    return %arg0, %arg1 : i32, i32
  }
}

module attributes {stable_mosaic.version = 11 : i64} {
  func.func @_self_attn_kernel(%arg0: i32, %arg1: i32, %arg2: memref<1x8x96xbf16, #tpu.memory_space<vmem>>, %arg3: memref<1x8x96xbf16, #tpu.memory_space<vmem>>, %arg4: memref<1x8x32xbf16, #tpu.memory_space<vmem>>) attributes {dimension_semantics = [#tpu.dimension_semantics<parallel>, #tpu.dimension_semantics<parallel>], iteration_bounds = array<i64: 2, 1>, scalar_prefetch = 0 : i64, scratch_operands = 0 : i64, tpu.core_type = #tpu.core_type<tc>, window_params = [{transform_indices = @transform_0, window_bounds = array<i64: 1, 8, 96>}, {transform_indices = @transform_1, window_bounds = array<i64: 1, 8, 96>}, {transform_indices = @transform_2, window_bounds = array<i64: 1, 8, 32>}]} {
    %c0 = arith.constant 0 : index
    %c0_0 = arith.constant 0 : index
    %c0_1 = arith.constant 0 : index
    %0 = vector.load %arg2[%c0, %c0_0, %c0_1] : memref<1x8x96xbf16, #tpu.memory_space<vmem>>, vector<1x8x32xbf16>
    %1 = vector.shape_cast %0 : vector<1x8x32xbf16> to vector<8x32xbf16>
    %2 = arith.extf %1 : vector<8x32xbf16> to vector<8x32xf32>
    %cst = arith.constant 0.353553385 : f32
    %3 = vector.broadcast %cst : f32 to vector<8x32xf32>
    %4 = arith.mulf %2, %3 : vector<8x32xf32>
    %5 = arith.truncf %4 : vector<8x32xf32> to vector<8x32xbf16>
    %c0_2 = arith.constant 0 : index
    %c0_3 = arith.constant 0 : index
    %c32 = arith.constant 32 : index
    %6 = vector.load %arg3[%c0_2, %c0_3, %c32] : memref<1x8x96xbf16, #tpu.memory_space<vmem>>, vector<1x8x32xbf16>
    %7 = vector.shape_cast %6 : vector<1x8x32xbf16> to vector<8x32xbf16>
    %c0_4 = arith.constant 0 : index
    %c0_5 = arith.constant 0 : index
    %c64 = arith.constant 64 : index
    %8 = vector.load %arg3[%c0_4, %c0_5, %c64] : memref<1x8x96xbf16, #tpu.memory_space<vmem>>, vector<1x8x32xbf16>
    %9 = vector.shape_cast %8 : vector<1x8x32xbf16> to vector<8x32xbf16>
    %c8_i32 = arith.constant 8 : i32
    %10 = arith.muli %arg1, %c8_i32 : i32
    %11 = tpu.iota {dimensions = array<i32: 0>} : vector<8x8xi32>
    %12 = vector.broadcast %10 : i32 to vector<8x8xi32>
    %13 = arith.addi %12, %11 : vector<8x8xi32>
    %14 = tpu.iota {dimensions = array<i32: 1>} : vector<8x8xi32>
    %15 = arith.cmpi sle, %14, %13 : vector<8x8xi32>
    %cst_6 = arith.constant 0.000000e+00 : f32
    %cst_7 = arith.constant -1.000000e+09 : f32
    %16 = vector.broadcast %cst_6 : f32 to vector<8x8xf32>
    %17 = vector.broadcast %cst_7 : f32 to vector<8x8xf32>
    %18 = arith.select %15, %16, %17 : vector<8x8xi1>, vector<8x8xf32>
    %19 = vector.extract_strided_slice %5 {offsets = [0, 0], sizes = [8, 8], strides = [1, 1]} : vector<8x32xbf16> to vector<8x8xbf16>
    %20 = vector.extract_strided_slice %7 {offsets = [0, 0], sizes = [8, 8], strides = [1, 1]} : vector<8x32xbf16> to vector<8x8xbf16>
    %cst_8 = arith.constant dense<0.000000e+00> : vector<8x8xf32>
    %21 = tpu.matmul %19, %20, %cst_8 {dimension_numbers = #tpu.dot_dimension_numbers<[1], [1], [0], [0], [0, 0, 1, 0], [], []>} : vector<8x8xbf16>, vector<8x8xbf16>, vector<8x8xf32> -> vector<8x8xf32>
    %22 = arith.addf %21, %18 : vector<8x8xf32>
    %cst_9 = arith.constant dense<0xFF800000> : vector<8xf32>
    %23 = vector.multi_reduction <maximumf>, %22, %cst_9 [1] : vector<8x8xf32> to vector<8xf32>
    %24 = vector.shape_cast %23 : vector<8xf32> to vector<8x1xf32>
    %25 = vector.broadcast %24 : vector<8x1xf32> to vector<8x8xf32>
    %26 = arith.subf %22, %25 : vector<8x8xf32>
    %27 = math.exp %26 : vector<8x8xf32>
    %cst_10 = arith.constant dense<0.000000e+00> : vector<8xf32>
    %28 = vector.multi_reduction <add>, %27, %cst_10 [1] : vector<8x8xf32> to vector<8xf32>
    %29 = vector.shape_cast %28 : vector<8xf32> to vector<8x1xf32>
    %cst_11 = arith.constant 1.000000e+00 : f32
    %30 = vector.broadcast %cst_11 : f32 to vector<8x1xf32>
    %31 = arith.divf %30, %29 : vector<8x1xf32>
    %32 = vector.broadcast %31 : vector<8x1xf32> to vector<8x8xf32>
    %33 = arith.mulf %27, %32 : vector<8x8xf32>
    %34 = arith.truncf %33 : vector<8x8xf32> to vector<8x8xbf16>
    %35 = vector.extract_strided_slice %9 {offsets = [0, 0], sizes = [8, 8], strides = [1, 1]} : vector<8x32xbf16> to vector<8x8xbf16>
    %cst_12 = arith.constant dense<0.000000e+00> : vector<8x8xf32>
    %36 = tpu.matmul %34, %35, %cst_12 {dimension_numbers = #tpu.dot_dimension_numbers<[1], [0], [0], [1], [0, 0, 1, 1], [], []>} : vector<8x8xbf16>, vector<8x8xbf16>, vector<8x8xf32> -> vector<8x8xf32>
    %37 = arith.truncf %36 : vector<8x8xf32> to vector<8x8xbf16>
    %c0_13 = arith.constant 0 : index
    %c0_14 = arith.constant 0 : index
    %c0_15 = arith.constant 0 : index
    %38 = vector.load %arg4[%c0_13, %c0_14, %c0_15] : memref<1x8x32xbf16, #tpu.memory_space<vmem>>, vector<1x8x8xbf16>
    %39 = vector.shape_cast %38 : vector<1x8x8xbf16> to vector<8x8xbf16>
    %40 = vector.shape_cast %37 : vector<8x8xbf16> to vector<1x8x8xbf16>
    tpu.vector_store %arg4[%c0_13, %c0_14, %c0_15], %40 {strides = array<i32>} : memref<1x8x32xbf16, #tpu.memory_space<vmem>>, vector<1x8x8xbf16>,
    %41 = vector.extract_strided_slice %5 {offsets = [0, 8], sizes = [8, 8], strides = [1, 1]} : vector<8x32xbf16> to vector<8x8xbf16>
    %42 = vector.extract_strided_slice %7 {offsets = [0, 8], sizes = [8, 8], strides = [1, 1]} : vector<8x32xbf16> to vector<8x8xbf16>
    %cst_16 = arith.constant dense<0.000000e+00> : vector<8x8xf32>
    %43 = tpu.matmul %41, %42, %cst_16 {dimension_numbers = #tpu.dot_dimension_numbers<[1], [1], [0], [0], [0, 0, 1, 0], [], []>} : vector<8x8xbf16>, vector<8x8xbf16>, vector<8x8xf32> -> vector<8x8xf32>
    %44 = arith.addf %43, %18 : vector<8x8xf32>
    %cst_17 = arith.constant dense<0xFF800000> : vector<8xf32>
    %45 = vector.multi_reduction <maximumf>, %44, %cst_17 [1] : vector<8x8xf32> to vector<8xf32>
    %46 = vector.shape_cast %45 : vector<8xf32> to vector<8x1xf32>
    %47 = vector.broadcast %46 : vector<8x1xf32> to vector<8x8xf32>
    %48 = arith.subf %44, %47 : vector<8x8xf32>
    %49 = math.exp %48 : vector<8x8xf32>
    %cst_18 = arith.constant dense<0.000000e+00> : vector<8xf32>
    %50 = vector.multi_reduction <add>, %49, %cst_18 [1] : vector<8x8xf32> to vector<8xf32>
    %51 = vector.shape_cast %50 : vector<8xf32> to vector<8x1xf32>
    %cst_19 = arith.constant 1.000000e+00 : f32
    %52 = vector.broadcast %cst_19 : f32 to vector<8x1xf32>
    %53 = arith.divf %52, %51 : vector<8x1xf32>
    %54 = vector.broadcast %53 : vector<8x1xf32> to vector<8x8xf32>
    %55 = arith.mulf %49, %54 : vector<8x8xf32>
    %56 = arith.truncf %55 : vector<8x8xf32> to vector<8x8xbf16>
    %57 = vector.extract_strided_slice %9 {offsets = [0, 8], sizes = [8, 8], strides = [1, 1]} : vector<8x32xbf16> to vector<8x8xbf16>
    %cst_20 = arith.constant dense<0.000000e+00> : vector<8x8xf32>
    %58 = tpu.matmul %56, %57, %cst_20 {dimension_numbers = #tpu.dot_dimension_numbers<[1], [0], [0], [1], [0, 0, 1, 1], [], []>} : vector<8x8xbf16>, vector<8x8xbf16>, vector<8x8xf32> -> vector<8x8xf32>
    %59 = arith.truncf %58 : vector<8x8xf32> to vector<8x8xbf16>
    %c0_21 = arith.constant 0 : index
    %c0_22 = arith.constant 0 : index
    %c8 = arith.constant 8 : index
    %60 = vector.load %arg4[%c0_21, %c0_22, %c8] : memref<1x8x32xbf16, #tpu.memory_space<vmem>>, vector<1x8x8xbf16>
    %61 = vector.shape_cast %60 : vector<1x8x8xbf16> to vector<8x8xbf16>
    %62 = vector.shape_cast %59 : vector<8x8xbf16> to vector<1x8x8xbf16>
    tpu.vector_store %arg4[%c0_21, %c0_22, %c8], %62 {strides = array<i32>} : memref<1x8x32xbf16, #tpu.memory_space<vmem>>, vector<1x8x8xbf16>,
    %63 = vector.extract_strided_slice %5 {offsets = [0, 16], sizes = [8, 8], strides = [1, 1]} : vector<8x32xbf16> to vector<8x8xbf16>
    %64 = vector.extract_strided_slice %7 {offsets = [0, 16], sizes = [8, 8], strides = [1, 1]} : vector<8x32xbf16> to vector<8x8xbf16>
    %cst_23 = arith.constant dense<0.000000e+00> : vector<8x8xf32>
    %65 = tpu.matmul %63, %64, %cst_23 {dimension_numbers = #tpu.dot_dimension_numbers<[1], [1], [0], [0], [0, 0, 1, 0], [], []>} : vector<8x8xbf16>, vector<8x8xbf16>, vector<8x8xf32> -> vector<8x8xf32>
    %66 = arith.addf %65, %18 : vector<8x8xf32>
    %cst_24 = arith.constant dense<0xFF800000> : vector<8xf32>
    %67 = vector.multi_reduction <maximumf>, %66, %cst_24 [1] : vector<8x8xf32> to vector<8xf32>
    %68 = vector.shape_cast %67 : vector<8xf32> to vector<8x1xf32>
    %69 = vector.broadcast %68 : vector<8x1xf32> to vector<8x8xf32>
    %70 = arith.subf %66, %69 : vector<8x8xf32>
    %71 = math.exp %70 : vector<8x8xf32>
    %cst_25 = arith.constant dense<0.000000e+00> : vector<8xf32>
    %72 = vector.multi_reduction <add>, %71, %cst_25 [1] : vector<8x8xf32> to vector<8xf32>
    %73 = vector.shape_cast %72 : vector<8xf32> to vector<8x1xf32>
    %cst_26 = arith.constant 1.000000e+00 : f32
    %74 = vector.broadcast %cst_26 : f32 to vector<8x1xf32>
    %75 = arith.divf %74, %73 : vector<8x1xf32>
    %76 = vector.broadcast %75 : vector<8x1xf32> to vector<8x8xf32>
    %77 = arith.mulf %71, %76 : vector<8x8xf32>
    %78 = arith.truncf %77 : vector<8x8xf32> to vector<8x8xbf16>
    %79 = vector.extract_strided_slice %9 {offsets = [0, 16], sizes = [8, 8], strides = [1, 1]} : vector<8x32xbf16> to vector<8x8xbf16>
    %cst_27 = arith.constant dense<0.000000e+00> : vector<8x8xf32>
    %80 = tpu.matmul %78, %79, %cst_27 {dimension_numbers = #tpu.dot_dimension_numbers<[1], [0], [0], [1], [0, 0, 1, 1], [], []>} : vector<8x8xbf16>, vector<8x8xbf16>, vector<8x8xf32> -> vector<8x8xf32>
    %81 = arith.truncf %80 : vector<8x8xf32> to vector<8x8xbf16>
    %c0_28 = arith.constant 0 : index
    %c0_29 = arith.constant 0 : index
    %c16 = arith.constant 16 : index
    %82 = vector.load %arg4[%c0_28, %c0_29, %c16] : memref<1x8x32xbf16, #tpu.memory_space<vmem>>, vector<1x8x8xbf16>
    %83 = vector.shape_cast %82 : vector<1x8x8xbf16> to vector<8x8xbf16>
    %84 = vector.shape_cast %81 : vector<8x8xbf16> to vector<1x8x8xbf16>
    tpu.vector_store %arg4[%c0_28, %c0_29, %c16], %84 {strides = array<i32>} : memref<1x8x32xbf16, #tpu.memory_space<vmem>>, vector<1x8x8xbf16>,
    %85 = vector.extract_strided_slice %5 {offsets = [0, 24], sizes = [8, 8], strides = [1, 1]} : vector<8x32xbf16> to vector<8x8xbf16>
    %86 = vector.extract_strided_slice %7 {offsets = [0, 24], sizes = [8, 8], strides = [1, 1]} : vector<8x32xbf16> to vector<8x8xbf16>
    %cst_30 = arith.constant dense<0.000000e+00> : vector<8x8xf32>
    %87 = tpu.matmul %85, %86, %cst_30 {dimension_numbers = #tpu.dot_dimension_numbers<[1], [1], [0], [0], [0, 0, 1, 0], [], []>} : vector<8x8xbf16>, vector<8x8xbf16>, vector<8x8xf32> -> vector<8x8xf32>
    %88 = arith.addf %87, %18 : vector<8x8xf32>
    %cst_31 = arith.constant dense<0xFF800000> : vector<8xf32>
    %89 = vector.multi_reduction <maximumf>, %88, %cst_31 [1] : vector<8x8xf32> to vector<8xf32>
    %90 = vector.shape_cast %89 : vector<8xf32> to vector<8x1xf32>
    %91 = vector.broadcast %90 : vector<8x1xf32> to vector<8x8xf32>
    %92 = arith.subf %88, %91 : vector<8x8xf32>
    %93 = math.exp %92 : vector<8x8xf32>
    %cst_32 = arith.constant dense<0.000000e+00> : vector<8xf32>
    %94 = vector.multi_reduction <add>, %93, %cst_32 [1] : vector<8x8xf32> to vector<8xf32>
    %95 = vector.shape_cast %94 : vector<8xf32> to vector<8x1xf32>
    %cst_33 = arith.constant 1.000000e+00 : f32
    %96 = vector.broadcast %cst_33 : f32 to vector<8x1xf32>
    %97 = arith.divf %96, %95 : vector<8x1xf32>
    %98 = vector.broadcast %97 : vector<8x1xf32> to vector<8x8xf32>
    %99 = arith.mulf %93, %98 : vector<8x8xf32>
    %100 = arith.truncf %99 : vector<8x8xf32> to vector<8x8xbf16>
    %101 = vector.extract_strided_slice %9 {offsets = [0, 24], sizes = [8, 8], strides = [1, 1]} : vector<8x32xbf16> to vector<8x8xbf16>
    %cst_34 = arith.constant dense<0.000000e+00> : vector<8x8xf32>
    %102 = tpu.matmul %100, %101, %cst_34 {dimension_numbers = #tpu.dot_dimension_numbers<[1], [0], [0], [1], [0, 0, 1, 1], [], []>} : vector<8x8xbf16>, vector<8x8xbf16>, vector<8x8xf32> -> vector<8x8xf32>
    %103 = arith.truncf %102 : vector<8x8xf32> to vector<8x8xbf16>
    %c0_35 = arith.constant 0 : index
    %c0_36 = arith.constant 0 : index
    %c24 = arith.constant 24 : index
    %104 = vector.load %arg4[%c0_35, %c0_36, %c24] : memref<1x8x32xbf16, #tpu.memory_space<vmem>>, vector<1x8x8xbf16>
    %105 = vector.shape_cast %104 : vector<1x8x8xbf16> to vector<8x8xbf16>
    %106 = vector.shape_cast %103 : vector<8x8xbf16> to vector<1x8x8xbf16>
    tpu.vector_store %arg4[%c0_35, %c0_36, %c24], %106 {strides = array<i32>} : memref<1x8x32xbf16, #tpu.memory_space<vmem>>, vector<1x8x8xbf16>,
    return
  }
  func.func @transform_0(%arg0: i32, %arg1: i32) -> (i32, i32, i32) {
    %c0_i32 = arith.constant 0 : i32
    %c0_i32_0 = arith.constant 0 : i32
    return %arg0, %arg1, %c0_i32 : i32, i32, i32
  }
  func.func @transform_1(%arg0: i32, %arg1: i32) -> (i32, i32, i32) {
    %c0_i32 = arith.constant 0 : i32
    %c0_i32_0 = arith.constant 0 : i32
    %c0_i32_1 = arith.constant 0 : i32
    return %arg0, %c0_i32, %c0_i32_0 : i32, i32, i32
  }
  func.func @transform_2(%arg0: i32, %arg1: i32) -> (i32, i32, i32) {
    %c0_i32 = arith.constant 0 : i32
    %c0_i32_0 = arith.constant 0 : i32
    return %arg0, %arg1, %c0_i32 : i32, i32, i32
  }
}

module attributes {stable_mosaic.version = 11 : i64} {
  func.func @kernel(%arg0: i32, %arg1: i32, %arg2: i32, %arg3: memref<16x32xbf16, #tpu.memory_space<vmem>>, %arg4: memref<32x96xbf16, #tpu.memory_space<vmem>>, %arg5: memref<1x96xf32, #tpu.memory_space<vmem>>, %arg6: memref<1x32xf32, #tpu.memory_space<vmem>>, %arg7: memref<1x32xf32, #tpu.memory_space<vmem>>, %arg8: memref<16x96xbf16, #tpu.memory_space<vmem>>, %arg9: memref<16x96xf32, #tpu.memory_space<vmem>>, %arg10: memref<16x32xbf16, #tpu.memory_space<vmem>>) attributes {dimension_semantics = [#tpu.dimension_semantics<parallel>, #tpu.dimension_semantics<arbitrary>, #tpu.dimension_semantics<arbitrary>], iteration_bounds = array<i64: 1, 1, 1>, scalar_prefetch = 0 : i64, scratch_operands = 2 : i64, tpu.core_type = #tpu.core_type<tc>, window_params = [{transform_indices = @transform_0, window_bounds = array<i64: 16, 32>}, {transform_indices = @transform_1, window_bounds = array<i64: 32, 96>}, {transform_indices = @transform_2, window_bounds = array<i64: 1, 96>}, {pipeline_mode = #tpu.pipeline_mode<synchronous>, transform_indices = @transform_3, window_bounds = array<i64: 1, 32>}, {pipeline_mode = #tpu.pipeline_mode<synchronous>, transform_indices = @transform_4, window_bounds = array<i64: 1, 32>}, {transform_indices = @transform_5, window_bounds = array<i64: 16, 96>}]} {
    %c0_i32 = arith.constant 0 : i32
    %0 = arith.cmpi eq, %arg1, %c0_i32 : i32
    %1 = arith.extui %0 : i1 to i32
    %c0_i32_0 = arith.constant 0 : i32
    %2 = arith.cmpi ne, %1, %c0_i32_0 : i32
    scf.if %2 {
      %c0_12 = arith.constant 0 : index
      %c0_13 = arith.constant 0 : index
      %15 = vector.load %arg3[%c0_12, %c0_13] : memref<16x32xbf16, #tpu.memory_space<vmem>>, vector<16x32xbf16>
      %16 = arith.extf %15 : vector<16x32xbf16> to vector<16x32xf32>
      %cst_14 = arith.constant dense<0.000000e+00> : vector<16xf32>
      %17 = vector.multi_reduction <add>, %16, %cst_14 [1] : vector<16x32xf32> to vector<16xf32>
      %18 = vector.shape_cast %17 : vector<16xf32> to vector<16x1xf32>
      %cst_15 = arith.constant 3.200000e+01 : f32
      %19 = vector.broadcast %cst_15 : f32 to vector<16x1xf32>
      %20 = arith.divf %18, %19 : vector<16x1xf32>
      %21 = vector.broadcast %20 : vector<16x1xf32> to vector<16x32xf32>
      %22 = arith.subf %16, %21 : vector<16x32xf32>
      %23 = arith.mulf %22, %22 : vector<16x32xf32>
      %cst_16 = arith.constant dense<0.000000e+00> : vector<16xf32>
      %24 = vector.multi_reduction <add>, %23, %cst_16 [1] : vector<16x32xf32> to vector<16xf32>
      %25 = vector.shape_cast %24 : vector<16xf32> to vector<16x1xf32>
      %cst_17 = arith.constant 3.200000e+01 : f32
      %26 = vector.broadcast %cst_17 : f32 to vector<16x1xf32>
      %27 = arith.divf %25, %26 : vector<16x1xf32>
      %28 = vector.broadcast %20 : vector<16x1xf32> to vector<16x32xf32>
      %29 = arith.subf %16, %28 : vector<16x32xf32>
      %cst_18 = arith.constant 9.99999974E-6 : f32
      %30 = vector.broadcast %cst_18 : f32 to vector<16x1xf32>
      %31 = arith.addf %27, %30 : vector<16x1xf32>
      %32 = math.rsqrt %31 : vector<16x1xf32>
      %33 = vector.broadcast %32 : vector<16x1xf32> to vector<16x32xf32>
      %34 = arith.mulf %29, %33 : vector<16x32xf32>
      %c0_19 = arith.constant 0 : index
      %c0_20 = arith.constant 0 : index
      %35 = vector.load %arg6[%c0_19, %c0_20] : memref<1x32xf32, #tpu.memory_space<vmem>>, vector<1x32xf32>
      %36 = vector.broadcast %35 : vector<1x32xf32> to vector<16x32xf32>
      %37 = arith.mulf %34, %36 : vector<16x32xf32>
      %c0_21 = arith.constant 0 : index
      %c0_22 = arith.constant 0 : index
      %38 = vector.load %arg7[%c0_21, %c0_22] : memref<1x32xf32, #tpu.memory_space<vmem>>, vector<1x32xf32>
      %39 = vector.broadcast %38 : vector<1x32xf32> to vector<16x32xf32>
      %40 = arith.addf %37, %39 : vector<16x32xf32>
      %41 = arith.truncf %40 : vector<16x32xf32> to vector<16x32xbf16>
      %c0_23 = arith.constant 0 : index
      %c0_24 = arith.constant 0 : index
      %42 = vector.load %arg10[%c0_23, %c0_24] : memref<16x32xbf16, #tpu.memory_space<vmem>>, vector<16x32xbf16>
      tpu.vector_store %arg10[%c0_23, %c0_24], %41 {strides = array<i32>} : memref<16x32xbf16, #tpu.memory_space<vmem>>, vector<16x32xbf16>,
    } else {
    }
    %c0 = arith.constant 0 : index
    %c0_1 = arith.constant 0 : index
    %3 = vector.load %arg10[%c0, %c0_1] : memref<16x32xbf16, #tpu.memory_space<vmem>>, vector<16x32xbf16>
    %c0_i32_2 = arith.constant 0 : i32
    %4 = arith.cmpi eq, %arg2, %c0_i32_2 : i32
    %5 = arith.extui %4 : i1 to i32
    %c0_i32_3 = arith.constant 0 : i32
    %6 = arith.cmpi ne, %5, %c0_i32_3 : i32
    scf.if %6 {
      %cst_12 = arith.constant 0.000000e+00 : f32
      %15 = vector.broadcast %cst_12 : f32 to vector<16x96xf32>
      %c0_13 = arith.constant 0 : index
      %c0_14 = arith.constant 0 : index
      %16 = vector.load %arg9[%c0_13, %c0_14] : memref<16x96xf32, #tpu.memory_space<vmem>>, vector<16x96xf32>
      tpu.vector_store %arg9[%c0_13, %c0_14], %15 {strides = array<i32>} : memref<16x96xf32, #tpu.memory_space<vmem>>, vector<16x96xf32>,
    } else {
    }
    %c0_4 = arith.constant 0 : index
    %c0_5 = arith.constant 0 : index
    %7 = vector.load %arg9[%c0_4, %c0_5] : memref<16x96xf32, #tpu.memory_space<vmem>>, vector<16x96xf32>
    %c0_6 = arith.constant 0 : index
    %c0_7 = arith.constant 0 : index
    %8 = vector.load %arg4[%c0_6, %c0_7] : memref<32x96xbf16, #tpu.memory_space<vmem>>, vector<32x96xbf16>
    %cst = arith.constant dense<0.000000e+00> : vector<16x96xf32>
    %9 = tpu.matmul %3, %8, %cst {dimension_numbers = #tpu.dot_dimension_numbers<[1], [0], [0], [1], [0, 0, 1, 1], [], []>} : vector<16x32xbf16>, vector<32x96xbf16>, vector<16x96xf32> -> vector<16x96xf32>
    %10 = arith.addf %7, %9 : vector<16x96xf32>
    %c0_8 = arith.constant 0 : index
    %c0_9 = arith.constant 0 : index
    %11 = vector.load %arg9[%c0_8, %c0_9] : memref<16x96xf32, #tpu.memory_space<vmem>>, vector<16x96xf32>
    tpu.vector_store %arg9[%c0_8, %c0_9], %10 {strides = array<i32>} : memref<16x96xf32, #tpu.memory_space<vmem>>, vector<16x96xf32>,
    %c0_i32_10 = arith.constant 0 : i32
    %12 = arith.cmpi eq, %arg2, %c0_i32_10 : i32
    %13 = arith.extui %12 : i1 to i32
    %c0_i32_11 = arith.constant 0 : i32
    %14 = arith.cmpi ne, %13, %c0_i32_11 : i32
    scf.if %14 {
      %c0_12 = arith.constant 0 : index
      %c0_13 = arith.constant 0 : index
      %15 = vector.load %arg9[%c0_12, %c0_13] : memref<16x96xf32, #tpu.memory_space<vmem>>, vector<16x96xf32>
      %c0_14 = arith.constant 0 : index
      %c0_15 = arith.constant 0 : index
      %16 = vector.load %arg5[%c0_14, %c0_15] : memref<1x96xf32, #tpu.memory_space<vmem>>, vector<1x96xf32>
      %17 = vector.broadcast %16 : vector<1x96xf32> to vector<16x96xf32>
      %18 = arith.addf %15, %17 : vector<16x96xf32>
      %19 = arith.truncf %18 : vector<16x96xf32> to vector<16x96xbf16>
      %c0_16 = arith.constant 0 : index
      %c0_17 = arith.constant 0 : index
      %20 = vector.load %arg8[%c0_16, %c0_17] : memref<16x96xbf16, #tpu.memory_space<vmem>>, vector<16x96xbf16>
      tpu.vector_store %arg8[%c0_16, %c0_17], %19 {strides = array<i32>} : memref<16x96xbf16, #tpu.memory_space<vmem>>, vector<16x96xbf16>,
    } else {
    }
    return
  }
  func.func @transform_0(%arg0: i32, %arg1: i32, %arg2: i32) -> (i32, i32) {
    %c0_i32 = arith.constant 0 : i32
    return %arg0, %arg2 : i32, i32
  }
  func.func @transform_1(%arg0: i32, %arg1: i32, %arg2: i32) -> (i32, i32) {
    %c0_i32 = arith.constant 0 : i32
    return %arg2, %arg1 : i32, i32
  }
  func.func @transform_2(%arg0: i32, %arg1: i32, %arg2: i32) -> (i32, i32) {
    %c0_i32 = arith.constant 0 : i32
    %c0_i32_0 = arith.constant 0 : i32
    return %c0_i32, %arg1 : i32, i32
  }
  func.func @transform_3(%arg0: i32, %arg1: i32, %arg2: i32) -> (i32, i32) {
    %c0_i32 = arith.constant 0 : i32
    %c0_i32_0 = arith.constant 0 : i32
    %c0_i32_1 = arith.constant 0 : i32
    return %c0_i32, %c0_i32_0 : i32, i32
  }
  func.func @transform_4(%arg0: i32, %arg1: i32, %arg2: i32) -> (i32, i32) {
    %c0_i32 = arith.constant 0 : i32
    %c0_i32_0 = arith.constant 0 : i32
    %c0_i32_1 = arith.constant 0 : i32
    return %c0_i32, %c0_i32_0 : i32, i32
  }
  func.func @transform_5(%arg0: i32, %arg1: i32, %arg2: i32) -> (i32, i32) {
    %c0_i32 = arith.constant 0 : i32
    return %arg0, %arg1 : i32, i32
  }
}

module attributes {stable_mosaic.version = 11 : i64} {
  func.func @kernel(%arg0: i32, %arg1: i32, %arg2: i32, %arg3: memref<16x32xbf16, #tpu.memory_space<vmem>>, %arg4: memref<32x64xbf16, #tpu.memory_space<vmem>>, %arg5: memref<1x64xf32, #tpu.memory_space<vmem>>, %arg6: memref<16x64xbf16, #tpu.memory_space<vmem>>, %arg7: memref<16x64xf32, #tpu.memory_space<vmem>>) attributes {dimension_semantics = [#tpu.dimension_semantics<parallel>, #tpu.dimension_semantics<parallel>, #tpu.dimension_semantics<arbitrary>], iteration_bounds = array<i64: 1, 1, 1>, scalar_prefetch = 0 : i64, scratch_operands = 1 : i64, tpu.core_type = #tpu.core_type<tc>, window_params = [{transform_indices = @transform_0, window_bounds = array<i64: 16, 32>}, {transform_indices = @transform_1, window_bounds = array<i64: 32, 64>}, {transform_indices = @transform_2, window_bounds = array<i64: 1, 64>}, {transform_indices = @transform_3, window_bounds = array<i64: 16, 64>}]} {
    %c0 = arith.constant 0 : index
    %c0_0 = arith.constant 0 : index
    %0 = vector.load %arg3[%c0, %c0_0] : memref<16x32xbf16, #tpu.memory_space<vmem>>, vector<16x32xbf16>
    %c0_i32 = arith.constant 0 : i32
    %1 = arith.cmpi eq, %arg2, %c0_i32 : i32
    %2 = arith.extui %1 : i1 to i32
    %c0_i32_1 = arith.constant 0 : i32
    %3 = arith.cmpi ne, %2, %c0_i32_1 : i32
    scf.if %3 {
      %cst_10 = arith.constant 0.000000e+00 : f32
      %12 = vector.broadcast %cst_10 : f32 to vector<16x64xf32>
      %c0_11 = arith.constant 0 : index
      %c0_12 = arith.constant 0 : index
      %13 = vector.load %arg7[%c0_11, %c0_12] : memref<16x64xf32, #tpu.memory_space<vmem>>, vector<16x64xf32>
      tpu.vector_store %arg7[%c0_11, %c0_12], %12 {strides = array<i32>} : memref<16x64xf32, #tpu.memory_space<vmem>>, vector<16x64xf32>,
    } else {
    }
    %c0_2 = arith.constant 0 : index
    %c0_3 = arith.constant 0 : index
    %4 = vector.load %arg7[%c0_2, %c0_3] : memref<16x64xf32, #tpu.memory_space<vmem>>, vector<16x64xf32>
    %c0_4 = arith.constant 0 : index
    %c0_5 = arith.constant 0 : index
    %5 = vector.load %arg4[%c0_4, %c0_5] : memref<32x64xbf16, #tpu.memory_space<vmem>>, vector<32x64xbf16>
    %cst = arith.constant dense<0.000000e+00> : vector<16x64xf32>
    %6 = tpu.matmul %0, %5, %cst {dimension_numbers = #tpu.dot_dimension_numbers<[1], [0], [0], [1], [0, 0, 1, 1], [], []>} : vector<16x32xbf16>, vector<32x64xbf16>, vector<16x64xf32> -> vector<16x64xf32>
    %7 = arith.addf %4, %6 : vector<16x64xf32>
    %c0_6 = arith.constant 0 : index
    %c0_7 = arith.constant 0 : index
    %8 = vector.load %arg7[%c0_6, %c0_7] : memref<16x64xf32, #tpu.memory_space<vmem>>, vector<16x64xf32>
    tpu.vector_store %arg7[%c0_6, %c0_7], %7 {strides = array<i32>} : memref<16x64xf32, #tpu.memory_space<vmem>>, vector<16x64xf32>,
    %c0_i32_8 = arith.constant 0 : i32
    %9 = arith.cmpi eq, %arg2, %c0_i32_8 : i32
    %10 = arith.extui %9 : i1 to i32
    %c0_i32_9 = arith.constant 0 : i32
    %11 = arith.cmpi ne, %10, %c0_i32_9 : i32
    scf.if %11 {
      %c0_10 = arith.constant 0 : index
      %c0_11 = arith.constant 0 : index
      %12 = vector.load %arg7[%c0_10, %c0_11] : memref<16x64xf32, #tpu.memory_space<vmem>>, vector<16x64xf32>
      %c0_12 = arith.constant 0 : index
      %c0_13 = arith.constant 0 : index
      %13 = vector.load %arg5[%c0_12, %c0_13] : memref<1x64xf32, #tpu.memory_space<vmem>>, vector<1x64xf32>
      %14 = vector.broadcast %13 : vector<1x64xf32> to vector<16x64xf32>
      %15 = arith.addf %12, %14 : vector<16x64xf32>
      %16 = arith.truncf %15 : vector<16x64xf32> to vector<16x64xbf16>
      %c0_14 = arith.constant 0 : index
      %c0_15 = arith.constant 0 : index
      %17 = vector.load %arg6[%c0_14, %c0_15] : memref<16x64xbf16, #tpu.memory_space<vmem>>, vector<16x64xbf16>
      tpu.vector_store %arg6[%c0_14, %c0_15], %16 {strides = array<i32>} : memref<16x64xbf16, #tpu.memory_space<vmem>>, vector<16x64xbf16>,
    } else {
    }
    return
  }
  func.func @transform_0(%arg0: i32, %arg1: i32, %arg2: i32) -> (i32, i32) {
    %c0_i32 = arith.constant 0 : i32
    return %arg0, %arg2 : i32, i32
  }
  func.func @transform_1(%arg0: i32, %arg1: i32, %arg2: i32) -> (i32, i32) {
    %c0_i32 = arith.constant 0 : i32
    return %arg2, %arg1 : i32, i32
  }
  func.func @transform_2(%arg0: i32, %arg1: i32, %arg2: i32) -> (i32, i32) {
    %c0_i32 = arith.constant 0 : i32
    %c0_i32_0 = arith.constant 0 : i32
    return %c0_i32, %arg1 : i32, i32
  }
  func.func @transform_3(%arg0: i32, %arg1: i32, %arg2: i32) -> (i32, i32) {
    %c0_i32 = arith.constant 0 : i32
    return %arg0, %arg1 : i32, i32
  }
}

module attributes {stable_mosaic.version = 11 : i64} {
  func.func @_cross_attn_kernel(%arg0: i32, %arg1: i32, %arg2: memref<1x8x32xbf16, #tpu.memory_space<vmem>>, %arg3: memref<1x8x64xbf16, #tpu.memory_space<vmem>>, %arg4: memref<1x1x8xi32, #tpu.memory_space<vmem>>, %arg5: memref<1x8x32xbf16, #tpu.memory_space<vmem>>) attributes {dimension_semantics = [#tpu.dimension_semantics<parallel>, #tpu.dimension_semantics<parallel>], iteration_bounds = array<i64: 2, 1>, scalar_prefetch = 0 : i64, scratch_operands = 0 : i64, tpu.core_type = #tpu.core_type<tc>, window_params = [{transform_indices = @transform_0, window_bounds = array<i64: 1, 8, 32>}, {transform_indices = @transform_1, window_bounds = array<i64: 1, 8, 64>}, {transform_indices = @transform_2, window_bounds = array<i64: 1, 1, 8>}, {transform_indices = @transform_3, window_bounds = array<i64: 1, 8, 32>}]} {
    %c0 = arith.constant 0 : index
    %c0_0 = arith.constant 0 : index
    %c0_1 = arith.constant 0 : index
    %0 = vector.load %arg2[%c0, %c0_0, %c0_1] : memref<1x8x32xbf16, #tpu.memory_space<vmem>>, vector<1x8x32xbf16>
    %1 = vector.shape_cast %0 : vector<1x8x32xbf16> to vector<8x32xbf16>
    %2 = arith.extf %1 : vector<8x32xbf16> to vector<8x32xf32>
    %cst = arith.constant 0.353553385 : f32
    %3 = vector.broadcast %cst : f32 to vector<8x32xf32>
    %4 = arith.mulf %2, %3 : vector<8x32xf32>
    %5 = arith.truncf %4 : vector<8x32xf32> to vector<8x32xbf16>
    %c0_2 = arith.constant 0 : index
    %c0_3 = arith.constant 0 : index
    %c0_4 = arith.constant 0 : index
    %6 = vector.load %arg3[%c0_2, %c0_3, %c0_4] : memref<1x8x64xbf16, #tpu.memory_space<vmem>>, vector<1x8x32xbf16>
    %7 = vector.shape_cast %6 : vector<1x8x32xbf16> to vector<8x32xbf16>
    %c0_5 = arith.constant 0 : index
    %c0_6 = arith.constant 0 : index
    %c32 = arith.constant 32 : index
    %8 = vector.load %arg3[%c0_5, %c0_6, %c32] : memref<1x8x64xbf16, #tpu.memory_space<vmem>>, vector<1x8x32xbf16>
    %9 = vector.shape_cast %8 : vector<1x8x32xbf16> to vector<8x32xbf16>
    %c0_7 = arith.constant 0 : index
    %c0_8 = arith.constant 0 : index
    %c0_9 = arith.constant 0 : index
    %10 = vector.load %arg4[%c0_7, %c0_8, %c0_9] : memref<1x1x8xi32, #tpu.memory_space<vmem>>, vector<1x1x8xi32>
    %11 = vector.shape_cast %10 : vector<1x1x8xi32> to vector<1x8xi32>
    %c0_i32 = arith.constant 0 : i32
    %12 = vector.broadcast %c0_i32 : i32 to vector<1x8xi32>
    %13 = arith.cmpi sgt, %11, %12 : vector<1x8xi32>
    %cst_10 = arith.constant -1.000000e+09 : f32
    %cst_11 = arith.constant 0.000000e+00 : f32
    %14 = vector.broadcast %cst_10 : f32 to vector<1x8xf32>
    %15 = vector.broadcast %cst_11 : f32 to vector<1x8xf32>
    %16 = arith.select %13, %14, %15 : vector<1x8xi1>, vector<1x8xf32>
    %17 = vector.extract_strided_slice %5 {offsets = [0, 0], sizes = [8, 8], strides = [1, 1]} : vector<8x32xbf16> to vector<8x8xbf16>
    %18 = vector.extract_strided_slice %7 {offsets = [0, 0], sizes = [8, 8], strides = [1, 1]} : vector<8x32xbf16> to vector<8x8xbf16>
    %cst_12 = arith.constant dense<0.000000e+00> : vector<8x8xf32>
    %19 = tpu.matmul %17, %18, %cst_12 {dimension_numbers = #tpu.dot_dimension_numbers<[1], [1], [0], [0], [0, 0, 1, 0], [], []>} : vector<8x8xbf16>, vector<8x8xbf16>, vector<8x8xf32> -> vector<8x8xf32>
    %20 = vector.broadcast %16 : vector<1x8xf32> to vector<8x8xf32>
    %21 = arith.addf %19, %20 : vector<8x8xf32>
    %cst_13 = arith.constant dense<0xFF800000> : vector<8xf32>
    %22 = vector.multi_reduction <maximumf>, %21, %cst_13 [1] : vector<8x8xf32> to vector<8xf32>
    %23 = vector.shape_cast %22 : vector<8xf32> to vector<8x1xf32>
    %24 = vector.broadcast %23 : vector<8x1xf32> to vector<8x8xf32>
    %25 = arith.subf %21, %24 : vector<8x8xf32>
    %26 = math.exp %25 : vector<8x8xf32>
    %cst_14 = arith.constant dense<0.000000e+00> : vector<8xf32>
    %27 = vector.multi_reduction <add>, %26, %cst_14 [1] : vector<8x8xf32> to vector<8xf32>
    %28 = vector.shape_cast %27 : vector<8xf32> to vector<8x1xf32>
    %cst_15 = arith.constant 1.000000e+00 : f32
    %29 = vector.broadcast %cst_15 : f32 to vector<8x1xf32>
    %30 = arith.divf %29, %28 : vector<8x1xf32>
    %31 = vector.broadcast %30 : vector<8x1xf32> to vector<8x8xf32>
    %32 = arith.mulf %26, %31 : vector<8x8xf32>
    %33 = arith.truncf %32 : vector<8x8xf32> to vector<8x8xbf16>
    %34 = vector.extract_strided_slice %9 {offsets = [0, 0], sizes = [8, 8], strides = [1, 1]} : vector<8x32xbf16> to vector<8x8xbf16>
    %cst_16 = arith.constant dense<0.000000e+00> : vector<8x8xf32>
    %35 = tpu.matmul %33, %34, %cst_16 {dimension_numbers = #tpu.dot_dimension_numbers<[1], [0], [0], [1], [0, 0, 1, 1], [], []>} : vector<8x8xbf16>, vector<8x8xbf16>, vector<8x8xf32> -> vector<8x8xf32>
    %36 = arith.truncf %35 : vector<8x8xf32> to vector<8x8xbf16>
    %c0_17 = arith.constant 0 : index
    %c0_18 = arith.constant 0 : index
    %c0_19 = arith.constant 0 : index
    %37 = vector.load %arg5[%c0_17, %c0_18, %c0_19] : memref<1x8x32xbf16, #tpu.memory_space<vmem>>, vector<1x8x8xbf16>
    %38 = vector.shape_cast %37 : vector<1x8x8xbf16> to vector<8x8xbf16>
    %39 = vector.shape_cast %36 : vector<8x8xbf16> to vector<1x8x8xbf16>
    tpu.vector_store %arg5[%c0_17, %c0_18, %c0_19], %39 {strides = array<i32>} : memref<1x8x32xbf16, #tpu.memory_space<vmem>>, vector<1x8x8xbf16>,
    %40 = vector.extract_strided_slice %5 {offsets = [0, 8], sizes = [8, 8], strides = [1, 1]} : vector<8x32xbf16> to vector<8x8xbf16>
    %41 = vector.extract_strided_slice %7 {offsets = [0, 8], sizes = [8, 8], strides = [1, 1]} : vector<8x32xbf16> to vector<8x8xbf16>
    %cst_20 = arith.constant dense<0.000000e+00> : vector<8x8xf32>
    %42 = tpu.matmul %40, %41, %cst_20 {dimension_numbers = #tpu.dot_dimension_numbers<[1], [1], [0], [0], [0, 0, 1, 0], [], []>} : vector<8x8xbf16>, vector<8x8xbf16>, vector<8x8xf32> -> vector<8x8xf32>
    %43 = vector.broadcast %16 : vector<1x8xf32> to vector<8x8xf32>
    %44 = arith.addf %42, %43 : vector<8x8xf32>
    %cst_21 = arith.constant dense<0xFF800000> : vector<8xf32>
    %45 = vector.multi_reduction <maximumf>, %44, %cst_21 [1] : vector<8x8xf32> to vector<8xf32>
    %46 = vector.shape_cast %45 : vector<8xf32> to vector<8x1xf32>
    %47 = vector.broadcast %46 : vector<8x1xf32> to vector<8x8xf32>
    %48 = arith.subf %44, %47 : vector<8x8xf32>
    %49 = math.exp %48 : vector<8x8xf32>
    %cst_22 = arith.constant dense<0.000000e+00> : vector<8xf32>
    %50 = vector.multi_reduction <add>, %49, %cst_22 [1] : vector<8x8xf32> to vector<8xf32>
    %51 = vector.shape_cast %50 : vector<8xf32> to vector<8x1xf32>
    %cst_23 = arith.constant 1.000000e+00 : f32
    %52 = vector.broadcast %cst_23 : f32 to vector<8x1xf32>
    %53 = arith.divf %52, %51 : vector<8x1xf32>
    %54 = vector.broadcast %53 : vector<8x1xf32> to vector<8x8xf32>
    %55 = arith.mulf %49, %54 : vector<8x8xf32>
    %56 = arith.truncf %55 : vector<8x8xf32> to vector<8x8xbf16>
    %57 = vector.extract_strided_slice %9 {offsets = [0, 8], sizes = [8, 8], strides = [1, 1]} : vector<8x32xbf16> to vector<8x8xbf16>
    %cst_24 = arith.constant dense<0.000000e+00> : vector<8x8xf32>
    %58 = tpu.matmul %56, %57, %cst_24 {dimension_numbers = #tpu.dot_dimension_numbers<[1], [0], [0], [1], [0, 0, 1, 1], [], []>} : vector<8x8xbf16>, vector<8x8xbf16>, vector<8x8xf32> -> vector<8x8xf32>
    %59 = arith.truncf %58 : vector<8x8xf32> to vector<8x8xbf16>
    %c0_25 = arith.constant 0 : index
    %c0_26 = arith.constant 0 : index
    %c8 = arith.constant 8 : index
    %60 = vector.load %arg5[%c0_25, %c0_26, %c8] : memref<1x8x32xbf16, #tpu.memory_space<vmem>>, vector<1x8x8xbf16>
    %61 = vector.shape_cast %60 : vector<1x8x8xbf16> to vector<8x8xbf16>
    %62 = vector.shape_cast %59 : vector<8x8xbf16> to vector<1x8x8xbf16>
    tpu.vector_store %arg5[%c0_25, %c0_26, %c8], %62 {strides = array<i32>} : memref<1x8x32xbf16, #tpu.memory_space<vmem>>, vector<1x8x8xbf16>,
    %63 = vector.extract_strided_slice %5 {offsets = [0, 16], sizes = [8, 8], strides = [1, 1]} : vector<8x32xbf16> to vector<8x8xbf16>
    %64 = vector.extract_strided_slice %7 {offsets = [0, 16], sizes = [8, 8], strides = [1, 1]} : vector<8x32xbf16> to vector<8x8xbf16>
    %cst_27 = arith.constant dense<0.000000e+00> : vector<8x8xf32>
    %65 = tpu.matmul %63, %64, %cst_27 {dimension_numbers = #tpu.dot_dimension_numbers<[1], [1], [0], [0], [0, 0, 1, 0], [], []>} : vector<8x8xbf16>, vector<8x8xbf16>, vector<8x8xf32> -> vector<8x8xf32>
    %66 = vector.broadcast %16 : vector<1x8xf32> to vector<8x8xf32>
    %67 = arith.addf %65, %66 : vector<8x8xf32>
    %cst_28 = arith.constant dense<0xFF800000> : vector<8xf32>
    %68 = vector.multi_reduction <maximumf>, %67, %cst_28 [1] : vector<8x8xf32> to vector<8xf32>
    %69 = vector.shape_cast %68 : vector<8xf32> to vector<8x1xf32>
    %70 = vector.broadcast %69 : vector<8x1xf32> to vector<8x8xf32>
    %71 = arith.subf %67, %70 : vector<8x8xf32>
    %72 = math.exp %71 : vector<8x8xf32>
    %cst_29 = arith.constant dense<0.000000e+00> : vector<8xf32>
    %73 = vector.multi_reduction <add>, %72, %cst_29 [1] : vector<8x8xf32> to vector<8xf32>
    %74 = vector.shape_cast %73 : vector<8xf32> to vector<8x1xf32>
    %cst_30 = arith.constant 1.000000e+00 : f32
    %75 = vector.broadcast %cst_30 : f32 to vector<8x1xf32>
    %76 = arith.divf %75, %74 : vector<8x1xf32>
    %77 = vector.broadcast %76 : vector<8x1xf32> to vector<8x8xf32>
    %78 = arith.mulf %72, %77 : vector<8x8xf32>
    %79 = arith.truncf %78 : vector<8x8xf32> to vector<8x8xbf16>
    %80 = vector.extract_strided_slice %9 {offsets = [0, 16], sizes = [8, 8], strides = [1, 1]} : vector<8x32xbf16> to vector<8x8xbf16>
    %cst_31 = arith.constant dense<0.000000e+00> : vector<8x8xf32>
    %81 = tpu.matmul %79, %80, %cst_31 {dimension_numbers = #tpu.dot_dimension_numbers<[1], [0], [0], [1], [0, 0, 1, 1], [], []>} : vector<8x8xbf16>, vector<8x8xbf16>, vector<8x8xf32> -> vector<8x8xf32>
    %82 = arith.truncf %81 : vector<8x8xf32> to vector<8x8xbf16>
    %c0_32 = arith.constant 0 : index
    %c0_33 = arith.constant 0 : index
    %c16 = arith.constant 16 : index
    %83 = vector.load %arg5[%c0_32, %c0_33, %c16] : memref<1x8x32xbf16, #tpu.memory_space<vmem>>, vector<1x8x8xbf16>
    %84 = vector.shape_cast %83 : vector<1x8x8xbf16> to vector<8x8xbf16>
    %85 = vector.shape_cast %82 : vector<8x8xbf16> to vector<1x8x8xbf16>
    tpu.vector_store %arg5[%c0_32, %c0_33, %c16], %85 {strides = array<i32>} : memref<1x8x32xbf16, #tpu.memory_space<vmem>>, vector<1x8x8xbf16>,
    %86 = vector.extract_strided_slice %5 {offsets = [0, 24], sizes = [8, 8], strides = [1, 1]} : vector<8x32xbf16> to vector<8x8xbf16>
    %87 = vector.extract_strided_slice %7 {offsets = [0, 24], sizes = [8, 8], strides = [1, 1]} : vector<8x32xbf16> to vector<8x8xbf16>
    %cst_34 = arith.constant dense<0.000000e+00> : vector<8x8xf32>
    %88 = tpu.matmul %86, %87, %cst_34 {dimension_numbers = #tpu.dot_dimension_numbers<[1], [1], [0], [0], [0, 0, 1, 0], [], []>} : vector<8x8xbf16>, vector<8x8xbf16>, vector<8x8xf32> -> vector<8x8xf32>
    %89 = vector.broadcast %16 : vector<1x8xf32> to vector<8x8xf32>
    %90 = arith.addf %88, %89 : vector<8x8xf32>
    %cst_35 = arith.constant dense<0xFF800000> : vector<8xf32>
    %91 = vector.multi_reduction <maximumf>, %90, %cst_35 [1] : vector<8x8xf32> to vector<8xf32>
    %92 = vector.shape_cast %91 : vector<8xf32> to vector<8x1xf32>
    %93 = vector.broadcast %92 : vector<8x1xf32> to vector<8x8xf32>
    %94 = arith.subf %90, %93 : vector<8x8xf32>
    %95 = math.exp %94 : vector<8x8xf32>
    %cst_36 = arith.constant dense<0.000000e+00> : vector<8xf32>
    %96 = vector.multi_reduction <add>, %95, %cst_36 [1] : vector<8x8xf32> to vector<8xf32>
    %97 = vector.shape_cast %96 : vector<8xf32> to vector<8x1xf32>
    %cst_37 = arith.constant 1.000000e+00 : f32
    %98 = vector.broadcast %cst_37 : f32 to vector<8x1xf32>
    %99 = arith.divf %98, %97 : vector<8x1xf32>
    %100 = vector.broadcast %99 : vector<8x1xf32> to vector<8x8xf32>
    %101 = arith.mulf %95, %100 : vector<8x8xf32>
    %102 = arith.truncf %101 : vector<8x8xf32> to vector<8x8xbf16>
    %103 = vector.extract_strided_slice %9 {offsets = [0, 24], sizes = [8, 8], strides = [1, 1]} : vector<8x32xbf16> to vector<8x8xbf16>
    %cst_38 = arith.constant dense<0.000000e+00> : vector<8x8xf32>
    %104 = tpu.matmul %102, %103, %cst_38 {dimension_numbers = #tpu.dot_dimension_numbers<[1], [0], [0], [1], [0, 0, 1, 1], [], []>} : vector<8x8xbf16>, vector<8x8xbf16>, vector<8x8xf32> -> vector<8x8xf32>
    %105 = arith.truncf %104 : vector<8x8xf32> to vector<8x8xbf16>
    %c0_39 = arith.constant 0 : index
    %c0_40 = arith.constant 0 : index
    %c24 = arith.constant 24 : index
    %106 = vector.load %arg5[%c0_39, %c0_40, %c24] : memref<1x8x32xbf16, #tpu.memory_space<vmem>>, vector<1x8x8xbf16>
    %107 = vector.shape_cast %106 : vector<1x8x8xbf16> to vector<8x8xbf16>
    %108 = vector.shape_cast %105 : vector<8x8xbf16> to vector<1x8x8xbf16>
    tpu.vector_store %arg5[%c0_39, %c0_40, %c24], %108 {strides = array<i32>} : memref<1x8x32xbf16, #tpu.memory_space<vmem>>, vector<1x8x8xbf16>,
    return
  }
  func.func @transform_0(%arg0: i32, %arg1: i32) -> (i32, i32, i32) {
    %c0_i32 = arith.constant 0 : i32
    %c0_i32_0 = arith.constant 0 : i32
    return %arg0, %arg1, %c0_i32 : i32, i32, i32
  }
  func.func @transform_1(%arg0: i32, %arg1: i32) -> (i32, i32, i32) {
    %c0_i32 = arith.constant 0 : i32
    %c0_i32_0 = arith.constant 0 : i32
    %c0_i32_1 = arith.constant 0 : i32
    return %arg0, %c0_i32, %c0_i32_0 : i32, i32, i32
  }
  func.func @transform_2(%arg0: i32, %arg1: i32) -> (i32, i32, i32) {
    %c0_i32 = arith.constant 0 : i32
    %c0_i32_0 = arith.constant 0 : i32
    %c0_i32_1 = arith.constant 0 : i32
    return %arg0, %c0_i32, %c0_i32_0 : i32, i32, i32
  }
  func.func @transform_3(%arg0: i32, %arg1: i32) -> (i32, i32, i32) {
    %c0_i32 = arith.constant 0 : i32
    %c0_i32_0 = arith.constant 0 : i32
    return %arg0, %arg1, %c0_i32 : i32, i32, i32
  }
}

module attributes {stable_mosaic.version = 11 : i64} {
  func.func @kernel(%arg0: i32, %arg1: i32, %arg2: i32, %arg3: memref<16x32xbf16, #tpu.memory_space<vmem>>, %arg4: memref<32x64xbf16, #tpu.memory_space<vmem>>, %arg5: memref<1x64xf32, #tpu.memory_space<vmem>>, %arg6: memref<1x32xf32, #tpu.memory_space<vmem>>, %arg7: memref<1x32xf32, #tpu.memory_space<vmem>>, %arg8: memref<16x64xbf16, #tpu.memory_space<vmem>>, %arg9: memref<16x64xf32, #tpu.memory_space<vmem>>, %arg10: memref<16x32xbf16, #tpu.memory_space<vmem>>) attributes {dimension_semantics = [#tpu.dimension_semantics<parallel>, #tpu.dimension_semantics<arbitrary>, #tpu.dimension_semantics<arbitrary>], iteration_bounds = array<i64: 1, 1, 1>, scalar_prefetch = 0 : i64, scratch_operands = 2 : i64, tpu.core_type = #tpu.core_type<tc>, window_params = [{transform_indices = @transform_0, window_bounds = array<i64: 16, 32>}, {transform_indices = @transform_1, window_bounds = array<i64: 32, 64>}, {transform_indices = @transform_2, window_bounds = array<i64: 1, 64>}, {pipeline_mode = #tpu.pipeline_mode<synchronous>, transform_indices = @transform_3, window_bounds = array<i64: 1, 32>}, {pipeline_mode = #tpu.pipeline_mode<synchronous>, transform_indices = @transform_4, window_bounds = array<i64: 1, 32>}, {transform_indices = @transform_5, window_bounds = array<i64: 16, 64>}]} {
    %c0_i32 = arith.constant 0 : i32
    %0 = arith.cmpi eq, %arg1, %c0_i32 : i32
    %1 = arith.extui %0 : i1 to i32
    %c0_i32_0 = arith.constant 0 : i32
    %2 = arith.cmpi ne, %1, %c0_i32_0 : i32
    scf.if %2 {
      %c0_12 = arith.constant 0 : index
      %c0_13 = arith.constant 0 : index
      %15 = vector.load %arg3[%c0_12, %c0_13] : memref<16x32xbf16, #tpu.memory_space<vmem>>, vector<16x32xbf16>
      %16 = arith.extf %15 : vector<16x32xbf16> to vector<16x32xf32>
      %cst_14 = arith.constant dense<0.000000e+00> : vector<16xf32>
      %17 = vector.multi_reduction <add>, %16, %cst_14 [1] : vector<16x32xf32> to vector<16xf32>
      %18 = vector.shape_cast %17 : vector<16xf32> to vector<16x1xf32>
      %cst_15 = arith.constant 3.200000e+01 : f32
      %19 = vector.broadcast %cst_15 : f32 to vector<16x1xf32>
      %20 = arith.divf %18, %19 : vector<16x1xf32>
      %21 = vector.broadcast %20 : vector<16x1xf32> to vector<16x32xf32>
      %22 = arith.subf %16, %21 : vector<16x32xf32>
      %23 = arith.mulf %22, %22 : vector<16x32xf32>
      %cst_16 = arith.constant dense<0.000000e+00> : vector<16xf32>
      %24 = vector.multi_reduction <add>, %23, %cst_16 [1] : vector<16x32xf32> to vector<16xf32>
      %25 = vector.shape_cast %24 : vector<16xf32> to vector<16x1xf32>
      %cst_17 = arith.constant 3.200000e+01 : f32
      %26 = vector.broadcast %cst_17 : f32 to vector<16x1xf32>
      %27 = arith.divf %25, %26 : vector<16x1xf32>
      %28 = vector.broadcast %20 : vector<16x1xf32> to vector<16x32xf32>
      %29 = arith.subf %16, %28 : vector<16x32xf32>
      %cst_18 = arith.constant 9.99999974E-6 : f32
      %30 = vector.broadcast %cst_18 : f32 to vector<16x1xf32>
      %31 = arith.addf %27, %30 : vector<16x1xf32>
      %32 = math.rsqrt %31 : vector<16x1xf32>
      %33 = vector.broadcast %32 : vector<16x1xf32> to vector<16x32xf32>
      %34 = arith.mulf %29, %33 : vector<16x32xf32>
      %c0_19 = arith.constant 0 : index
      %c0_20 = arith.constant 0 : index
      %35 = vector.load %arg6[%c0_19, %c0_20] : memref<1x32xf32, #tpu.memory_space<vmem>>, vector<1x32xf32>
      %36 = vector.broadcast %35 : vector<1x32xf32> to vector<16x32xf32>
      %37 = arith.mulf %34, %36 : vector<16x32xf32>
      %c0_21 = arith.constant 0 : index
      %c0_22 = arith.constant 0 : index
      %38 = vector.load %arg7[%c0_21, %c0_22] : memref<1x32xf32, #tpu.memory_space<vmem>>, vector<1x32xf32>
      %39 = vector.broadcast %38 : vector<1x32xf32> to vector<16x32xf32>
      %40 = arith.addf %37, %39 : vector<16x32xf32>
      %41 = arith.truncf %40 : vector<16x32xf32> to vector<16x32xbf16>
      %c0_23 = arith.constant 0 : index
      %c0_24 = arith.constant 0 : index
      %42 = vector.load %arg10[%c0_23, %c0_24] : memref<16x32xbf16, #tpu.memory_space<vmem>>, vector<16x32xbf16>
      tpu.vector_store %arg10[%c0_23, %c0_24], %41 {strides = array<i32>} : memref<16x32xbf16, #tpu.memory_space<vmem>>, vector<16x32xbf16>,
    } else {
    }
    %c0 = arith.constant 0 : index
    %c0_1 = arith.constant 0 : index
    %3 = vector.load %arg10[%c0, %c0_1] : memref<16x32xbf16, #tpu.memory_space<vmem>>, vector<16x32xbf16>
    %c0_i32_2 = arith.constant 0 : i32
    %4 = arith.cmpi eq, %arg2, %c0_i32_2 : i32
    %5 = arith.extui %4 : i1 to i32
    %c0_i32_3 = arith.constant 0 : i32
    %6 = arith.cmpi ne, %5, %c0_i32_3 : i32
    scf.if %6 {
      %cst_12 = arith.constant 0.000000e+00 : f32
      %15 = vector.broadcast %cst_12 : f32 to vector<16x64xf32>
      %c0_13 = arith.constant 0 : index
      %c0_14 = arith.constant 0 : index
      %16 = vector.load %arg9[%c0_13, %c0_14] : memref<16x64xf32, #tpu.memory_space<vmem>>, vector<16x64xf32>
      tpu.vector_store %arg9[%c0_13, %c0_14], %15 {strides = array<i32>} : memref<16x64xf32, #tpu.memory_space<vmem>>, vector<16x64xf32>,
    } else {
    }
    %c0_4 = arith.constant 0 : index
    %c0_5 = arith.constant 0 : index
    %7 = vector.load %arg9[%c0_4, %c0_5] : memref<16x64xf32, #tpu.memory_space<vmem>>, vector<16x64xf32>
    %c0_6 = arith.constant 0 : index
    %c0_7 = arith.constant 0 : index
    %8 = vector.load %arg4[%c0_6, %c0_7] : memref<32x64xbf16, #tpu.memory_space<vmem>>, vector<32x64xbf16>
    %cst = arith.constant dense<0.000000e+00> : vector<16x64xf32>
    %9 = tpu.matmul %3, %8, %cst {dimension_numbers = #tpu.dot_dimension_numbers<[1], [0], [0], [1], [0, 0, 1, 1], [], []>} : vector<16x32xbf16>, vector<32x64xbf16>, vector<16x64xf32> -> vector<16x64xf32>
    %10 = arith.addf %7, %9 : vector<16x64xf32>
    %c0_8 = arith.constant 0 : index
    %c0_9 = arith.constant 0 : index
    %11 = vector.load %arg9[%c0_8, %c0_9] : memref<16x64xf32, #tpu.memory_space<vmem>>, vector<16x64xf32>
    tpu.vector_store %arg9[%c0_8, %c0_9], %10 {strides = array<i32>} : memref<16x64xf32, #tpu.memory_space<vmem>>, vector<16x64xf32>,
    %c0_i32_10 = arith.constant 0 : i32
    %12 = arith.cmpi eq, %arg2, %c0_i32_10 : i32
    %13 = arith.extui %12 : i1 to i32
    %c0_i32_11 = arith.constant 0 : i32
    %14 = arith.cmpi ne, %13, %c0_i32_11 : i32
    scf.if %14 {
      %c0_12 = arith.constant 0 : index
      %c0_13 = arith.constant 0 : index
      %15 = vector.load %arg9[%c0_12, %c0_13] : memref<16x64xf32, #tpu.memory_space<vmem>>, vector<16x64xf32>
      %c0_14 = arith.constant 0 : index
      %c0_15 = arith.constant 0 : index
      %16 = vector.load %arg5[%c0_14, %c0_15] : memref<1x64xf32, #tpu.memory_space<vmem>>, vector<1x64xf32>
      %17 = vector.broadcast %16 : vector<1x64xf32> to vector<16x64xf32>
      %18 = arith.addf %15, %17 : vector<16x64xf32>
      %cst_16 = arith.constant 0.000000e+00 : f32
      %19 = vector.broadcast %cst_16 : f32 to vector<16x64xf32>
      %20 = arith.maximumf %18, %19 : vector<16x64xf32>
      %21 = arith.truncf %20 : vector<16x64xf32> to vector<16x64xbf16>
      %c0_17 = arith.constant 0 : index
      %c0_18 = arith.constant 0 : index
      %22 = vector.load %arg8[%c0_17, %c0_18] : memref<16x64xbf16, #tpu.memory_space<vmem>>, vector<16x64xbf16>
      tpu.vector_store %arg8[%c0_17, %c0_18], %21 {strides = array<i32>} : memref<16x64xbf16, #tpu.memory_space<vmem>>, vector<16x64xbf16>,
    } else {
    }
    return
  }
  func.func @transform_0(%arg0: i32, %arg1: i32, %arg2: i32) -> (i32, i32) {
    %c0_i32 = arith.constant 0 : i32
    return %arg0, %arg2 : i32, i32
  }
  func.func @transform_1(%arg0: i32, %arg1: i32, %arg2: i32) -> (i32, i32) {
    %c0_i32 = arith.constant 0 : i32
    return %arg2, %arg1 : i32, i32
  }
  func.func @transform_2(%arg0: i32, %arg1: i32, %arg2: i32) -> (i32, i32) {
    %c0_i32 = arith.constant 0 : i32
    %c0_i32_0 = arith.constant 0 : i32
    return %c0_i32, %arg1 : i32, i32
  }
  func.func @transform_3(%arg0: i32, %arg1: i32, %arg2: i32) -> (i32, i32) {
    %c0_i32 = arith.constant 0 : i32
    %c0_i32_0 = arith.constant 0 : i32
    %c0_i32_1 = arith.constant 0 : i32
    return %c0_i32, %c0_i32_0 : i32, i32
  }
  func.func @transform_4(%arg0: i32, %arg1: i32, %arg2: i32) -> (i32, i32) {
    %c0_i32 = arith.constant 0 : i32
    %c0_i32_0 = arith.constant 0 : i32
    %c0_i32_1 = arith.constant 0 : i32
    return %c0_i32, %c0_i32_0 : i32, i32
  }
  func.func @transform_5(%arg0: i32, %arg1: i32, %arg2: i32) -> (i32, i32) {
    %c0_i32 = arith.constant 0 : i32
    return %arg0, %arg1 : i32, i32
  }
}

module attributes {stable_mosaic.version = 11 : i64} {
  func.func @kernel(%arg0: i32, %arg1: i32, %arg2: i32, %arg3: memref<16x64xbf16, #tpu.memory_space<vmem>>, %arg4: memref<64x32xbf16, #tpu.memory_space<vmem>>, %arg5: memref<1x32xf32, #tpu.memory_space<vmem>>, %arg6: memref<16x32xbf16, #tpu.memory_space<vmem>>, %arg7: memref<16x32xbf16, #tpu.memory_space<vmem>>, %arg8: memref<16x32xf32, #tpu.memory_space<vmem>>) attributes {dimension_semantics = [#tpu.dimension_semantics<parallel>, #tpu.dimension_semantics<parallel>, #tpu.dimension_semantics<arbitrary>], iteration_bounds = array<i64: 1, 1, 1>, scalar_prefetch = 0 : i64, scratch_operands = 1 : i64, tpu.core_type = #tpu.core_type<tc>, window_params = [{transform_indices = @transform_0, window_bounds = array<i64: 16, 64>}, {transform_indices = @transform_1, window_bounds = array<i64: 64, 32>}, {transform_indices = @transform_2, window_bounds = array<i64: 1, 32>}, {transform_indices = @transform_3, window_bounds = array<i64: 16, 32>}, {transform_indices = @transform_4, window_bounds = array<i64: 16, 32>}]} {
    %c0 = arith.constant 0 : index
    %c0_0 = arith.constant 0 : index
    %0 = vector.load %arg3[%c0, %c0_0] : memref<16x64xbf16, #tpu.memory_space<vmem>>, vector<16x64xbf16>
    %c0_i32 = arith.constant 0 : i32
    %1 = arith.cmpi eq, %arg2, %c0_i32 : i32
    %2 = arith.extui %1 : i1 to i32
    %c0_i32_1 = arith.constant 0 : i32
    %3 = arith.cmpi ne, %2, %c0_i32_1 : i32
    scf.if %3 {
      %cst_10 = arith.constant 0.000000e+00 : f32
      %12 = vector.broadcast %cst_10 : f32 to vector<16x32xf32>
      %c0_11 = arith.constant 0 : index
      %c0_12 = arith.constant 0 : index
      %13 = vector.load %arg8[%c0_11, %c0_12] : memref<16x32xf32, #tpu.memory_space<vmem>>, vector<16x32xf32>
      tpu.vector_store %arg8[%c0_11, %c0_12], %12 {strides = array<i32>} : memref<16x32xf32, #tpu.memory_space<vmem>>, vector<16x32xf32>,
    } else {
    }
    %c0_2 = arith.constant 0 : index
    %c0_3 = arith.constant 0 : index
    %4 = vector.load %arg8[%c0_2, %c0_3] : memref<16x32xf32, #tpu.memory_space<vmem>>, vector<16x32xf32>
    %c0_4 = arith.constant 0 : index
    %c0_5 = arith.constant 0 : index
    %5 = vector.load %arg4[%c0_4, %c0_5] : memref<64x32xbf16, #tpu.memory_space<vmem>>, vector<64x32xbf16>
    %cst = arith.constant dense<0.000000e+00> : vector<16x32xf32>
    %6 = tpu.matmul %0, %5, %cst {dimension_numbers = #tpu.dot_dimension_numbers<[1], [0], [0], [1], [0, 0, 1, 1], [], []>} : vector<16x64xbf16>, vector<64x32xbf16>, vector<16x32xf32> -> vector<16x32xf32>
    %7 = arith.addf %4, %6 : vector<16x32xf32>
    %c0_6 = arith.constant 0 : index
    %c0_7 = arith.constant 0 : index
    %8 = vector.load %arg8[%c0_6, %c0_7] : memref<16x32xf32, #tpu.memory_space<vmem>>, vector<16x32xf32>
    tpu.vector_store %arg8[%c0_6, %c0_7], %7 {strides = array<i32>} : memref<16x32xf32, #tpu.memory_space<vmem>>, vector<16x32xf32>,
    %c0_i32_8 = arith.constant 0 : i32
    %9 = arith.cmpi eq, %arg2, %c0_i32_8 : i32
    %10 = arith.extui %9 : i1 to i32
    %c0_i32_9 = arith.constant 0 : i32
    %11 = arith.cmpi ne, %10, %c0_i32_9 : i32
    scf.if %11 {
      %c0_10 = arith.constant 0 : index
      %c0_11 = arith.constant 0 : index
      %12 = vector.load %arg8[%c0_10, %c0_11] : memref<16x32xf32, #tpu.memory_space<vmem>>, vector<16x32xf32>
      %c0_12 = arith.constant 0 : index
      %c0_13 = arith.constant 0 : index
      %13 = vector.load %arg5[%c0_12, %c0_13] : memref<1x32xf32, #tpu.memory_space<vmem>>, vector<1x32xf32>
      %14 = vector.broadcast %13 : vector<1x32xf32> to vector<16x32xf32>
      %15 = arith.addf %12, %14 : vector<16x32xf32>
      %c0_14 = arith.constant 0 : index
      %c0_15 = arith.constant 0 : index
      %16 = vector.load %arg6[%c0_14, %c0_15] : memref<16x32xbf16, #tpu.memory_space<vmem>>, vector<16x32xbf16>
      %17 = arith.extf %16 : vector<16x32xbf16> to vector<16x32xf32>
      %18 = arith.addf %15, %17 : vector<16x32xf32>
      %19 = arith.truncf %18 : vector<16x32xf32> to vector<16x32xbf16>
      %c0_16 = arith.constant 0 : index
      %c0_17 = arith.constant 0 : index
      %20 = vector.load %arg7[%c0_16, %c0_17] : memref<16x32xbf16, #tpu.memory_space<vmem>>, vector<16x32xbf16>
      tpu.vector_store %arg7[%c0_16, %c0_17], %19 {strides = array<i32>} : memref<16x32xbf16, #tpu.memory_space<vmem>>, vector<16x32xbf16>,
    } else {
    }
    return
  }
  func.func @transform_0(%arg0: i32, %arg1: i32, %arg2: i32) -> (i32, i32) {
    %c0_i32 = arith.constant 0 : i32
    return %arg0, %arg2 : i32, i32
  }
  func.func @transform_1(%arg0: i32, %arg1: i32, %arg2: i32) -> (i32, i32) {
    %c0_i32 = arith.constant 0 : i32
    return %arg2, %arg1 : i32, i32
  }
  func.func @transform_2(%arg0: i32, %arg1: i32, %arg2: i32) -> (i32, i32) {
    %c0_i32 = arith.constant 0 : i32
    %c0_i32_0 = arith.constant 0 : i32
    return %c0_i32, %arg1 : i32, i32
  }
  func.func @transform_3(%arg0: i32, %arg1: i32, %arg2: i32) -> (i32, i32) {
    %c0_i32 = arith.constant 0 : i32
    return %arg0, %arg1 : i32, i32
  }
  func.func @transform_4(%arg0: i32, %arg1: i32, %arg2: i32) -> (i32, i32) {
    %c0_i32 = arith.constant 0 : i32
    return %arg0, %arg1 : i32, i32
  }
}

module attributes {stable_mosaic.version = 11 : i64} {
  func.func @kernel(%arg0: i32, %arg1: i32, %arg2: i32, %arg3: memref<16x32xbf16, #tpu.memory_space<vmem>>, %arg4: memref<32x64xbf16, #tpu.memory_space<vmem>>, %arg5: memref<1x32xf32, #tpu.memory_space<vmem>>, %arg6: memref<1x32xf32, #tpu.memory_space<vmem>>, %arg7: memref<16x64xf32, #tpu.memory_space<vmem>>, %arg8: memref<16x64xf32, #tpu.memory_space<vmem>>, %arg9: memref<16x32xbf16, #tpu.memory_space<vmem>>) attributes {dimension_semantics = [#tpu.dimension_semantics<parallel>, #tpu.dimension_semantics<arbitrary>, #tpu.dimension_semantics<arbitrary>], iteration_bounds = array<i64: 1, 1, 1>, scalar_prefetch = 0 : i64, scratch_operands = 2 : i64, tpu.core_type = #tpu.core_type<tc>, window_params = [{transform_indices = @transform_0, window_bounds = array<i64: 16, 32>}, {transform_indices = @transform_1, window_bounds = array<i64: 32, 64>}, {pipeline_mode = #tpu.pipeline_mode<synchronous>, transform_indices = @transform_2, window_bounds = array<i64: 1, 32>}, {pipeline_mode = #tpu.pipeline_mode<synchronous>, transform_indices = @transform_3, window_bounds = array<i64: 1, 32>}, {transform_indices = @transform_4, window_bounds = array<i64: 16, 64>}]} {
    %c0_i32 = arith.constant 0 : i32
    %0 = arith.cmpi eq, %arg1, %c0_i32 : i32
    %1 = arith.extui %0 : i1 to i32
    %c0_i32_0 = arith.constant 0 : i32
    %2 = arith.cmpi ne, %1, %c0_i32_0 : i32
    scf.if %2 {
      %c0_12 = arith.constant 0 : index
      %c0_13 = arith.constant 0 : index
      %15 = vector.load %arg3[%c0_12, %c0_13] : memref<16x32xbf16, #tpu.memory_space<vmem>>, vector<16x32xbf16>
      %16 = arith.extf %15 : vector<16x32xbf16> to vector<16x32xf32>
      %cst_14 = arith.constant dense<0.000000e+00> : vector<16xf32>
      %17 = vector.multi_reduction <add>, %16, %cst_14 [1] : vector<16x32xf32> to vector<16xf32>
      %18 = vector.shape_cast %17 : vector<16xf32> to vector<16x1xf32>
      %cst_15 = arith.constant 3.200000e+01 : f32
      %19 = vector.broadcast %cst_15 : f32 to vector<16x1xf32>
      %20 = arith.divf %18, %19 : vector<16x1xf32>
      %21 = vector.broadcast %20 : vector<16x1xf32> to vector<16x32xf32>
      %22 = arith.subf %16, %21 : vector<16x32xf32>
      %23 = arith.mulf %22, %22 : vector<16x32xf32>
      %cst_16 = arith.constant dense<0.000000e+00> : vector<16xf32>
      %24 = vector.multi_reduction <add>, %23, %cst_16 [1] : vector<16x32xf32> to vector<16xf32>
      %25 = vector.shape_cast %24 : vector<16xf32> to vector<16x1xf32>
      %cst_17 = arith.constant 3.200000e+01 : f32
      %26 = vector.broadcast %cst_17 : f32 to vector<16x1xf32>
      %27 = arith.divf %25, %26 : vector<16x1xf32>
      %28 = vector.broadcast %20 : vector<16x1xf32> to vector<16x32xf32>
      %29 = arith.subf %16, %28 : vector<16x32xf32>
      %cst_18 = arith.constant 9.99999974E-6 : f32
      %30 = vector.broadcast %cst_18 : f32 to vector<16x1xf32>
      %31 = arith.addf %27, %30 : vector<16x1xf32>
      %32 = math.rsqrt %31 : vector<16x1xf32>
      %33 = vector.broadcast %32 : vector<16x1xf32> to vector<16x32xf32>
      %34 = arith.mulf %29, %33 : vector<16x32xf32>
      %c0_19 = arith.constant 0 : index
      %c0_20 = arith.constant 0 : index
      %35 = vector.load %arg5[%c0_19, %c0_20] : memref<1x32xf32, #tpu.memory_space<vmem>>, vector<1x32xf32>
      %36 = vector.broadcast %35 : vector<1x32xf32> to vector<16x32xf32>
      %37 = arith.mulf %34, %36 : vector<16x32xf32>
      %c0_21 = arith.constant 0 : index
      %c0_22 = arith.constant 0 : index
      %38 = vector.load %arg6[%c0_21, %c0_22] : memref<1x32xf32, #tpu.memory_space<vmem>>, vector<1x32xf32>
      %39 = vector.broadcast %38 : vector<1x32xf32> to vector<16x32xf32>
      %40 = arith.addf %37, %39 : vector<16x32xf32>
      %41 = arith.truncf %40 : vector<16x32xf32> to vector<16x32xbf16>
      %c0_23 = arith.constant 0 : index
      %c0_24 = arith.constant 0 : index
      %42 = vector.load %arg9[%c0_23, %c0_24] : memref<16x32xbf16, #tpu.memory_space<vmem>>, vector<16x32xbf16>
      tpu.vector_store %arg9[%c0_23, %c0_24], %41 {strides = array<i32>} : memref<16x32xbf16, #tpu.memory_space<vmem>>, vector<16x32xbf16>,
    } else {
    }
    %c0 = arith.constant 0 : index
    %c0_1 = arith.constant 0 : index
    %3 = vector.load %arg9[%c0, %c0_1] : memref<16x32xbf16, #tpu.memory_space<vmem>>, vector<16x32xbf16>
    %c0_i32_2 = arith.constant 0 : i32
    %4 = arith.cmpi eq, %arg2, %c0_i32_2 : i32
    %5 = arith.extui %4 : i1 to i32
    %c0_i32_3 = arith.constant 0 : i32
    %6 = arith.cmpi ne, %5, %c0_i32_3 : i32
    scf.if %6 {
      %cst_12 = arith.constant 0.000000e+00 : f32
      %15 = vector.broadcast %cst_12 : f32 to vector<16x64xf32>
      %c0_13 = arith.constant 0 : index
      %c0_14 = arith.constant 0 : index
      %16 = vector.load %arg8[%c0_13, %c0_14] : memref<16x64xf32, #tpu.memory_space<vmem>>, vector<16x64xf32>
      tpu.vector_store %arg8[%c0_13, %c0_14], %15 {strides = array<i32>} : memref<16x64xf32, #tpu.memory_space<vmem>>, vector<16x64xf32>,
    } else {
    }
    %c0_4 = arith.constant 0 : index
    %c0_5 = arith.constant 0 : index
    %7 = vector.load %arg8[%c0_4, %c0_5] : memref<16x64xf32, #tpu.memory_space<vmem>>, vector<16x64xf32>
    %c0_6 = arith.constant 0 : index
    %c0_7 = arith.constant 0 : index
    %8 = vector.load %arg4[%c0_6, %c0_7] : memref<32x64xbf16, #tpu.memory_space<vmem>>, vector<32x64xbf16>
    %cst = arith.constant dense<0.000000e+00> : vector<16x64xf32>
    %9 = tpu.matmul %3, %8, %cst {dimension_numbers = #tpu.dot_dimension_numbers<[1], [0], [0], [1], [0, 0, 1, 1], [], []>} : vector<16x32xbf16>, vector<32x64xbf16>, vector<16x64xf32> -> vector<16x64xf32>
    %10 = arith.addf %7, %9 : vector<16x64xf32>
    %c0_8 = arith.constant 0 : index
    %c0_9 = arith.constant 0 : index
    %11 = vector.load %arg8[%c0_8, %c0_9] : memref<16x64xf32, #tpu.memory_space<vmem>>, vector<16x64xf32>
    tpu.vector_store %arg8[%c0_8, %c0_9], %10 {strides = array<i32>} : memref<16x64xf32, #tpu.memory_space<vmem>>, vector<16x64xf32>,
    %c0_i32_10 = arith.constant 0 : i32
    %12 = arith.cmpi eq, %arg2, %c0_i32_10 : i32
    %13 = arith.extui %12 : i1 to i32
    %c0_i32_11 = arith.constant 0 : i32
    %14 = arith.cmpi ne, %13, %c0_i32_11 : i32
    scf.if %14 {
      %c0_12 = arith.constant 0 : index
      %c0_13 = arith.constant 0 : index
      %15 = vector.load %arg8[%c0_12, %c0_13] : memref<16x64xf32, #tpu.memory_space<vmem>>, vector<16x64xf32>
      %c0_14 = arith.constant 0 : index
      %c0_15 = arith.constant 0 : index
      %16 = vector.load %arg7[%c0_14, %c0_15] : memref<16x64xf32, #tpu.memory_space<vmem>>, vector<16x64xf32>
      tpu.vector_store %arg7[%c0_14, %c0_15], %15 {strides = array<i32>} : memref<16x64xf32, #tpu.memory_space<vmem>>, vector<16x64xf32>,
    } else {
    }
    return
  }
  func.func @transform_0(%arg0: i32, %arg1: i32, %arg2: i32) -> (i32, i32) {
    %c0_i32 = arith.constant 0 : i32
    return %arg0, %arg2 : i32, i32
  }
  func.func @transform_1(%arg0: i32, %arg1: i32, %arg2: i32) -> (i32, i32) {
    %c0_i32 = arith.constant 0 : i32
    return %arg2, %arg1 : i32, i32
  }
  func.func @transform_2(%arg0: i32, %arg1: i32, %arg2: i32) -> (i32, i32) {
    %c0_i32 = arith.constant 0 : i32
    %c0_i32_0 = arith.constant 0 : i32
    %c0_i32_1 = arith.constant 0 : i32
    return %c0_i32, %c0_i32_0 : i32, i32
  }
  func.func @transform_3(%arg0: i32, %arg1: i32, %arg2: i32) -> (i32, i32) {
    %c0_i32 = arith.constant 0 : i32
    %c0_i32_0 = arith.constant 0 : i32
    %c0_i32_1 = arith.constant 0 : i32
    return %c0_i32, %c0_i32_0 : i32, i32
  }
  func.func @transform_4(%arg0: i32, %arg1: i32, %arg2: i32) -> (i32, i32) {
    %c0_i32 = arith.constant 0 : i32
    return %arg0, %arg1 : i32, i32
  }
}

</mosaic_0001>

<bundles_post_ra>
// kernel: clgpt2_forward.21
= control target key start
LH: loop header
LB: loop body
LE: loop exit
PB: predicated region body
PF: predicated region fallthrough
CT: control target
= control target key end

     0   :  { %vm24_vm0 = vcmask 261120   ;;  %v163_v0 = vmov 0.0   ;;  %vm164_vm1 = vmmov 0   ;;  %vm127_vm2 = vcmask 257024   ;;  %s216_s1 = inlined_call_operand.vmem [shape: bf16[32,32], index: 1, kind: input, shape index: {}]   ;;  %s217_s0 = inlined_call_operand.vmem [shape: bf16[16,32], index: 0, kind: input, shape index: {}]   ;;  %s218_s3 = inlined_call_operand.vmem [shape: bf16[16,32], index: 3, kind: input, shape index: {}]   ;;  %s219_s2 = inlined_call_operand.vmem [shape: f32[1,32], index: 2, kind: input, shape index: {}]   ;;  %s220_s4 = inlined_call_operand.vmem [shape: bf16[16,32], index: 4, kind: output, shape index: {}]  }
   0x1   :  { %150 = vmatprep.subr.bf16.mxu0 %v163_v0  ;;  %v160_v1 = vld [vmem:[%s216_s1] sm:$0xff]   ;;  %154 = vmatprep.mubr.msk.bf16.mxu0 %vm164_vm1, %v163_v0  ;;  %25 = vst.msk [vmem:[#allocation2] sm:$0xff] %vm24_vm0, %v163_v0  ;;  %26 = vst.msk [vmem:[#allocation2 + $0x8] sm:$0xff] %vm24_vm0, %v163_v0  ;;  %v161_v2 = vld [vmem:[%s216_s1 + $0x8] sm:$0xff]  }
   0x2   :  { %151 = vmatpush3.bf16.msra.mxu0 %v160_v1  ;;  %v162_v3 = vld [vmem:[%s217_s0] sm:$0xff]  }
   0x3   :  { %152 = vmatprep.subr.bf16.mxu0 %v163_v0  ;;  %v144_v12 = vld [vmem:[%s218_s3] sm:$0xff]  }
   0x4   :  { %v138_v13 = vld [vmem:[%s219_s2] ss:$0 sm:$0xff]  ;;  %v145_v14 = vunpack.c.l.bf16 %v144_v12  ;;  %v146_v17 = vunpack.c.h.bf16 %v144_v12 }
   0x6   :  { %153 = vmatpush3.bf16.msra.mxu0 %v161_v2 }
   0x8   :  { %v27_v4 = vld [vmem:[#allocation2] sm:$0xff]  ;;  %v28_v6 = vld [vmem:[#allocation2 + $0x8] sm:$0xff] }
   0x9   :  { %155 = vmatmul.mubr.msk.bf16.vlgmr.msra.gmra.mrb[0].mxu0 %vm24_vm0, %v162_v3 }
  0xdc   :  { %v88_v5 = vpop.f32.mrb[0].mxu0 }
  0xdd   :  { %v95_v7 = vadd.f32 %v88_v5, %v27_v4  ;;  %v156_v8 = vpop.f32.mrb[1].mxu0 }
  0xde   :  { %v91_v9 = vpop.f32.mrb[2].mxu0 }
  0xdf   :  { %97 = vst.msk [vmem:[#allocation2] sm:$0xff] %vm24_vm0, %v95_v7  ;;  %v96_v10 = vadd.f32 %v91_v9, %v28_v6  ;;  %v157_v11 = vpop.f32.mrb[3].mxu0 }
  0xe1   :  { %98 = vst.msk [vmem:[#allocation2 + $0x8] sm:$0xff] %vm24_vm0, %v96_v10 }
  0xe6   :  { %v102_v15 = vld [vmem:[#allocation2] sm:$0xff] }
  0xe7   :  { %v111_v16 = vadd.f32 %v138_v13, %v102_v15 }
  0xe8   :  { %v103_v18 = vld [vmem:[#allocation2 + $0x8] sm:$0xff] }
  0xe9   :  { %v117_v19 = vadd.f32 %v145_v14, %v111_v16  ;;  %v112_v20 = vadd.f32 %v138_v13, %v103_v18 }
  0xeb   :  { %v141_v21 = vpack.c.bf16 %v117_v19, %v117_v19  ;;  %v118_v22 = vadd.f32 %v146_v17, %v112_v20 }
  0xed   :  { %128 = vst.msk [vmem:[%s220_s4] sm:$0xf] %vm127_vm2, %v141_v21  ;;  %v142_v23 = vpack.c.bf16 %v118_v22, %v118_v22 }
  0xef   :  { %129 = vst.msk [vmem:[%s220_s4 + $0x4] sm:$0xf] %vm127_vm2, %v142_v23 }

// kernel: clgpt2_forward.19
= control target key start
LH: loop header
LB: loop body
LE: loop exit
PB: predicated region body
PF: predicated region fallthrough
CT: control target
= control target key end

     0   :  { %vm29_vm0 = vcmask 261120   ;;  %v215_v16 = vmov 0.0   ;;  %vm216_vm1 = vmmov 0   ;;  %vm82_vm2 = vcmask 785408   ;;  %s281_s0 = inlined_call_operand.vmem [shape: bf16[16,32], index: 0, kind: input, shape index: {}]   ;;  %s282_s1 = inlined_call_operand.vmem [shape: bf16[32,96], index: 1, kind: input, shape index: {}]   ;;  %s283_s3 = inlined_call_operand.vmem [shape: f32[1,32], index: 3, kind: input, shape index: {}]   ;;  %s284_s4 = inlined_call_operand.vmem [shape: f32[1,32], index: 4, kind: input, shape index: {}]   ;;  %s285_s2 = inlined_call_operand.vmem [shape: f32[1,96], index: 2, kind: input, shape index: {}]   ;;  %s286_s5 = inlined_call_operand.vmem [shape: bf16[16,96], index: 5, kind: output, shape index: {}]  }
   0x1   :  { %v193_v0 = vld [vmem:[%s281_s0] sm:$0xff]   ;;  %199 = vmatprep.subr.bf16.mxu0 %v215_v16  ;;  %v210_v17 = vld [vmem:[%s282_s1 + $0x8] sm:$0xff]   ;;  %203 = vmatprep.mubr.msk.bf16.mxu0 %vm216_vm1, %v215_v16  ;;  %83 = vst.msk [vmem:[#allocation2] sm:$0xff] %vm82_vm2, %v215_v16  ;;  %84 = vst.msk [vmem:[#allocation2 + $0x8] sm:$0xff] %vm82_vm2, %v215_v16  ;;  %vm175_vm3 = vcmask 781312  }
   0x2   :  { %v194_v1 = vunpack.c.l.bf16 %v193_v0  ;;  %v195_v2 = vunpack.c.h.bf16 %v193_v0  ;;  %v209_v15 = vld [vmem:[%s282_s1] sm:$0xff]  }
   0x3   :  { %200 = vmatpush3.bf16.msra.mxu0 %v209_v15  ;;  %v182_v26 = vld [vmem:[%s283_s3] ss:$0 sm:$0xff] }
   0x4   :  { %v30_v3 = vsel %vm29_vm0, %v194_v1, 0.0  ;;  %v33_v4 = vsel %vm29_vm0, %v195_v2, 0.0  ;;  %201 = vmatprep.subr.bf16.mxu0 %v215_v16  ;;  %v183_v30 = vld [vmem:[%s284_s4] ss:$0 sm:$0xff] }
   0x5   :  { %31 = vadd.xlane.f32.xlu0 %v30_v3  ;;  %v187_v44 = vld [vmem:[%s285_s2] ss:$0 sm:$0xff] }
   0x7   :  { %202 = vmatpush3.bf16.msra.mxu0 %v210_v17 }
   0x8   :  { %v85_v36 = vld [vmem:[#allocation2] sm:$0xff]  ;;  %v86_v38 = vld [vmem:[#allocation2 + $0x8] sm:$0xff] }
   0x9   :  { %34 = vadd.xlane.f32.xlu0 %v33_v4 }
  0x92   :  { %v32_v5 = vpop.xlane.xlu0 %31 }
  0x93   :  { %v37_v6 = vmul.f32 0.03125, %v32_v5 }
  0x95   :  { %v39_v7 = vsub.f32 %v194_v1, %v37_v6 }
  0x96   :  { %v35_v8 = vpop.xlane.xlu0 %34 }
  0x97   :  { %v38_v9 = vmul.f32 0.03125, %v35_v8  ;;  %v41_v10 = vmul.f32 %v39_v7, %v39_v7 }
  0x99   :  { %v40_v11 = vsub.f32 %v195_v2, %v38_v9  ;;  %v43_v12 = vsel %vm29_vm0, %v41_v10, 0.0 }
  0x9a   :  { %44 = vadd.xlane.f32.xlu1 %v43_v12 }
  0x9b   :  { %v42_v13 = vmul.f32 %v40_v11, %v40_v11 }
  0x9d   :  { %v46_v14 = vsel %vm29_vm0, %v42_v13, 0.0 }
  0x9e   :  { %47 = vadd.xlane.f32.xlu1 %v46_v14 }
 0x127   :  { %v45_v18 = vpop.xlane.xlu1 %44 }
 0x128   :  { %v49_v19 = vmul.f32 0.03125, %v45_v18 }
 0x12a   :  { %v51_v20 = vadd.f32 1e-05, %v49_v19 }
 0x12b   :  { %v48_v21 = vpop.xlane.xlu1 %47 }
 0x12c   :  { %211 = vrsqrt.f32 %v51_v20  ;;  %v50_v22 = vmul.f32 0.03125, %v48_v21 }
 0x12e   :  { %v52_v23 = vadd.f32 1e-05, %v50_v22 }
 0x130   :  { %213 = vrsqrt.f32 %v52_v23 }
 0x136   :  { %v212_v24 = vpop.eup %211 }
 0x137   :  { %v55_v25 = vmul.f32 %v212_v24, %v39_v7 }
 0x139   :  { %v64_v28 = vmul.f32 %v182_v26, %v55_v25 }
 0x13a   :  { %v214_v27 = vpop.eup %213 }
 0x13b   :  { %v56_v29 = vmul.f32 %v214_v27, %v40_v11  ;;  %v73_v32 = vadd.f32 %v183_v30, %v64_v28 }
 0x13d   :  { %v65_v31 = vmul.f32 %v182_v26, %v56_v29 }
 0x13f   :  { %v74_v33 = vadd.f32 %v183_v30, %v65_v31 }
 0x141   :  { %v75_v34 = vpack.c.bf16 %v74_v33, %v73_v32 }
 0x143   :  { %76 = vst.msk [vmem:[#allocation3] sm:$0xff] %vm29_vm0, %v75_v34 }
 0x14a   :  { %v77_v35 = vld [vmem:[#allocation3] sm:$0xff] }
 0x14b   :  { %204 = vmatmul.mubr.msk.bf16.vlgmr.msra.gmra.mrb[0].mxu0 %vm29_vm0, %v77_v35 }
 0x21e   :  { %v141_v37 = vpop.f32.mrb[0].mxu0 }
 0x21f   :  { %v148_v39 = vadd.f32 %v141_v37, %v85_v36  ;;  %v205_v40 = vpop.f32.mrb[1].mxu0 }
 0x220   :  { %v144_v41 = vpop.f32.mrb[2].mxu0 }
 0x221   :  { %151 = vst.msk [vmem:[#allocation2] sm:$0xff] %vm82_vm2, %v148_v39  ;;  %v149_v42 = vadd.f32 %v144_v41, %v86_v38  ;;  %v206_v43 = vpop.f32.mrb[3].mxu0 }
 0x223   :  { %152 = vst.msk [vmem:[#allocation2 + $0x8] sm:$0xff] %vm82_vm2, %v149_v42 }
 0x228   :  { %v156_v45 = vld [vmem:[#allocation2] sm:$0xff] }
 0x229   :  { %v165_v46 = vadd.f32 %v187_v44, %v156_v45 }
 0x22a   :  { %v157_v47 = vld [vmem:[#allocation2 + $0x8] sm:$0xff] }
 0x22b   :  { %v190_v48 = vpack.c.bf16 %v165_v46, %v165_v46  ;;  %v166_v49 = vadd.f32 %v187_v44, %v157_v47 }
 0x22d   :  { %176 = vst.msk [vmem:[%s286_s5] sm:$0xf] %vm175_vm3, %v190_v48  ;;  %v191_v50 = vpack.c.bf16 %v166_v49, %v166_v49 }
 0x22f   :  { %177 = vst.msk [vmem:[%s286_s5 + $0x4] sm:$0xf] %vm175_vm3, %v191_v50 }

// kernel: clgpt2_forward.22
= control target key start
LH: loop header
LB: loop body
LE: loop exit
PB: predicated region body
PF: predicated region fallthrough
CT: control target
= control target key end

     0   :  { %vm29_vm0 = vcmask 261120   ;;  %v214_v16 = vmov 0.0   ;;  %vm215_vm1 = vmmov 0   ;;  %vm174_vm2 = vcmask 257024   ;;  %s280_s0 = inlined_call_operand.vmem [shape: bf16[16,32], index: 0, kind: input, shape index: {}]   ;;  %s281_s1 = inlined_call_operand.vmem [shape: bf16[32,32], index: 1, kind: input, shape index: {}]   ;;  %s282_s3 = inlined_call_operand.vmem [shape: f32[1,32], index: 3, kind: input, shape index: {}]   ;;  %s283_s4 = inlined_call_operand.vmem [shape: f32[1,32], index: 4, kind: input, shape index: {}]   ;;  %s284_s2 = inlined_call_operand.vmem [shape: f32[1,32], index: 2, kind: input, shape index: {}]   ;;  %s285_s5 = inlined_call_operand.vmem [shape: bf16[16,32], index: 5, kind: output, shape index: {}]  }
   0x1   :  { %v192_v0 = vld [vmem:[%s280_s0] sm:$0xff]   ;;  %198 = vmatprep.subr.bf16.mxu0 %v214_v16  ;;  %83 = vst.msk [vmem:[#allocation2] sm:$0xff] %vm29_vm0, %v214_v16  ;;  %84 = vst.msk [vmem:[#allocation2 + $0x8] sm:$0xff] %vm29_vm0, %v214_v16  ;;  %v209_v17 = vld [vmem:[%s281_s1 + $0x8] sm:$0xff]   ;;  %202 = vmatprep.mubr.msk.bf16.mxu0 %vm215_vm1, %v214_v16 }
   0x2   :  { %v193_v1 = vunpack.c.l.bf16 %v192_v0  ;;  %v194_v2 = vunpack.c.h.bf16 %v192_v0  ;;  %v208_v15 = vld [vmem:[%s281_s1] sm:$0xff]  }
   0x3   :  { %199 = vmatpush3.bf16.msra.mxu0 %v208_v15  ;;  %v181_v26 = vld [vmem:[%s282_s3] ss:$0 sm:$0xff] }
   0x4   :  { %v30_v3 = vsel %vm29_vm0, %v193_v1, 0.0  ;;  %v33_v4 = vsel %vm29_vm0, %v194_v2, 0.0  ;;  %200 = vmatprep.subr.bf16.mxu0 %v214_v16  ;;  %v182_v30 = vld [vmem:[%s283_s4] ss:$0 sm:$0xff] }
   0x5   :  { %31 = vadd.xlane.f32.xlu0 %v30_v3  ;;  %v186_v44 = vld [vmem:[%s284_s2] ss:$0 sm:$0xff] }
   0x7   :  { %201 = vmatpush3.bf16.msra.mxu0 %v209_v17 }
   0x8   :  { %v85_v36 = vld [vmem:[#allocation2] sm:$0xff]  ;;  %v86_v38 = vld [vmem:[#allocation2 + $0x8] sm:$0xff] }
   0x9   :  { %34 = vadd.xlane.f32.xlu0 %v33_v4 }
  0x92   :  { %v32_v5 = vpop.xlane.xlu0 %31 }
  0x93   :  { %v37_v6 = vmul.f32 0.03125, %v32_v5 }
  0x95   :  { %v39_v7 = vsub.f32 %v193_v1, %v37_v6 }
  0x96   :  { %v35_v8 = vpop.xlane.xlu0 %34 }
  0x97   :  { %v38_v9 = vmul.f32 0.03125, %v35_v8  ;;  %v41_v10 = vmul.f32 %v39_v7, %v39_v7 }
  0x99   :  { %v40_v11 = vsub.f32 %v194_v2, %v38_v9  ;;  %v43_v12 = vsel %vm29_vm0, %v41_v10, 0.0 }
  0x9a   :  { %44 = vadd.xlane.f32.xlu1 %v43_v12 }
  0x9b   :  { %v42_v13 = vmul.f32 %v40_v11, %v40_v11 }
  0x9d   :  { %v46_v14 = vsel %vm29_vm0, %v42_v13, 0.0 }
  0x9e   :  { %47 = vadd.xlane.f32.xlu1 %v46_v14 }
 0x127   :  { %v45_v18 = vpop.xlane.xlu1 %44 }
 0x128   :  { %v49_v19 = vmul.f32 0.03125, %v45_v18 }
 0x12a   :  { %v51_v20 = vadd.f32 1e-05, %v49_v19 }
 0x12b   :  { %v48_v21 = vpop.xlane.xlu1 %47 }
 0x12c   :  { %210 = vrsqrt.f32 %v51_v20  ;;  %v50_v22 = vmul.f32 0.03125, %v48_v21 }
 0x12e   :  { %v52_v23 = vadd.f32 1e-05, %v50_v22 }
 0x130   :  { %212 = vrsqrt.f32 %v52_v23 }
 0x136   :  { %v211_v24 = vpop.eup %210 }
 0x137   :  { %v55_v25 = vmul.f32 %v211_v24, %v39_v7 }
 0x139   :  { %v64_v28 = vmul.f32 %v181_v26, %v55_v25 }
 0x13a   :  { %v213_v27 = vpop.eup %212 }
 0x13b   :  { %v56_v29 = vmul.f32 %v213_v27, %v40_v11  ;;  %v73_v32 = vadd.f32 %v182_v30, %v64_v28 }
 0x13d   :  { %v65_v31 = vmul.f32 %v181_v26, %v56_v29 }
 0x13f   :  { %v74_v33 = vadd.f32 %v182_v30, %v65_v31 }
 0x141   :  { %v75_v34 = vpack.c.bf16 %v74_v33, %v73_v32 }
 0x143   :  { %76 = vst.msk [vmem:[#allocation3] sm:$0xff] %vm29_vm0, %v75_v34 }
 0x14a   :  { %v77_v35 = vld [vmem:[#allocation3] sm:$0xff] }
 0x14b   :  { %203 = vmatmul.mubr.msk.bf16.vlgmr.msra.gmra.mrb[0].mxu0 %vm29_vm0, %v77_v35 }
 0x21e   :  { %v141_v37 = vpop.f32.mrb[0].mxu0 }
 0x21f   :  { %v148_v39 = vadd.f32 %v141_v37, %v85_v36  ;;  %v204_v40 = vpop.f32.mrb[1].mxu0 }
 0x220   :  { %v144_v41 = vpop.f32.mrb[2].mxu0 }
 0x221   :  { %150 = vst.msk [vmem:[#allocation2] sm:$0xff] %vm29_vm0, %v148_v39  ;;  %v149_v42 = vadd.f32 %v144_v41, %v86_v38  ;;  %v205_v43 = vpop.f32.mrb[3].mxu0 }
 0x223   :  { %151 = vst.msk [vmem:[#allocation2 + $0x8] sm:$0xff] %vm29_vm0, %v149_v42 }
 0x228   :  { %v155_v45 = vld [vmem:[#allocation2] sm:$0xff] }
 0x229   :  { %v164_v46 = vadd.f32 %v186_v44, %v155_v45 }
 0x22a   :  { %v156_v47 = vld [vmem:[#allocation2 + $0x8] sm:$0xff] }
 0x22b   :  { %v189_v48 = vpack.c.bf16 %v164_v46, %v164_v46  ;;  %v165_v49 = vadd.f32 %v186_v44, %v156_v47 }
 0x22d   :  { %175 = vst.msk [vmem:[%s285_s5] sm:$0xf] %vm174_vm2, %v189_v48  ;;  %v190_v50 = vpack.c.bf16 %v165_v49, %v165_v49 }
 0x22f   :  { %176 = vst.msk [vmem:[%s285_s5 + $0x4] sm:$0xf] %vm174_vm2, %v190_v50 }

// kernel: clgpt2_forward.20
= control target key start
LH: loop header
LB: loop body
LE: loop exit
PB: predicated region body
PF: predicated region fallthrough
CT: control target
= control target key end

     0   :  { %s969_s9 = smov 0   ;;  %s971_s10 = smov 0   ;;  %s1080_s0 = inlined_call_operand.vmem [shape: bf16[2,8,96], index: 0, kind: input, shape index: {}, may-alias: {0,1}]   ;;  %s1081_s1 = inlined_call_operand.vmem [shape: bf16[2,8,96], index: 1, kind: input, shape index: {}, may-alias: {0,1}]   ;;  %s1082_s2 = inlined_call_operand.vmem [shape: bf16[2,8,32], index: 2, kind: output, shape index: {}]  }
   0x1   :  { %s973_s11 = smov 0  }
   0x2 LB: > { %s24_s12 = sadd.s32 1, %s931_s10  ;;  %p770_p0 = scmp.ge.s32.totalorder %s935_s11, 1  ;;  %s935_s11 = sphi %s973_s11, %s12_s11   ;;  %s931_s10 = sphi %s971_s10, %s1084_s10   ;;  %s927_s9 = sphi %s969_s9, %s1083_s9  }
   0x3   : > { %p26_p1 = scmp.ge.s32.totalorder %s24_s12, 2  ;;  %p139_p2 = scmp.lt.s32.totalorder %s935_s11, 3 }
   0x5   : > { %s1086_s12 = smov (%p26_p1, %s24_s12), 0  ;;  %p140_p3 = pnand %p770_p0, %p139_p2 }
   0x6   : > { %p169_p4 = scmp.lt.s32.totalorder (!%p140_p3), %s927_s9, 1  ;;  %v937_v0 = vmov (!%p140_p3), 0.0   ;;  %vm938_vm0 = vmmov (!%p140_p3), 0   ;;  %s939_s17 = smov (!%p140_p3), 96   ;;  %vm207_vm1 = vcmask (!%p140_p3), 64512   ;;  %v194_v8 = vlaneseq (!%p140_p3) }
   0x7   : > { %143 = sbr.rel (%p140_p3) target bundleno = 1600 (0x640), region = 28  ;;  %807 = vmatprep.subr.bf16.mxu0 (!%p140_p3), %v937_v0  ;;  %809 = vmatprep.mubr.msk.bf16.mxu0 (!%p140_p3), %vm938_vm0, %v937_v0  ;;  %s940_s21 = smov (!%p140_p3), 64   ;;  %v942_v11 = vmov (!%p140_p3), -1e+09   ;;  %vm272_vm3 = vcmask (!%p140_p3), 1043456   ;;  %vm317_vm4 = vcmask (!%p140_p3), 60416  }
   0x8   : > { %813 = vmatprep.subr.bf16.mxu1 (!%p140_p3), %v937_v0  ;;  %815 = vmatprep.mubr.msk.bf16.mxu1 (!%p140_p3), %vm938_vm0, %v937_v0  ;;  %s941_s22 = smov (!%p140_p3), 88   ;;  %v195_v9 = vshrl.u32 (!%p140_p3), %v194_v8, 7  ;;  %v199_v10 = vand.u32 (!%p140_p3), 127, %v194_v8  ;;  %s943_s23 = smov (!%p140_p3), 72   ;;  %vm438_vm5 = vcmask (!%p140_p3), 126016   ;;  %vm558_vm6 = vcmask (!%p140_p3), 191616  }
   0x9   : > { %s944_s24 = smov (!%p140_p3), 120   ;;  %s945_s25 = smov (!%p140_p3), 80   ;;  %vm678_vm7 = vcmask (!%p140_p3), 257216  }
   0xa   : > { %vm200_vm2 = vcmp.le.s32.totalorder (!%p140_p3), %v199_v10, %v195_v9  ;;  %s946_s26 = smov (!%p140_p3), 112   ;;  %s947_s27 = smov (!%p140_p3), 104  }
   0xb   : > { %v1013_v12 = vsel (!%p140_p3), %vm200_vm2, 0.0, %v942_v11  ;;  %s948_s3 = smov (!%p140_p3), 56   ;;  %s949_s4 = smov (!%p140_p3), 48  }
   0xc   : > { %s950_s5 = smov (!%p140_p3), 40   ;;  %s951_s6 = smov (!%p140_p3), 8  }
   0xd   : > { %s952_s7 = smov (!%p140_p3), 16   ;;  %s953_s8 = smov (!%p140_p3), 24  }
   0xe   : > { %s1088_s9 = smov (!%p169_p4, %s927_s9), 1 }
   0xf   : > { %s993_s13 = sshll.u32 %s1088_s9, 2 }
  0x10   : > { %s179_s16 = scalar_lea.vmem %s1081_s1, %s993_s13  ;;  %s175_s20 = scalar_lea.vmem %s1080_s0, %s993_s13 }
  0x11   : > { %v999_v1 = vld [vmem:[%s179_s16] ss:$0 sps:$4 sm:$0xff]   ;;  %s1041_s30 = scalar_lea.vmem %s1082_s2, %s993_s13 }
  0x12   : > { %205 = vrot.lane.b32.xlu0 %v999_v1, %s939_s17  ;;  %v188_v2 = vld [vmem:[%s175_s20] sm:$0xf]  ;;  %267 = vrot.lane.b32.xlu1 %v999_v1, %s940_s21 }
  0x13   : > { %v189_v3 = vunpack.c.l.bf16 %v188_v2 }
  0x15   : > { %v190_v6 = vmul.f32 0.35355338, %v189_v3 }
  0x16   : > { %322 = vrot.lane.b32.xlu1 %v999_v1, %s941_s22 }
  0x17   : > { %v191_v7 = vpack.c.bf16 %v190_v6, %v190_v6 }
  0x84   : > { %v206_v4 = vpop.permute.xlu0 %205  ;;  %v268_v19 = vpop.permute.xlu1 %267 }
  0x85   : > { %v212_v5 = vsel %vm207_vm1, %v206_v4, 0  ;;  %v274_v20 = vsel %vm272_vm3, %v268_v19, 0 }
  0x86   : > { %808 = vmatpush3.bf16.xpose.msra.mxu0 %v212_v5  ;;  %814 = vmatpush3.bf16.msra.mxu1 %v274_v20 }
  0x87   : > { %825 = vmatprep.subr.bf16.mxu0 %v937_v0  ;;  %819 = vmatprep.subr.bf16.mxu1 %v937_v0 }
  0x88   : > { %v323_v26 = vpop.permute.xlu1 %322 }
  0x89   : > { %v328_v32 = vsel %vm207_vm1, %v323_v26, 0 }
  0x8d   : > { %810 = vmatmul.mubr.msk.bf16.vlgmr.msra.gmra.mrb[0].mxu0 %vm207_vm1, %v191_v7 }
  0x8e   : > { %827 = vmatprep.mubr.msk.bf16.mxu0 %vm938_vm0, %v937_v0 }
 0x160   : > { %v248_v13 = vpop.f32.mrb[0].mxu0 }
 0x161   : > { %v249_v14 = vadd.f32 %v248_v13, %v1013_v12  ;;  %v811_v15 = vpop.f32.mrb[1].mxu0 }
 0x162   : > { %v251_v16 = vpop.f32.mrb[2].mxu0 }
 0x163   : > { %v812_v17 = vpop.f32.mrb[3].mxu0  ;;  %v254_v18 = vsel %vm207_vm1, %v249_v14, -inf }
 0x164   : > { %255 = vmax.xlane.f32.xlu0 %v254_v18 }
 0x17a   : > { %562 = vrot.lane.b32.xlu0 %v999_v1, %s943_s23 }
 0x1f1   : > { %v256_v21 = vpop.xlane.xlu0 %255 }
 0x1f2   : > { %v257_v22 = vsub.f32 %v249_v14, %v256_v21 }
 0x1f4   : > { %v258_v23 = vmul.f32 1.442695, %v257_v22 }
 0x1f5   : > { %v563_v35 = vpop.permute.xlu0 %562 }
 0x1f6   : > { %897 = vpow2.f32 %v258_v23  ;;  %v568_v37 = vsel %vm207_vm1, %v563_v35, 0 }
 0x200   : > { %v898_v24 = vpop.eup %897 }
 0x201   : > { %v260_v25 = vsel %vm207_vm1, %v898_v24, 0.0 }
 0x202   : > { %261 = vadd.xlane.f32.xlu1 %v260_v25 }
 0x213   : > { %320 = vrot.lane.b32.xlu1 %v191_v7, %s944_s24 }
 0x217   : > { %442 = vrot.lane.b32.xlu1 %v999_v1, %s945_s25 }
 0x21b   : > { %440 = vrot.lane.b32.xlu1 %v191_v7, %s946_s26 }
 0x21f   : > { %560 = vrot.lane.b32.xlu1 %v191_v7, %s947_s27 }
 0x28f   : > { %v262_v27 = vpop.xlane.xlu1 %261 }
 0x290   : > { %899 = vrcp.f32 %v262_v27 }
 0x293   : > { %v321_v30 = vpop.permute.xlu1 %320 }
 0x297   : > { %v443_v33 = vpop.permute.xlu1 %442 }
 0x298   : > { %v448_v34 = vsel %vm207_vm1, %v443_v33, 0 }
 0x29a   : > { %v900_v28 = vpop.eup %899 }
 0x29b   : > { %v265_v29 = vmul.f32 %v900_v28, %v898_v24  ;;  %v441_v36 = vpop.permute.xlu1 %440 }
 0x29d   : > { %v266_v31 = vpack.c.bf16 %v265_v29, %v265_v29 }
 0x29f   : > { %816 = vmatmul.mubr.msk.bf16.vlgmr.msra.gmra.mrb[0].mxu1 %vm207_vm1, %v266_v31  ;;  %v561_v38 = vpop.permute.xlu1 %560 }
 0x2a0   : > { %820 = vmatpush3.bf16.xpose.msra.mxu1 %v328_v32  ;;  %821 = vmatprep.mubr.msk.bf16.mxu1 %vm938_vm0, %v937_v0 }
 0x2a1   : > { %831 = vmatprep.subr.bf16.mxu1 %v937_v0 }
 0x2a7   : > { %822 = vmatmul.mubr.msk.bf16.vlgmr.msra.gmra.mrb[4].mxu1 %vm207_vm1, %v321_v30 }
 0x2a8   : > { %832 = vmatpush3.bf16.xpose.msra.mxu1 %v448_v34  ;;  %833 = vmatprep.mubr.msk.bf16.mxu1 %vm938_vm0, %v937_v0 }
 0x2a9   : > { %843 = vmatprep.subr.bf16.mxu1 %v937_v0 }
 0x2af   : > { %834 = vmatmul.mubr.msk.bf16.vlgmr.msra.gmra.mrb[8].mxu1 %vm207_vm1, %v441_v36 }
 0x2b0   : > { %844 = vmatpush3.bf16.xpose.msra.mxu1 %v568_v37  ;;  %845 = vmatprep.mubr.msk.bf16.mxu1 %vm938_vm0, %v937_v0 }
 0x2b7   : > { %846 = vmatmul.mubr.msk.bf16.vlgmr.msra.gmra.mrb[12].mxu1 %vm207_vm1, %v561_v38 }
 0x372   : > { %v310_v39 = vpop.f32.mrb[0].mxu1 }
 0x373   : > { %v316_v40 = vpack.c.bf16 %v310_v39, %v310_v39  ;;  %v817_v41 = vpop.f32.mrb[1].mxu1 }
 0x374   : > { %v313_v42 = vpop.f32.mrb[2].mxu1 }
 0x375   : > { %318 = vst.msk [vmem:[%s1041_s30] sm:$0xf] %vm317_vm4, %v316_v40  ;;  %v818_v43 = vpop.f32.mrb[3].mxu1 }
 0x37a   : > { %v364_v44 = vpop.f32.mrb[4].mxu1 }
 0x37b   : > { %v365_v45 = vadd.f32 %v364_v44, %v1013_v12  ;;  %v823_v46 = vpop.f32.mrb[5].mxu1 }
 0x37c   : > { %v367_v47 = vpop.f32.mrb[6].mxu1 }
 0x37d   : > { %v824_v48 = vpop.f32.mrb[7].mxu1  ;;  %v370_v49 = vsel %vm207_vm1, %v365_v45, -inf }
 0x37e   : > { %371 = vmax.xlane.f32.xlu1 %v370_v49 }
 0x382   : > { %v484_v50 = vpop.f32.mrb[8].mxu1 }
 0x383   : > { %v485_v51 = vadd.f32 %v484_v50, %v1013_v12  ;;  %v835_v52 = vpop.f32.mrb[9].mxu1 }
 0x384   : > { %v487_v53 = vpop.f32.mrb[10].mxu1 }
 0x385   : > { %v490_v54 = vsel %vm207_vm1, %v485_v51, -inf  ;;  %v836_v55 = vpop.f32.mrb[11].mxu1 }
 0x386   : > { %491 = vmax.xlane.f32.xlu0 %v490_v54 }
 0x38a   : > { %v604_v56 = vpop.f32.mrb[12].mxu1 }
 0x38b   : > { %v605_v57 = vadd.f32 %v604_v56, %v1013_v12  ;;  %v847_v58 = vpop.f32.mrb[13].mxu1 }
 0x38c   : > { %v607_v59 = vpop.f32.mrb[14].mxu1 }
 0x38d   : > { %v610_v60 = vsel %vm207_vm1, %v605_v57, -inf  ;;  %v848_v61 = vpop.f32.mrb[15].mxu1 }
 0x38e   : > { %611 = vmax.xlane.f32.xlu1 %v610_v60 }
 0x40b   : > { %v372_v62 = vpop.xlane.xlu1 %371 }
 0x40c   : > { %v373_v63 = vsub.f32 %v365_v45, %v372_v62 }
 0x40e   : > { %v374_v2 = vmul.f32 1.442695, %v373_v63 }
 0x410   : > { %901 = vpow2.f32 %v374_v2 }
 0x413   : > { %v492_v10 = vpop.xlane.xlu0 %491 }
 0x414   : > { %v493_v11 = vsub.f32 %v485_v51, %v492_v10 }
 0x416   : > { %v494_v12 = vmul.f32 1.442695, %v493_v11 }
 0x41a   : > { %v902_v3 = vpop.eup %901 }
 0x41b   : > { %v612_v4 = vpop.xlane.xlu1 %611  ;;  %v376_v5 = vsel %vm207_vm1, %v902_v3, 0.0 }
 0x41c   : > { %v613_v6 = vsub.f32 %v605_v57, %v612_v4  ;;  %377 = vadd.xlane.f32.xlu1 %v376_v5 }
 0x41e   : > { %v614_v7 = vmul.f32 1.442695, %v613_v6 }
 0x420   : > { %903 = vpow2.f32 %v614_v7 }
 0x421   : > { %905 = vpow2.f32 %v494_v12 }
 0x42a   : > { %v904_v8 = vpop.eup %903 }
 0x42b   : > { %v616_v9 = vsel %vm207_vm1, %v904_v8, 0.0  ;;  %v906_v13 = vpop.eup %905 }
 0x42c   : > { %617 = vadd.xlane.f32.xlu0 %v616_v9  ;;  %v496_v14 = vsel %vm207_vm1, %v906_v13, 0.0 }
 0x42d   : > { %383 = vrot.lane.b32.xlu1 %v999_v1, %s948_s3 }
 0x442   : > { %503 = vrot.lane.b32.xlu0 %v999_v1, %s949_s4 }
 0x451   : > { %497 = vadd.xlane.f32.xlu1 %v496_v14 }
 0x462   : > { %623 = vrot.lane.b32.xlu1 %v999_v1, %s950_s5 }
 0x4a9   : > { %v378_v15 = vpop.xlane.xlu1 %377 }
 0x4aa   : > { %907 = vrcp.f32 %v378_v15 }
 0x4ad   : > { %v384_v16 = vpop.permute.xlu1 %383 }
 0x4ae   : > { %v389_v17 = vsel %vm272_vm3, %v384_v16, 0 }
 0x4af   : > { %826 = vmatpush3.bf16.msra.mxu0 %v389_v17 }
 0x4b0   : > { %837 = vmatprep.subr.bf16.mxu0 %v937_v0 }
 0x4b4   : > { %v908_v18 = vpop.eup %907 }
 0x4b5   : > { %v381_v19 = vmul.f32 %v908_v18, %v902_v3 }
 0x4b7   : > { %v382_v20 = vpack.c.bf16 %v381_v19, %v381_v19 }
 0x4b9   : > { %828 = vmatmul.mubr.msk.bf16.vlgmr.msra.gmra.mrb[4].mxu0 %vm207_vm1, %v382_v20  ;;  %v618_v21 = vpop.xlane.xlu0 %617 }
 0x4ba   : > { %839 = vmatprep.mubr.msk.bf16.mxu0 %vm938_vm0, %v937_v0 }
 0x4bd   : > { %v504_v22 = vpop.permute.xlu0 %503 }
 0x4be   : > { %v509_v1 = vsel %vm272_vm3, %v504_v22, 0 }
 0x4bf   : > { %838 = vmatpush3.bf16.msra.mxu0 %v509_v1 }
 0x4c0   : > { %849 = vmatprep.subr.bf16.mxu0 %v937_v0 }
 0x4de   : > { %v498_v23 = vpop.xlane.xlu1 %497 }
 0x4df   : > { %909 = vrcp.f32 %v498_v23 }
 0x4e0   : > { %911 = vrcp.f32 %v618_v21 }
 0x4e2   : > { %v624_v25 = vpop.permute.xlu1 %623 }
 0x4e3   : > { %v629_v27 = vsel %vm272_vm3, %v624_v25, 0 }
 0x4e9   : > { %v910_v24 = vpop.eup %909 }
 0x4ea   : > { %v501_v26 = vmul.f32 %v910_v24, %v906_v13  ;;  %v912_v29 = vpop.eup %911 }
 0x4eb   : > { %v621_v30 = vmul.f32 %v912_v29, %v904_v8 }
 0x4ec   : > { %v502_v28 = vpack.c.bf16 %v501_v26, %v501_v26 }
 0x4ed   : > { %v622_v31 = vpack.c.bf16 %v621_v30, %v621_v30 }
 0x4ee   : > { %840 = vmatmul.mubr.msk.bf16.vlgmr.msra.gmra.mrb[8].mxu0 %vm207_vm1, %v502_v28 }
 0x4ef   : > { %850 = vmatpush3.bf16.msra.mxu0 %v629_v27  ;;  %851 = vmatprep.mubr.msk.bf16.mxu0 %vm938_vm0, %v937_v0 }
 0x4f6   : > { %852 = vmatmul.mubr.msk.bf16.vlgmr.msra.gmra.mrb[12].mxu0 %vm207_vm1, %v622_v31 }
 0x58c   : > { %v425_v32 = vpop.f32.mrb[4].mxu0 }
 0x58d   : > { %v788_v33 = vpack.c.bf16 %v425_v32, %v425_v32  ;;  %v829_v34 = vpop.f32.mrb[5].mxu0 }
 0x58e   : > { %v428_v35 = vpop.f32.mrb[6].mxu0 }
 0x58f   : > { %435 = vrot.lane.b32.xlu1 %v788_v33, %s951_s6  ;;  %v830_v36 = vpop.f32.mrb[7].mxu0 }
 0x5c1   : > { %v545_v37 = vpop.f32.mrb[8].mxu0 }
 0x5c2   : > { %v789_v38 = vpack.c.bf16 %v545_v37, %v545_v37  ;;  %v841_v39 = vpop.f32.mrb[9].mxu0 }
 0x5c3   : > { %v548_v40 = vpop.f32.mrb[10].mxu0 }
 0x5c4   : > { %555 = vrot.lane.b32.xlu0 %v789_v38, %s952_s7  ;;  %v842_v0 = vpop.f32.mrb[11].mxu0 }
 0x5c9   : > { %v665_v41 = vpop.f32.mrb[12].mxu0 }
 0x5ca   : > { %v790_v42 = vpack.c.bf16 %v665_v41, %v665_v41  ;;  %v853_v43 = vpop.f32.mrb[13].mxu0 }
 0x5cb   : > { %v668_v44 = vpop.f32.mrb[14].mxu0 }
 0x5cc   : > { %675 = vrot.lane.b32.xlu1 %v790_v42, %s953_s8  ;;  %v854_v45 = vpop.f32.mrb[15].mxu0 }
 0x601   : > { %v436_v46 = vpop.permute.xlu1 %435 }
 0x602   : > { %439 = vst.msk [vmem:[%s1041_s30] sm:$0xf] %vm438_vm5, %v436_v46 }
 0x636   : > { %v556_v47 = vpop.permute.xlu0 %555 }
 0x637   : > { %559 = vst.msk [vmem:[%s1041_s30] sm:$0xf] %vm558_vm6, %v556_v47 }
 0x63e   : > { %v676_v48 = vpop.permute.xlu1 %675 }
 0x63f   : > { %679 = vst.msk [vmem:[%s1041_s30] sm:$0xf] %vm678_vm7, %v676_v48 }
 0x640 PF: > { %s12_s11 = sadd.s32 1, %s935_s11   ;;  %s1083_s9 = smov %s931_s10 }
 0x641   : > { %p9_p5 = scmp.ge.s32.totalorder %s12_s11, 4   ;;  %s1084_s10 = smov %s1086_s12 }
 0x643   :  { %11 = sbr.rel (!%p9_p5) target bundleno = 2 (0x2), region = 61 }

// kernel: clgpt2_forward.23
= control target key start
LH: loop header
LB: loop body
LE: loop exit
PB: predicated region body
PF: predicated region fallthrough
CT: control target
= control target key end

     0   :  { %vm21_vm0 = vcmask 523264   ;;  %v151_v0 = vmov 0.0   ;;  %vm152_vm1 = vmmov 0   ;;  %vm47_vm2 = vcmask 261120   ;;  %s195_s1 = inlined_call_operand.vmem [shape: bf16[32,64], index: 1, kind: input, shape index: {}]   ;;  %s196_s0 = inlined_call_operand.vmem [shape: bf16[16,32], index: 0, kind: input, shape index: {}]   ;;  %s197_s2 = inlined_call_operand.vmem [shape: f32[1,64], index: 2, kind: input, shape index: {}]   ;;  %s198_s3 = inlined_call_operand.vmem [shape: bf16[16,64], index: 3, kind: output, shape index: {}]  }
   0x1   :  { %138 = vmatprep.subr.bf16.mxu0 %v151_v0  ;;  %v148_v1 = vld [vmem:[%s195_s1] sm:$0xff]   ;;  %142 = vmatprep.mubr.msk.bf16.mxu0 %vm152_vm1, %v151_v0  ;;  %22 = vst.msk [vmem:[#allocation2] sm:$0xff] %vm21_vm0, %v151_v0  ;;  %23 = vst.msk [vmem:[#allocation2 + $0x8] sm:$0xff] %vm21_vm0, %v151_v0  ;;  %v149_v2 = vld [vmem:[%s195_s1 + $0x8] sm:$0xff]   ;;  %vm119_vm3 = vcmask 519168  }
   0x2   :  { %139 = vmatpush3.bf16.msra.mxu0 %v148_v1  ;;  %v150_v3 = vld [vmem:[%s196_s0] sm:$0xff]  }
   0x3   :  { %140 = vmatprep.subr.bf16.mxu0 %v151_v0  ;;  %v130_v12 = vld [vmem:[%s197_s2] ss:$0 sm:$0xff] }
   0x6   :  { %141 = vmatpush3.bf16.msra.mxu0 %v149_v2 }
   0x8   :  { %v24_v4 = vld [vmem:[#allocation2] sm:$0xff]  ;;  %v25_v6 = vld [vmem:[#allocation2 + $0x8] sm:$0xff] }
   0x9   :  { %143 = vmatmul.mubr.msk.bf16.vlgmr.msra.gmra.mrb[0].mxu0 %vm47_vm2, %v150_v3 }
  0xdc   :  { %v85_v5 = vpop.f32.mrb[0].mxu0 }
  0xdd   :  { %v92_v7 = vadd.f32 %v85_v5, %v24_v4  ;;  %v144_v8 = vpop.f32.mrb[1].mxu0 }
  0xde   :  { %v88_v9 = vpop.f32.mrb[2].mxu0 }
  0xdf   :  { %95 = vst.msk [vmem:[#allocation2] sm:$0xff] %vm21_vm0, %v92_v7  ;;  %v93_v10 = vadd.f32 %v88_v9, %v25_v6  ;;  %v145_v11 = vpop.f32.mrb[3].mxu0 }
  0xe1   :  { %96 = vst.msk [vmem:[#allocation2 + $0x8] sm:$0xff] %vm21_vm0, %v93_v10 }
  0xe6   :  { %v100_v13 = vld [vmem:[#allocation2] sm:$0xff] }
  0xe7   :  { %v109_v14 = vadd.f32 %v130_v12, %v100_v13 }
  0xe8   :  { %v101_v15 = vld [vmem:[#allocation2 + $0x8] sm:$0xff] }
  0xe9   :  { %v133_v16 = vpack.c.bf16 %v109_v14, %v109_v14  ;;  %v110_v17 = vadd.f32 %v130_v12, %v101_v15 }
  0xeb   :  { %120 = vst.msk [vmem:[%s198_s3] sm:$0xf] %vm119_vm3, %v133_v16  ;;  %v134_v18 = vpack.c.bf16 %v110_v17, %v110_v17 }
  0xed   :  { %121 = vst.msk [vmem:[%s198_s3 + $0x4] sm:$0xf] %vm119_vm3, %v134_v18 }

// kernel: clgpt2_forward.27
= control target key start
LH: loop header
LB: loop body
LE: loop exit
PB: predicated region body
PF: predicated region fallthrough
CT: control target
= control target key end

     0   :  { %vm24_vm0 = vcmask 261120   ;;  %v190_v0 = vmov 0.0   ;;  %vm191_vm1 = vmmov 0   ;;  %vm66_vm2 = vcmask 523264   ;;  %s248_s1 = inlined_call_operand.vmem [shape: bf16[64,32], index: 1, kind: input, shape index: {}]   ;;  %s249_s0 = inlined_call_operand.vmem [shape: bf16[16,64], index: 0, kind: input, shape index: {}]   ;;  %s250_s3 = inlined_call_operand.vmem [shape: bf16[16,32], index: 3, kind: input, shape index: {}]   ;;  %s251_s2 = inlined_call_operand.vmem [shape: f32[1,32], index: 2, kind: input, shape index: {}]   ;;  %s252_s4 = inlined_call_operand.vmem [shape: bf16[16,32], index: 4, kind: output, shape index: {}]  }
   0x1   :  { %171 = vmatprep.subr.bf16.mxu0 %v190_v0  ;;  %v185_v1 = vld [vmem:[%s248_s1] sm:$0xff]   ;;  %179 = vmatprep.mubr.msk.bf16.mxu0 %vm191_vm1, %v190_v0  ;;  %25 = vst.msk [vmem:[#allocation2] sm:$0xff] %vm24_vm0, %v190_v0  ;;  %26 = vst.msk [vmem:[#allocation2 + $0x8] sm:$0xff] %vm24_vm0, %v190_v0  ;;  %v186_v2 = vld [vmem:[%s248_s1 + $0x8] sm:$0xff]   ;;  %vm144_vm3 = vcmask 257024  }
   0x2   :  { %172 = vmatpush3.bf16.msra.mxu0 %v185_v1  ;;  %v187_v3 = vld [vmem:[%s248_s1 + $0x10] sm:$0xff]   ;;  %v188_v4 = vld [vmem:[%s248_s1 + $0x18] sm:$0xff]   ;;  %v189_v5 = vld [vmem:[%s249_s0] sm:$0xff]  }
   0x3   :  { %173 = vmatprep.subr.bf16.mxu0 %v190_v0  ;;  %v163_v14 = vld [vmem:[%s250_s3] sm:$0xff]  }
   0x4   :  { %v157_v15 = vld [vmem:[%s251_s2] ss:$0 sm:$0xff]  ;;  %v164_v16 = vunpack.c.l.bf16 %v163_v14  ;;  %v165_v19 = vunpack.c.h.bf16 %v163_v14 }
   0x6   :  { %174 = vmatpush3.bf16.msra.mxu0 %v186_v2 }
   0x7   :  { %175 = vmatprep.subr.bf16.mxu0 %v190_v0 }
   0x8   :  { %v27_v6 = vld [vmem:[#allocation2] sm:$0xff]  ;;  %v28_v8 = vld [vmem:[#allocation2 + $0x8] sm:$0xff] }
   0xa   :  { %176 = vmatpush3.bf16.msra.mxu0 %v187_v3 }
   0xb   :  { %177 = vmatprep.subr.bf16.mxu0 %v190_v0 }
   0xe   :  { %178 = vmatpush3.bf16.msra.mxu0 %v188_v4 }
  0x11   :  { %180 = vmatmul.mubr.msk.bf16.vlgmr.msra.gmra.mrb[0].mxu0 %vm66_vm2, %v189_v5 }
  0xe4   :  { %v104_v7 = vpop.f32.mrb[0].mxu0 }
  0xe5   :  { %v111_v9 = vadd.f32 %v104_v7, %v27_v6  ;;  %v181_v10 = vpop.f32.mrb[1].mxu0 }
  0xe6   :  { %v107_v11 = vpop.f32.mrb[2].mxu0 }
  0xe7   :  { %114 = vst.msk [vmem:[#allocation2] sm:$0xff] %vm24_vm0, %v111_v9  ;;  %v112_v12 = vadd.f32 %v107_v11, %v28_v8  ;;  %v182_v13 = vpop.f32.mrb[3].mxu0 }
  0xe9   :  { %115 = vst.msk [vmem:[#allocation2 + $0x8] sm:$0xff] %vm24_vm0, %v112_v12 }
  0xee   :  { %v119_v17 = vld [vmem:[#allocation2] sm:$0xff] }
  0xef   :  { %v128_v18 = vadd.f32 %v157_v15, %v119_v17 }
  0xf0   :  { %v120_v20 = vld [vmem:[#allocation2 + $0x8] sm:$0xff] }
  0xf1   :  { %v134_v21 = vadd.f32 %v164_v16, %v128_v18  ;;  %v129_v22 = vadd.f32 %v157_v15, %v120_v20 }
  0xf3   :  { %v160_v23 = vpack.c.bf16 %v134_v21, %v134_v21  ;;  %v135_v24 = vadd.f32 %v165_v19, %v129_v22 }
  0xf5   :  { %145 = vst.msk [vmem:[%s252_s4] sm:$0xf] %vm144_vm3, %v160_v23  ;;  %v161_v25 = vpack.c.bf16 %v135_v24, %v135_v24 }
  0xf7   :  { %146 = vst.msk [vmem:[%s252_s4 + $0x4] sm:$0xf] %vm144_vm3, %v161_v25 }

// kernel: clgpt2_forward.26
= control target key start
LH: loop header
LB: loop body
LE: loop exit
PB: predicated region body
PF: predicated region fallthrough
CT: control target
= control target key end

     0   :  { %vm29_vm0 = vcmask 261120   ;;  %v217_v16 = vmov 0.0   ;;  %vm218_vm1 = vmmov 0   ;;  %vm82_vm2 = vcmask 523264   ;;  %s283_s0 = inlined_call_operand.vmem [shape: bf16[16,32], index: 0, kind: input, shape index: {}]   ;;  %s284_s1 = inlined_call_operand.vmem [shape: bf16[32,64], index: 1, kind: input, shape index: {}]   ;;  %s285_s3 = inlined_call_operand.vmem [shape: f32[1,32], index: 3, kind: input, shape index: {}]   ;;  %s286_s4 = inlined_call_operand.vmem [shape: f32[1,32], index: 4, kind: input, shape index: {}]   ;;  %s287_s2 = inlined_call_operand.vmem [shape: f32[1,64], index: 2, kind: input, shape index: {}]   ;;  %s288_s5 = inlined_call_operand.vmem [shape: bf16[16,64], index: 5, kind: output, shape index: {}]  }
   0x1   :  { %v195_v0 = vld [vmem:[%s283_s0] sm:$0xff]   ;;  %201 = vmatprep.subr.bf16.mxu0 %v217_v16  ;;  %v212_v17 = vld [vmem:[%s284_s1 + $0x8] sm:$0xff]   ;;  %205 = vmatprep.mubr.msk.bf16.mxu0 %vm218_vm1, %v217_v16  ;;  %83 = vst.msk [vmem:[#allocation2] sm:$0xff] %vm82_vm2, %v217_v16  ;;  %84 = vst.msk [vmem:[#allocation2 + $0x8] sm:$0xff] %vm82_vm2, %v217_v16  ;;  %vm177_vm3 = vcmask 519168  }
   0x2   :  { %v196_v1 = vunpack.c.l.bf16 %v195_v0  ;;  %v197_v2 = vunpack.c.h.bf16 %v195_v0  ;;  %v211_v15 = vld [vmem:[%s284_s1] sm:$0xff]  }
   0x3   :  { %202 = vmatpush3.bf16.msra.mxu0 %v211_v15  ;;  %v184_v26 = vld [vmem:[%s285_s3] ss:$0 sm:$0xff] }
   0x4   :  { %v30_v3 = vsel %vm29_vm0, %v196_v1, 0.0  ;;  %v33_v4 = vsel %vm29_vm0, %v197_v2, 0.0  ;;  %203 = vmatprep.subr.bf16.mxu0 %v217_v16  ;;  %v185_v30 = vld [vmem:[%s286_s4] ss:$0 sm:$0xff] }
   0x5   :  { %31 = vadd.xlane.f32.xlu0 %v30_v3  ;;  %v189_v44 = vld [vmem:[%s287_s2] ss:$0 sm:$0xff] }
   0x7   :  { %204 = vmatpush3.bf16.msra.mxu0 %v212_v17 }
   0x8   :  { %v85_v36 = vld [vmem:[#allocation2] sm:$0xff]  ;;  %v86_v38 = vld [vmem:[#allocation2 + $0x8] sm:$0xff] }
   0x9   :  { %34 = vadd.xlane.f32.xlu0 %v33_v4 }
  0x92   :  { %v32_v5 = vpop.xlane.xlu0 %31 }
  0x93   :  { %v37_v6 = vmul.f32 0.03125, %v32_v5 }
  0x95   :  { %v39_v7 = vsub.f32 %v196_v1, %v37_v6 }
  0x96   :  { %v35_v8 = vpop.xlane.xlu0 %34 }
  0x97   :  { %v38_v9 = vmul.f32 0.03125, %v35_v8  ;;  %v41_v10 = vmul.f32 %v39_v7, %v39_v7 }
  0x99   :  { %v40_v11 = vsub.f32 %v197_v2, %v38_v9  ;;  %v43_v12 = vsel %vm29_vm0, %v41_v10, 0.0 }
  0x9a   :  { %44 = vadd.xlane.f32.xlu1 %v43_v12 }
  0x9b   :  { %v42_v13 = vmul.f32 %v40_v11, %v40_v11 }
  0x9d   :  { %v46_v14 = vsel %vm29_vm0, %v42_v13, 0.0 }
  0x9e   :  { %47 = vadd.xlane.f32.xlu1 %v46_v14 }
 0x127   :  { %v45_v18 = vpop.xlane.xlu1 %44 }
 0x128   :  { %v49_v19 = vmul.f32 0.03125, %v45_v18 }
 0x12a   :  { %v51_v20 = vadd.f32 1e-05, %v49_v19 }
 0x12b   :  { %v48_v21 = vpop.xlane.xlu1 %47 }
 0x12c   :  { %213 = vrsqrt.f32 %v51_v20  ;;  %v50_v22 = vmul.f32 0.03125, %v48_v21 }
 0x12e   :  { %v52_v23 = vadd.f32 1e-05, %v50_v22 }
 0x130   :  { %215 = vrsqrt.f32 %v52_v23 }
 0x136   :  { %v214_v24 = vpop.eup %213 }
 0x137   :  { %v55_v25 = vmul.f32 %v214_v24, %v39_v7 }
 0x139   :  { %v64_v28 = vmul.f32 %v184_v26, %v55_v25 }
 0x13a   :  { %v216_v27 = vpop.eup %215 }
 0x13b   :  { %v56_v29 = vmul.f32 %v216_v27, %v40_v11  ;;  %v73_v32 = vadd.f32 %v185_v30, %v64_v28 }
 0x13d   :  { %v65_v31 = vmul.f32 %v184_v26, %v56_v29 }
 0x13f   :  { %v74_v33 = vadd.f32 %v185_v30, %v65_v31 }
 0x141   :  { %v75_v34 = vpack.c.bf16 %v74_v33, %v73_v32 }
 0x143   :  { %76 = vst.msk [vmem:[#allocation3] sm:$0xff] %vm29_vm0, %v75_v34 }
 0x14a   :  { %v77_v35 = vld [vmem:[#allocation3] sm:$0xff] }
 0x14b   :  { %206 = vmatmul.mubr.msk.bf16.vlgmr.msra.gmra.mrb[0].mxu0 %vm29_vm0, %v77_v35 }
 0x21e   :  { %v141_v37 = vpop.f32.mrb[0].mxu0 }
 0x21f   :  { %v148_v39 = vadd.f32 %v141_v37, %v85_v36  ;;  %v207_v40 = vpop.f32.mrb[1].mxu0 }
 0x220   :  { %v144_v41 = vpop.f32.mrb[2].mxu0 }
 0x221   :  { %151 = vst.msk [vmem:[#allocation2] sm:$0xff] %vm82_vm2, %v148_v39  ;;  %v149_v42 = vadd.f32 %v144_v41, %v86_v38  ;;  %v208_v43 = vpop.f32.mrb[3].mxu0 }
 0x223   :  { %152 = vst.msk [vmem:[#allocation2 + $0x8] sm:$0xff] %vm82_vm2, %v149_v42 }
 0x228   :  { %v156_v45 = vld [vmem:[#allocation2] sm:$0xff] }
 0x229   :  { %v165_v46 = vadd.f32 %v189_v44, %v156_v45 }
 0x22a   :  { %v157_v47 = vld [vmem:[#allocation2 + $0x8] sm:$0xff] }
 0x22b   :  { %v167_v48 = vmax.f32 %v165_v46, 0.0  ;;  %v166_v49 = vadd.f32 %v189_v44, %v157_v47 }
 0x22d   :  { %v192_v50 = vpack.c.bf16 %v167_v48, %v167_v48  ;;  %v168_v51 = vmax.f32 %v166_v49, 0.0 }
 0x22f   :  { %178 = vst.msk [vmem:[%s288_s5] sm:$0xf] %vm177_vm3, %v192_v50  ;;  %v193_v52 = vpack.c.bf16 %v168_v51, %v168_v51 }
 0x231   :  { %179 = vst.msk [vmem:[%s288_s5 + $0x4] sm:$0xf] %vm177_vm3, %v193_v52 }

// kernel: clgpt2_forward.24
= control target key start
LH: loop header
LB: loop body
LE: loop exit
PB: predicated region body
PF: predicated region fallthrough
CT: control target
= control target key end

     0   :  { %s1012_s12 = smov 0   ;;  %s1014_s13 = smov 0   ;;  %s1126_s0 = inlined_call_operand.vmem [shape: bf16[2,8,32], index: 0, kind: input, shape index: {}]   ;;  %s1127_s1 = inlined_call_operand.vmem [shape: bf16[2,8,64], index: 1, kind: input, shape index: {}]   ;;  %s1128_s2 = inlined_call_operand.vmem [shape: s32[2,1,8], index: 2, kind: input, shape index: {}]   ;;  %s1129_s3 = inlined_call_operand.vmem [shape: bf16[2,8,32], index: 3, kind: output, shape index: {}]  }
   0x1   :  { %s1016_s14 = smov 0  }
   0x2 LB: > { %s25_s15 = sadd.s32 1, %s974_s13  ;;  %p818_p0 = scmp.ge.s32.totalorder %s978_s14, 1  ;;  %s978_s14 = sphi %s1016_s14, %s13_s14   ;;  %s974_s13 = sphi %s1014_s13, %s1131_s13   ;;  %s970_s12 = sphi %s1012_s12, %s1130_s12  }
   0x3   : > { %p27_p1 = scmp.ge.s32.totalorder %s25_s15, 2  ;;  %p172_p2 = scmp.lt.s32.totalorder %s978_s14, 3 }
   0x5   : > { %s1133_s15 = smov (%p27_p1, %s25_s15), 0  ;;  %p173_p3 = pnand %p818_p0, %p172_p2 }
   0x6   : > { %p207_p4 = scmp.lt.s32.totalorder (!%p173_p3), %s970_s12, 1  ;;  %v980_v0 = vmov (!%p173_p3), 0.0   ;;  %vm981_vm0 = vmmov (!%p173_p3), 0   ;;  %vm243_vm1 = vcmask (!%p173_p3), 64512   ;;  %v238_v7 = vlaneseq (!%p173_p3)  ;;  %s982_s26 = smov (!%p173_p3), 96  }
   0x7   : > { %176 = sbr.rel (%p173_p3) target bundleno = 1442 (0x5a2), region = 32  ;;  %855 = vmatprep.subr.bf16.mxu0 (!%p173_p3), %v980_v0  ;;  %857 = vmatprep.mubr.msk.bf16.mxu0 (!%p173_p3), %vm981_vm0, %v980_v0  ;;  %s983_s27 = smov (!%p173_p3), 120   ;;  %vm311_vm3 = vcmask (!%p173_p3), 1043456   ;;  %vm356_vm4 = vcmask (!%p173_p3), 60416   ;;  %vm477_vm5 = vcmask (!%p173_p3), 126016   ;;  %vm597_vm6 = vcmask (!%p173_p3), 191616  }
   0x8   : > { %861 = vmatprep.subr.bf16.mxu1 (!%p173_p3), %v980_v0  ;;  %863 = vmatprep.mubr.msk.bf16.mxu1 (!%p173_p3), %vm981_vm0, %v980_v0  ;;  %v239_v9 = vshrl.u32 (!%p173_p3), %v238_v7, 7  ;;  %s984_s28 = smov (!%p173_p3), 112   ;;  %s985_s29 = smov (!%p173_p3), 104   ;;  %vm717_vm7 = vcmask (!%p173_p3), 257216  }
   0x9   : > { %s986_s6 = smov (!%p173_p3), 88   ;;  %s987_s7 = smov (!%p173_p3), 72  }
   0xa   : > { %v240_v10 = vsub.s32 (!%p173_p3), 0, %v239_v9  ;;  %s988_s8 = smov (!%p173_p3), 80   ;;  %s989_s9 = smov (!%p173_p3), 8  }
   0xb   : > { %s990_s10 = smov (!%p173_p3), 16   ;;  %s991_s11 = smov (!%p173_p3), 24  }
   0xe   : > { %s1135_s12 = smov (!%p207_p4, %s970_s12), 1 }
   0xf   : > { %s1036_s16 = sshll.u32 %s1135_s12, 2  ;;  %s220_s25 = scalar_lea.vmem %s1128_s2, %s1135_s12 }
  0x10   : > { %s213_s19 = scalar_lea.vmem %s1126_s0, %s1036_s16  ;;  %s217_s22 = scalar_lea.vmem %s1127_s1, %s1036_s16  ;;  %v234_v8 = vld [vmem:[%s220_s25] sm:$0x1] }
  0x11   : > { %v229_v1 = vld [vmem:[%s213_s19] sm:$0xf]  ;;  %vm235_vm2 = vcmp.gt.s32.totalorder %v234_v8, 0  ;;  %s1087_s5 = scalar_lea.vmem %s1129_s3, %s1036_s16 }
  0x12   : > { %v233_v2 = vld [vmem:[%s217_s22] sm:$0xf]  ;;  %v230_v3 = vunpack.c.l.bf16 %v229_v1  ;;  %v236_v11 = vsel %vm235_vm2, -1e+09, %v980_v0 }
  0x13   : > { %v248_v4 = vsel %vm243_vm1, %v233_v2, 0  ;;  %v1055_v12 = vrot.slane %v236_v11, %v240_v10  ;;  %v1059_v19 = vcombine.low %v233_v2, %v233_v2 }
  0x14   : > { %856 = vmatpush3.bf16.xpose.msra.mxu0 %v248_v4  ;;  %v231_v5 = vmul.f32 0.35355338, %v230_v3 }
  0x15   : > { %873 = vmatprep.subr.bf16.mxu0 %v980_v0  ;;  %306 = vrot.lane.b32.xlu1 %v1059_v19, %s982_s26 }
  0x16   : > { %v232_v6 = vpack.c.bf16 %v231_v5, %v231_v5 }
  0x19   : > { %361 = vrot.lane.b32.xlu1 %v1059_v19, %s983_s27 }
  0x1b   : > { %858 = vmatmul.mubr.msk.bf16.vlgmr.msra.gmra.mrb[0].mxu0 %vm243_vm1, %v232_v6 }
  0x1c   : > { %875 = vmatprep.mubr.msk.bf16.mxu0 %vm981_vm0, %v980_v0 }
  0x1d   : > { %481 = vrot.lane.b32.xlu1 %v1059_v19, %s984_s28 }
  0x21   : > { %479 = vrot.lane.b32.xlu1 %v232_v6, %s984_s28 }
  0x25   : > { %601 = vrot.lane.b32.xlu1 %v1059_v19, %s985_s29 }
  0x29   : > { %599 = vrot.lane.b32.xlu1 %v232_v6, %s985_s29 }
  0x87   : > { %v307_v25 = vpop.permute.xlu1 %306 }
  0x88   : > { %v313_v26 = vsel %vm311_vm3, %v307_v25, 0 }
  0x89   : > { %862 = vmatpush3.bf16.msra.mxu1 %v313_v26 }
  0x8a   : > { %867 = vmatprep.subr.bf16.mxu1 %v980_v0 }
  0x8b   : > { %v362_v29 = vpop.permute.xlu1 %361 }
  0x8c   : > { %v367_v31 = vsel %vm243_vm1, %v362_v29, 0 }
  0x8f   : > { %v482_v33 = vpop.permute.xlu1 %481 }
  0x90   : > { %v487_v36 = vsel %vm243_vm1, %v482_v33, 0 }
  0x93   : > { %v480_v35 = vpop.permute.xlu1 %479 }
  0x97   : > { %v602_v37 = vpop.permute.xlu1 %601 }
  0x98   : > { %v607_v38 = vsel %vm243_vm1, %v602_v37, 0 }
  0x9b   : > { %v600_v39 = vpop.permute.xlu1 %599 }
  0xee   : > { %v284_v13 = vpop.f32.mrb[0].mxu0 }
  0xef   : > { %v285_v14 = vadd.f32 %v284_v13, %v1055_v12  ;;  %v859_v15 = vpop.f32.mrb[1].mxu0 }
  0xf0   : > { %v287_v16 = vpop.f32.mrb[2].mxu0 }
  0xf1   : > { %v860_v17 = vpop.f32.mrb[3].mxu0  ;;  %v290_v18 = vsel %vm243_vm1, %v285_v14, -inf }
  0xf2   : > { %291 = vmax.xlane.f32.xlu0 %v290_v18 }
 0x17f   : > { %v292_v20 = vpop.xlane.xlu0 %291 }
 0x180   : > { %v293_v21 = vsub.f32 %v285_v14, %v292_v20 }
 0x182   : > { %v294_v22 = vmul.f32 1.442695, %v293_v21 }
 0x184   : > { %940 = vpow2.f32 %v294_v22 }
 0x18e   : > { %v941_v23 = vpop.eup %940 }
 0x18f   : > { %v296_v24 = vsel %vm243_vm1, %v941_v23, 0.0 }
 0x190   : > { %297 = vadd.xlane.f32.xlu0 %v296_v24 }
 0x1a6   : > { %359 = vrot.lane.b32.xlu0 %v232_v6, %s983_s27 }
 0x21d   : > { %v298_v27 = vpop.xlane.xlu0 %297 }
 0x21e   : > { %942 = vrcp.f32 %v298_v27 }
 0x221   : > { %v360_v34 = vpop.permute.xlu0 %359 }
 0x228   : > { %v943_v28 = vpop.eup %942 }
 0x229   : > { %v301_v30 = vmul.f32 %v943_v28, %v941_v23 }
 0x22b   : > { %v302_v32 = vpack.c.bf16 %v301_v30, %v301_v30 }
 0x22d   : > { %864 = vmatmul.mubr.msk.bf16.vlgmr.msra.gmra.mrb[0].mxu1 %vm243_vm1, %v302_v32 }
 0x22e   : > { %868 = vmatpush3.bf16.xpose.msra.mxu1 %v367_v31  ;;  %869 = vmatprep.mubr.msk.bf16.mxu1 %vm981_vm0, %v980_v0 }
 0x22f   : > { %879 = vmatprep.subr.bf16.mxu1 %v980_v0 }
 0x235   : > { %870 = vmatmul.mubr.msk.bf16.vlgmr.msra.gmra.mrb[4].mxu1 %vm243_vm1, %v360_v34 }
 0x236   : > { %880 = vmatpush3.bf16.xpose.msra.mxu1 %v487_v36  ;;  %881 = vmatprep.mubr.msk.bf16.mxu1 %vm981_vm0, %v980_v0 }
 0x237   : > { %891 = vmatprep.subr.bf16.mxu1 %v980_v0 }
 0x23d   : > { %882 = vmatmul.mubr.msk.bf16.vlgmr.msra.gmra.mrb[8].mxu1 %vm243_vm1, %v480_v35 }
 0x23e   : > { %892 = vmatpush3.bf16.xpose.msra.mxu1 %v607_v38  ;;  %893 = vmatprep.mubr.msk.bf16.mxu1 %vm981_vm0, %v980_v0 }
 0x245   : > { %894 = vmatmul.mubr.msk.bf16.vlgmr.msra.gmra.mrb[12].mxu1 %vm243_vm1, %v600_v39 }
 0x300   : > { %v349_v40 = vpop.f32.mrb[0].mxu1 }
 0x301   : > { %v355_v41 = vpack.c.bf16 %v349_v40, %v349_v40  ;;  %v865_v42 = vpop.f32.mrb[1].mxu1 }
 0x302   : > { %v352_v43 = vpop.f32.mrb[2].mxu1 }
 0x303   : > { %357 = vst.msk [vmem:[%s1087_s5] sm:$0xf] %vm356_vm4, %v355_v41  ;;  %v866_v44 = vpop.f32.mrb[3].mxu1 }
 0x308   : > { %v403_v45 = vpop.f32.mrb[4].mxu1 }
 0x309   : > { %v404_v46 = vadd.f32 %v403_v45, %v1055_v12  ;;  %v871_v47 = vpop.f32.mrb[5].mxu1 }
 0x30a   : > { %v406_v48 = vpop.f32.mrb[6].mxu1 }
 0x30b   : > { %v872_v49 = vpop.f32.mrb[7].mxu1  ;;  %v409_v50 = vsel %vm243_vm1, %v404_v46, -inf }
 0x30c   : > { %410 = vmax.xlane.f32.xlu1 %v409_v50 }
 0x310   : > { %v523_v51 = vpop.f32.mrb[8].mxu1 }
 0x311   : > { %v524_v52 = vadd.f32 %v523_v51, %v1055_v12  ;;  %v883_v53 = vpop.f32.mrb[9].mxu1 }
 0x312   : > { %v526_v54 = vpop.f32.mrb[10].mxu1 }
 0x313   : > { %v884_v55 = vpop.f32.mrb[11].mxu1  ;;  %v529_v56 = vsel %vm243_vm1, %v524_v52, -inf }
 0x314   : > { %530 = vmax.xlane.f32.xlu0 %v529_v56 }
 0x318   : > { %v643_v57 = vpop.f32.mrb[12].mxu1 }
 0x319   : > { %v644_v58 = vadd.f32 %v643_v57, %v1055_v12  ;;  %v895_v59 = vpop.f32.mrb[13].mxu1 }
 0x31a   : > { %v646_v60 = vpop.f32.mrb[14].mxu1 }
 0x31b   : > { %v896_v61 = vpop.f32.mrb[15].mxu1  ;;  %v649_v62 = vsel %vm243_vm1, %v644_v58, -inf }
 0x31c   : > { %650 = vmax.xlane.f32.xlu1 %v649_v62 }
 0x32d   : > { %422 = vrot.lane.b32.xlu1 %v1059_v19, %s986_s6 }
 0x399   : > { %v411_v63 = vpop.xlane.xlu1 %410 }
 0x39a   : > { %v412_v1 = vsub.f32 %v404_v46, %v411_v63 }
 0x39c   : > { %v413_v2 = vmul.f32 1.442695, %v412_v1 }
 0x39e   : > { %944 = vpow2.f32 %v413_v2 }
 0x3a1   : > { %v531_v3 = vpop.xlane.xlu0 %530 }
 0x3a2   : > { %v532_v4 = vsub.f32 %v524_v52, %v531_v3 }
 0x3a4   : > { %v533_v5 = vmul.f32 1.442695, %v532_v4 }
 0x3a6   : > { %946 = vpow2.f32 %v533_v5 }
 0x3a8   : > { %v945_v6 = vpop.eup %944 }
 0x3a9   : > { %v651_v7 = vpop.xlane.xlu1 %650  ;;  %v415_v8 = vsel %vm243_vm1, %v945_v6, 0.0 }
 0x3aa   : > { %v652_v9 = vsub.f32 %v644_v58, %v651_v7  ;;  %416 = vadd.xlane.f32.xlu0 %v415_v8 }
 0x3ac   : > { %v653_v10 = vmul.f32 1.442695, %v652_v9 }
 0x3ad   : > { %v423_v11 = vpop.permute.xlu1 %422 }
 0x3ae   : > { %948 = vpow2.f32 %v653_v10  ;;  %v428_v12 = vsel %vm311_vm3, %v423_v11, 0 }
 0x3af   : > { %874 = vmatpush3.bf16.msra.mxu0 %v428_v12 }
 0x3b0   : > { %v947_v13 = vpop.eup %946  ;;  %885 = vmatprep.subr.bf16.mxu0 %v980_v0 }
 0x3b1   : > { %v535_v14 = vsel %vm243_vm1, %v947_v13, 0.0 }
 0x3b2   : > { %536 = vadd.xlane.f32.xlu1 %v535_v14 }
 0x3b8   : > { %v949_v15 = vpop.eup %948 }
 0x3b9   : > { %v655_v16 = vsel %vm243_vm1, %v949_v15, 0.0 }
 0x3ba   : > { %656 = vadd.xlane.f32.xlu0 %v655_v16 }
 0x3c3   : > { %662 = vrot.lane.b32.xlu1 %v1059_v19, %s987_s7 }
 0x3d0   : > { %542 = vrot.lane.b32.xlu0 %v1059_v19, %s988_s8 }
 0x437   : > { %v417_v17 = vpop.xlane.xlu0 %416 }
 0x438   : > { %950 = vrcp.f32 %v417_v17 }
 0x43f   : > { %v537_v18 = vpop.xlane.xlu1 %536 }
 0x440   : > { %952 = vrcp.f32 %v537_v18 }
 0x442   : > { %v951_v20 = vpop.eup %950 }
 0x443   : > { %v420_v21 = vmul.f32 %v951_v20, %v945_v6  ;;  %v663_v27 = vpop.permute.xlu1 %662 }
 0x444   : > { %v668_v29 = vsel %vm311_vm3, %v663_v27, 0 }
 0x445   : > { %v421_v22 = vpack.c.bf16 %v420_v21, %v420_v21 }
 0x447   : > { %v657_v23 = vpop.xlane.xlu0 %656  ;;  %876 = vmatmul.mubr.msk.bf16.vlgmr.msra.gmra.mrb[4].mxu0 %vm243_vm1, %v421_v22 }
 0x448   : > { %954 = vrcp.f32 %v657_v23  ;;  %887 = vmatprep.mubr.msk.bf16.mxu0 %vm981_vm0, %v980_v0 }
 0x44a   : > { %v953_v24 = vpop.eup %952 }
 0x44b   : > { %v540_v25 = vmul.f32 %v953_v24, %v947_v13  ;;  %v543_v26 = vpop.permute.xlu0 %542 }
 0x44c   : > { %v548_v19 = vsel %vm311_vm3, %v543_v26, 0 }
 0x44d   : > { %886 = vmatpush3.bf16.msra.mxu0 %v548_v19  ;;  %v541_v28 = vpack.c.bf16 %v540_v25, %v540_v25 }
 0x44e   : > { %897 = vmatprep.subr.bf16.mxu0 %v980_v0 }
 0x450   : > { %888 = vmatmul.mubr.msk.bf16.vlgmr.msra.gmra.mrb[8].mxu0 %vm243_vm1, %v541_v28 }
 0x451   : > { %898 = vmatpush3.bf16.msra.mxu0 %v668_v29  ;;  %899 = vmatprep.mubr.msk.bf16.mxu0 %vm981_vm0, %v980_v0 }
 0x452   : > { %v955_v30 = vpop.eup %954 }
 0x453   : > { %v660_v31 = vmul.f32 %v955_v30, %v949_v15 }
 0x455   : > { %v661_v32 = vpack.c.bf16 %v660_v31, %v660_v31 }
 0x458   : > { %900 = vmatmul.mubr.msk.bf16.vlgmr.msra.gmra.mrb[12].mxu0 %vm243_vm1, %v661_v32 }
 0x51a   : > { %v464_v33 = vpop.f32.mrb[4].mxu0 }
 0x51b   : > { %v836_v34 = vpack.c.bf16 %v464_v33, %v464_v33  ;;  %v877_v35 = vpop.f32.mrb[5].mxu0 }
 0x51c   : > { %v467_v36 = vpop.f32.mrb[6].mxu0 }
 0x51d   : > { %474 = vrot.lane.b32.xlu1 %v836_v34, %s989_s9  ;;  %v878_v37 = vpop.f32.mrb[7].mxu0 }
 0x523   : > { %v584_v38 = vpop.f32.mrb[8].mxu0 }
 0x524   : > { %v837_v39 = vpack.c.bf16 %v584_v38, %v584_v38  ;;  %v889_v40 = vpop.f32.mrb[9].mxu0 }
 0x525   : > { %v587_v41 = vpop.f32.mrb[10].mxu0 }
 0x526   : > { %594 = vrot.lane.b32.xlu0 %v837_v39, %s990_s10  ;;  %v890_v0 = vpop.f32.mrb[11].mxu0 }
 0x52b   : > { %v704_v42 = vpop.f32.mrb[12].mxu0 }
 0x52c   : > { %v838_v43 = vpack.c.bf16 %v704_v42, %v704_v42  ;;  %v901_v44 = vpop.f32.mrb[13].mxu0 }
 0x52d   : > { %v707_v45 = vpop.f32.mrb[14].mxu0 }
 0x52e   : > { %714 = vrot.lane.b32.xlu1 %v838_v43, %s991_s11  ;;  %v902_v46 = vpop.f32.mrb[15].mxu0 }
 0x58f   : > { %v475_v47 = vpop.permute.xlu1 %474 }
 0x590   : > { %478 = vst.msk [vmem:[%s1087_s5] sm:$0xf] %vm477_vm5, %v475_v47 }
 0x598   : > { %v595_v48 = vpop.permute.xlu0 %594 }
 0x599   : > { %598 = vst.msk [vmem:[%s1087_s5] sm:$0xf] %vm597_vm6, %v595_v48 }
 0x5a0   : > { %v715_v49 = vpop.permute.xlu1 %714 }
 0x5a1   : > { %718 = vst.msk [vmem:[%s1087_s5] sm:$0xf] %vm717_vm7, %v715_v49 }
 0x5a2 PF: > { %s13_s14 = sadd.s32 1, %s978_s14   ;;  %s1130_s12 = smov %s974_s13 }
 0x5a3   : > { %p10_p5 = scmp.ge.s32.totalorder %s13_s14, 4   ;;  %s1131_s13 = smov %s1133_s15 }
 0x5a5   :  { %12 = sbr.rel (!%p10_p5) target bundleno = 2 (0x2), region = 68 }

// kernel: clgpt2_forward.37
= control target key start
LH: loop header
LB: loop body
LE: loop exit
PB: predicated region body
PF: predicated region fallthrough
CT: control target
= control target key end

     0   :  { %vm26_vm0 = vcmask 261120   ;;  %v189_v16 = vmov 0.0   ;;  %vm190_vm1 = vmmov 0   ;;  %vm79_vm2 = vcmask 523264   ;;  %s249_s0 = inlined_call_operand.vmem [shape: bf16[16,32], index: 0, kind: input, shape index: {}]   ;;  %s250_s1 = inlined_call_operand.vmem [shape: bf16[32,64], index: 1, kind: input, shape index: {}]   ;;  %s251_s2 = inlined_call_operand.vmem [shape: f32[1,32], index: 2, kind: input, shape index: {}]   ;;  %s252_s3 = inlined_call_operand.vmem [shape: f32[1,32], index: 3, kind: input, shape index: {}]   ;;  %s253_s4 = inlined_call_operand.vmem [shape: f32[16,64], index: 4, kind: output, shape index: {}]  }
   0x1   :  { %v167_v0 = vld [vmem:[%s249_s0] sm:$0xff]   ;;  %173 = vmatprep.subr.bf16.mxu0 %v189_v16  ;;  %v184_v17 = vld [vmem:[%s250_s1 + $0x8] sm:$0xff]   ;;  %177 = vmatprep.mubr.msk.bf16.mxu0 %vm190_vm1, %v189_v16  ;;  %80 = vst.msk [vmem:[#allocation2] sm:$0xff] %vm79_vm2, %v189_v16  ;;  %81 = vst.msk [vmem:[#allocation2 + $0x8] sm:$0xff] %vm79_vm2, %v189_v16 }
   0x2   :  { %v168_v1 = vunpack.c.l.bf16 %v167_v0  ;;  %v169_v2 = vunpack.c.h.bf16 %v167_v0  ;;  %v183_v15 = vld [vmem:[%s250_s1] sm:$0xff]  }
   0x3   :  { %174 = vmatpush3.bf16.msra.mxu0 %v183_v15  ;;  %v161_v26 = vld [vmem:[%s251_s2] ss:$0 sm:$0xff] }
   0x4   :  { %v27_v3 = vsel %vm26_vm0, %v168_v1, 0.0  ;;  %v30_v4 = vsel %vm26_vm0, %v169_v2, 0.0  ;;  %175 = vmatprep.subr.bf16.mxu0 %v189_v16  ;;  %v162_v30 = vld [vmem:[%s252_s3] ss:$0 sm:$0xff] }
   0x5   :  { %28 = vadd.xlane.f32.xlu0 %v27_v3 }
   0x7   :  { %176 = vmatpush3.bf16.msra.mxu0 %v184_v17 }
   0x8   :  { %v82_v36 = vld [vmem:[#allocation2] sm:$0xff]  ;;  %v83_v38 = vld [vmem:[#allocation2 + $0x8] sm:$0xff] }
   0x9   :  { %31 = vadd.xlane.f32.xlu0 %v30_v4 }
  0x92   :  { %v29_v5 = vpop.xlane.xlu0 %28 }
  0x93   :  { %v34_v6 = vmul.f32 0.03125, %v29_v5 }
  0x95   :  { %v36_v7 = vsub.f32 %v168_v1, %v34_v6 }
  0x96   :  { %v32_v8 = vpop.xlane.xlu0 %31 }
  0x97   :  { %v35_v9 = vmul.f32 0.03125, %v32_v8  ;;  %v38_v10 = vmul.f32 %v36_v7, %v36_v7 }
  0x99   :  { %v37_v11 = vsub.f32 %v169_v2, %v35_v9  ;;  %v40_v12 = vsel %vm26_vm0, %v38_v10, 0.0 }
  0x9a   :  { %41 = vadd.xlane.f32.xlu1 %v40_v12 }
  0x9b   :  { %v39_v13 = vmul.f32 %v37_v11, %v37_v11 }
  0x9d   :  { %v43_v14 = vsel %vm26_vm0, %v39_v13, 0.0 }
  0x9e   :  { %44 = vadd.xlane.f32.xlu1 %v43_v14 }
 0x127   :  { %v42_v18 = vpop.xlane.xlu1 %41 }
 0x128   :  { %v46_v19 = vmul.f32 0.03125, %v42_v18 }
 0x12a   :  { %v48_v20 = vadd.f32 1e-05, %v46_v19 }
 0x12b   :  { %v45_v21 = vpop.xlane.xlu1 %44 }
 0x12c   :  { %185 = vrsqrt.f32 %v48_v20  ;;  %v47_v22 = vmul.f32 0.03125, %v45_v21 }
 0x12e   :  { %v49_v23 = vadd.f32 1e-05, %v47_v22 }
 0x130   :  { %187 = vrsqrt.f32 %v49_v23 }
 0x136   :  { %v186_v24 = vpop.eup %185 }
 0x137   :  { %v52_v25 = vmul.f32 %v186_v24, %v36_v7 }
 0x139   :  { %v61_v28 = vmul.f32 %v161_v26, %v52_v25 }
 0x13a   :  { %v188_v27 = vpop.eup %187 }
 0x13b   :  { %v53_v29 = vmul.f32 %v188_v27, %v37_v11  ;;  %v70_v32 = vadd.f32 %v162_v30, %v61_v28 }
 0x13d   :  { %v62_v31 = vmul.f32 %v161_v26, %v53_v29 }
 0x13f   :  { %v71_v33 = vadd.f32 %v162_v30, %v62_v31 }
 0x141   :  { %v72_v34 = vpack.c.bf16 %v71_v33, %v70_v32 }
 0x143   :  { %73 = vst.msk [vmem:[#allocation3] sm:$0xff] %vm26_vm0, %v72_v34 }
 0x14a   :  { %v74_v35 = vld [vmem:[#allocation3] sm:$0xff] }
 0x14b   :  { %178 = vmatmul.mubr.msk.bf16.vlgmr.msra.gmra.mrb[0].mxu0 %vm26_vm0, %v74_v35 }
 0x21e   :  { %v138_v37 = vpop.f32.mrb[0].mxu0 }
 0x21f   :  { %v145_v39 = vadd.f32 %v138_v37, %v82_v36  ;;  %v179_v40 = vpop.f32.mrb[1].mxu0 }
 0x220   :  { %v141_v41 = vpop.f32.mrb[2].mxu0 }
 0x221   :  { %148 = vst.msk [vmem:[#allocation2] sm:$0xff] %vm79_vm2, %v145_v39  ;;  %v146_v42 = vadd.f32 %v141_v41, %v83_v38  ;;  %v180_v43 = vpop.f32.mrb[3].mxu0 }
 0x223   :  { %149 = vst.msk [vmem:[#allocation2 + $0x8] sm:$0xff] %vm79_vm2, %v146_v42 }
 0x228   :  { %v153_v44 = vld [vmem:[#allocation2] sm:$0xff] }
 0x229   :  { %155 = vst.msk [vmem:[%s253_s4] sm:$0xff] %vm79_vm2, %v153_v44 }
 0x22a   :  { %v154_v45 = vld [vmem:[#allocation2 + $0x8] sm:$0xff] }
 0x22b   :  { %156 = vst.msk [vmem:[%s253_s4 + $0x8] sm:$0xff] %vm79_vm2, %v154_v45 }

</bundles_post_ra>
